<compile_context>
chip_gen: v7x
topology: tpu7x:2x2x1
jax: 0.10.0
libtpu: 0.0.40
codegen_flags: <defaults>
</compile_context>

<pallas_src>
import functools

import jax
import jax.numpy as jnp
from jax import lax
from jax.experimental import pallas as pl
from jax.experimental.pallas import tpu as pltpu


def make_divisible(v, divisor=8, min_value=None):
    min_value = min_value or divisor
    new_v = max(min_value, int(v + divisor / 2) // divisor * divisor)
    if new_v < 0.9 * v:
        new_v += divisor
    return new_v


def _rup(v, m):
    return (v + m - 1) // m * m


def _ir_kernel(x_hbm, w1_ref, wdw_ref, w3_ref, b1_ref, b2_ref, b3_ref, o_ref,
               xbuf, sem, *, tile_h, H, W, c_out):
    """One (batch, row-block) step of the fused InvertedResidual forward."""
    TH = tile_h
    HP = TH + 2                                 # 1 halo row each side
    n = pl.program_id(0)
    hb = pl.program_id(1)
    n_hb = pl.num_programs(1)
    slot = hb % 2

    # ---- manual double-buffered input DMA (no materialized halo slab) ----------
    def start_fetch(row_block, slot_idx):
        pltpu.make_async_copy(
            x_hbm.at[n, pl.ds(row_block * TH, HP)],
            xbuf.at[slot_idx],
            sem.at[slot_idx],
        ).start()

    @pl.when(hb == 0)
    def _():                                    # prime the first tile of this image
        start_fetch(0, 0)

    pltpu.make_async_copy(                      # wait for the current window
        x_hbm.at[n, pl.ds(hb * TH, HP)],
        xbuf.at[slot],
        sem.at[slot],
    ).wait()

    @pl.when(hb + 1 < n_hb)
    def _():                                    # prefetch next row block of this image
        start_fetch(hb + 1, 1 - slot)

    x = xbuf[slot]                              # (HP, WP, Cin_p) bf16, zero-padded frame
    _, WP, Cin = x.shape
    Cm = w1_ref.shape[1]

    # ---- 1x1 expand conv (BN1 scale folded into w1) + bias + ReLU --------------
    # Recomputed on the 2 halo rows; bf16 operands, f32 accumulation on the MXU.
    # (The WP-W-2 padded columns ride along: trimming them would need a
    #  non-8-aligned sublane merge, which costs more than the spare MXU rows.)
    xf = x.reshape(HP * WP, Cin)
    h1 = jnp.dot(xf, w1_ref[...], preferred_element_type=jnp.float32)
    h1 = jnp.maximum(h1 + b1_ref[...], 0.0).reshape(HP, WP, Cm)

    # Out-of-image rows/cols carry relu(b1) (bias applied to the zero frame); the
    # 3x3 depthwise SAME padding must see zeros there -> mask them out.
    row = hb * TH + lax.broadcasted_iota(jnp.int32, (HP, WP, 1), 0)
    col = lax.broadcasted_iota(jnp.int32, (HP, WP, 1), 1)
    valid = (row >= 1) & (row <= H) & (col >= 1) & (col <= W)
    h1 = jnp.where(valid, h1, 0.0)

    # ---- 3x3 depthwise conv, stride 1, SAME (BN2 scale folded), f32 VPU math ----
    wdw = wdw_ref[...]                          # (3, 3, Cm)
    h1c = [h1[:, dx:dx + W, :] for dx in range(3)]   # hoisted W-shifted views
    acc = h1c[0][0:TH] * wdw[0, 0]              # first tap initializes the accumulator
    for dy in range(3):
        for dx in range(3):
            if dy == 0 and dx == 0:
                continue
            acc = acc + h1c[dx][dy:dy + TH] * wdw[dy, dx]
    h2 = jnp.maximum(acc + b2_ref[...], 0.0)

    # ---- SE: Identity (default se_layer=None / se_ratio=0.0) --------------------

    # ---- 1x1 project conv (BN3 scale folded into w3) + bias ---------------------
    h2f = h2.reshape(TH * W, Cm).astype(jnp.bfloat16)
    h3 = jnp.dot(h2f, w3_ref[...], preferred_element_type=jnp.float32) + b3_ref[...]

    # ---- residual (in_chs == out_chs, stride == 1, drop_path_rate == 0) ---------
    xc = x[1:TH + 1, 1:W + 1, :].astype(jnp.float32).reshape(TH * W, Cin)
    y = (h3 + xc)[:, :c_out]                    # drop lane padding before the store
    o_ref[...] = y.reshape(TH, W, c_out).astype(o_ref.dtype)


def _auto_tile_h(H, W, cin_p, cmid_p, cout, *, max_tile=64, budget=10 * 2**20):
    """Largest divisor of H (<= max_tile) whose per-step working set fits budget."""
    WP = _rup(W + 2, 8)
    best = 1
    for th in range(1, min(H, max_tile) + 1):
        if H % th:
            continue
        HP = th + 2
        need = (2 * HP * WP * cin_p * 2              # double-buffered bf16 x window
                + HP * WP * cmid_p * 4               # h1 (f32)
                + 2 * th * W * cmid_p * 4            # depthwise acc + h2 (f32)
                + 2 * th * W * _rup(cout, 128) * 4)  # pipelined output blocks
        if need <= budget:
            best = th
    return best


def inverted_residual_nhwc(x_nhwc, params, *, tile_h=None):
    """x_nhwc: (N, H, W, C_in) float32. Returns (N, H, W, C_out) float32."""
    N, H, W, C_in = x_nhwc.shape
    w1, wdw, w3 = params['w1'], params['wdw'], params['w3']
    C_mid, C_out = w1.shape[1], w3.shape[1]

    # Default InvertedResidual config: stride=1, dilation=1, 3x3 dw, residual on.
    assert C_in == C_out, "residual path requires in_chs == out_chs (stride=1, not noskip)"
    assert W % 8 == 0, "this kernel keeps reshapes sublane-aligned (W % 8 == 0)"

    LANE = 128
    Cin_p, Cmid_p, Cout_p = _rup(C_in, LANE), _rup(C_mid, LANE), _rup(C_out, LANE)
    assert Cin_p == Cout_p
    WP = _rup(W + 2, 8)               # >= 1 halo column each side, sublane-aligned
    pad_l, pad_r = 1, WP - W - 1

    if tile_h is None:
        tile_h = _auto_tile_h(H, W, Cin_p, Cmid_p, C_out)
    assert H % tile_h == 0, "H must be divisible by tile_h"
    n_hb = H // tile_h

    f32, bf16 = jnp.float32, jnp.bfloat16

    # Fold eval-mode BN scales into the conv weights; zero-pad to lane width.
    w1p = jnp.zeros((Cin_p, Cmid_p), bf16).at[:C_in, :C_mid].set(
        (w1 * params['s1'][None, :]).astype(bf16))
    wdwp = jnp.zeros((3, 3, Cmid_p), f32).at[:, :, :C_mid].set(
        wdw * params['s2'][None, None, :])
    w3p = jnp.zeros((Cmid_p, Cout_p), bf16).at[:C_mid, :C_out].set(
        (w3 * params['s3'][None, :]).astype(bf16))
    b1p = jnp.zeros((1, Cmid_p), f32).at[0, :C_mid].set(params['b1'])
    b2p = jnp.zeros((1, Cmid_p), f32).at[0, :C_mid].set(params['b2'])
    b3p = jnp.zeros((1, Cout_p), f32).at[0, :C_out].set(params['b3'])

    # Single bf16 zero-padded frame in HBM; the kernel DMAs overlapping
    # (tile_h + 2)-row windows straight out of it (no slab copy through HBM).
    x_pad = jnp.pad(x_nhwc.astype(bf16),
                    ((0, 0), (1, 1), (pad_l, pad_r), (0, Cin_p - C_in)))

    kernel = functools.partial(_ir_kernel, tile_h=tile_h, H=H, W=W, c_out=C_out)

    def fixed(shape):   # weights/biases: constant block index -> VMEM-resident
        return pl.BlockSpec(shape, lambda n, hb: (0,) * len(shape))

    out = pl.pallas_call(
        kernel,
        out_shape=jax.ShapeDtypeStruct((N, H, W, C_out), f32),
        grid_spec=pltpu.PrefetchScalarGridSpec(
            num_scalar_prefetch=0,
            grid=(N, n_hb),
            in_specs=[
                pl.BlockSpec(memory_space=pl.ANY),   # x_pad stays in HBM; manual DMA
                fixed((Cin_p, Cmid_p)),              # w1 (expand, BN1-folded, bf16)
                fixed((3, 3, Cmid_p)),               # depthwise weights (BN2-folded)
                fixed((Cmid_p, Cout_p)),             # w3 (project, BN3-folded, bf16)
                fixed((1, Cmid_p)),                  # b1
                fixed((1, Cmid_p)),                  # b2
                fixed((1, Cout_p)),                  # b3
            ],
            out_specs=pl.BlockSpec((None, tile_h, W, C_out),
                                   lambda n, hb: (n, hb, 0, 0)),
            scratch_shapes=[
                pltpu.VMEM((2, tile_h + 2, WP, Cin_p), bf16),  # double-buffered window
                pltpu.SemaphoreType.DMA((2,)),
            ],
        ),
        compiler_params=pltpu.CompilerParams(
            # Batch axis may be split across v7x's two TensorCores; the row-block
            # axis must run in order for the manual prefetch chain.
            dimension_semantics=("parallel", "arbitrary"),
            # _auto_tile_h keeps the working set <= ~10 MiB, so 32 MiB is safe on
            # v5e/v6e (128 MiB VMEM) and within v7x's 64 MiB physical VMEM.
            vmem_limit_bytes=32 * 1024 * 1024,
        ),
    )(x_pad, w1p, wdwp, w3p, b1p, b2p, b3p)
    return out


def inverted_residual(x_nchw, params, *, tile_h=None):
    """PyTorch-layout entry point: (N, C, H, W) float32 -> (N, C, H, W) float32."""
    # TODO(synk): NHWC callers should use inverted_residual_nhwc directly and skip
    #             these two layout transposes (each is an extra HBM round trip).
    x_nhwc = jnp.transpose(x_nchw, (0, 2, 3, 1))
    out = inverted_residual_nhwc(x_nhwc, params, tile_h=tile_h)
    return jnp.transpose(out, (0, 3, 1, 2))


def reference_forward(x_nchw, params):
    """Pure-JAX f32 reference of the same forward pass (NHWC internally)."""
    x = jnp.transpose(x_nchw, (0, 2, 3, 1)).astype(jnp.float32)
    C_mid = params['w1'].shape[1]
    h = jnp.einsum('nhwc,cm->nhwm', x, params['w1'])
    h = jnp.maximum(h * params['s1'] + params['b1'], 0.0)
    dw = params['wdw'].reshape(3, 3, 1, C_mid)
    h = lax.conv_general_dilated(
        h, dw, window_strides=(1, 1), padding='SAME',
        dimension_numbers=('NHWC', 'HWIO', 'NHWC'),
        feature_group_count=C_mid)
    h = jnp.maximum(h * params['s2'] + params['b2'], 0.0)
    h = jnp.einsum('nhwm,mo->nhwo', h, params['w3'])
    h = h * params['s3'] + params['b3']
    h = h + x
    return jnp.transpose(h, (0, 3, 1, 2))


def init_params(key, in_chs, out_chs, exp_ratio):
    mid_chs = make_divisible(in_chs * exp_ratio)
    ks = jax.random.split(key, 6)
    eps = 1e-5

    def bn_fold(k, c):
        kg, kb, km, kv = jax.random.split(k, 4)
        gamma = 1.0 + 0.1 * jax.random.normal(kg, (c,), jnp.float32)
        beta = 0.05 * jax.random.normal(kb, (c,), jnp.float32)
        mean = 0.02 * jax.random.normal(km, (c,), jnp.float32)
        var = 1.0 + 0.1 * jax.random.uniform(kv, (c,), jnp.float32)
        scale = gamma / jnp.sqrt(var + eps)
        bias = beta - mean * scale
        return scale, bias

    # conv weights (bias-free, as each is immediately followed by BN)
    w1 = 0.1 * jax.random.normal(ks[0], (in_chs, mid_chs), jnp.float32)
    wdw = 0.1 * jax.random.normal(ks[1], (3, 3, mid_chs), jnp.float32)
    w3 = 0.1 * jax.random.normal(ks[2], (mid_chs, out_chs), jnp.float32)
    s1, b1 = bn_fold(ks[3], mid_chs)
    s2, b2 = bn_fold(ks[4], mid_chs)
    s3, b3 = bn_fold(ks[5], out_chs)
    return dict(w1=w1, wdw=wdw, w3=w3, s1=s1, b1=b1, s2=s2, b2=b2, s3=s3, b3=b3)


if __name__ == "__main__":
    key = jax.random.PRNGKey(0)
    k_x, k_p = jax.random.split(key)

    N, C_in, H, W = 2, 8, 16, 16
    out_chs, exp_ratio = 8, 4.0      # mid_chs = make_divisible(32) = 32

    x = jax.random.normal(k_x, (N, C_in, H, W), jnp.float32)
    params = init_params(k_p, C_in, out_chs, exp_ratio)

    fwd = jax.jit(lambda xx: inverted_residual(xx, params))
    out = jax.block_until_ready(fwd(x))

    ref = jax.block_until_ready(reference_forward(x, params))
    assert out.shape == (N, out_chs, H, W)
    max_err = jnp.max(jnp.abs(out - ref))
    # bf16 input + bf16 MXU matmuls vs. f32 reference -> ~1e-3 level differences.
    assert jnp.allclose(out, ref, atol=2e-2, rtol=2e-2), f"max err {max_err}"

    print("KERNEL_OK")
</pallas_src>

<mosaic_0001>
module attributes {stable_mosaic.version = 11 : i64} {
  func.func @_ir_kernel(%arg0: i32, %arg1: i32, %arg2: memref<2x18x24x128xbf16, #tpu.memory_space<any>>, %arg3: memref<128x128xbf16, #tpu.memory_space<vmem>>, %arg4: memref<3x3x128xf32, #tpu.memory_space<vmem>>, %arg5: memref<128x128xbf16, #tpu.memory_space<vmem>>, %arg6: memref<1x128xf32, #tpu.memory_space<vmem>>, %arg7: memref<1x128xf32, #tpu.memory_space<vmem>>, %arg8: memref<1x128xf32, #tpu.memory_space<vmem>>, %arg9: memref<1x16x16x8xf32, #tpu.memory_space<vmem>>, %arg10: memref<2x18x24x128xbf16, #tpu.memory_space<vmem>>, %arg11: memref<2x!tpu.dma_semaphore, #tpu.memory_space<semaphore_mem>>) attributes {dimension_semantics = [#tpu.dimension_semantics<parallel>, #tpu.dimension_semantics<arbitrary>], iteration_bounds = array<i64: 2, 1>, scalar_prefetch = 0 : i64, scratch_operands = 2 : i64, tpu.core_type = #tpu.core_type<tc>, window_params = [{}, {pipeline_mode = #tpu.pipeline_mode<synchronous>, transform_indices = @transform_1, window_bounds = array<i64: 128, 128>}, {pipeline_mode = #tpu.pipeline_mode<synchronous>, transform_indices = @transform_2, window_bounds = array<i64: 3, 3, 128>}, {pipeline_mode = #tpu.pipeline_mode<synchronous>, transform_indices = @transform_3, window_bounds = array<i64: 128, 128>}, {pipeline_mode = #tpu.pipeline_mode<synchronous>, transform_indices = @transform_4, window_bounds = array<i64: 1, 128>}, {pipeline_mode = #tpu.pipeline_mode<synchronous>, transform_indices = @transform_5, window_bounds = array<i64: 1, 128>}, {pipeline_mode = #tpu.pipeline_mode<synchronous>, transform_indices = @transform_6, window_bounds = array<i64: 1, 128>}, {transform_indices = @transform_7, window_bounds = array<i64: 1, 16, 16, 8>}]} {
    %c2_i32 = arith.constant 2 : i32
    %c0_i32 = arith.constant 0 : i32
    %0 = arith.cmpi eq, %c2_i32, %c0_i32 : i32
    %c1_i32 = arith.constant 1 : i32
    %1 = arith.select %0, %c1_i32, %c2_i32 : i32
    %2 = arith.remsi %arg1, %1 : i32
    %c0_i32_0 = arith.constant 0 : i32
    %3 = arith.cmpi ne, %2, %c0_i32_0 : i32
    %c0_i32_1 = arith.constant 0 : i32
    %4 = arith.cmpi slt, %2, %c0_i32_1 : i32
    %c0_i32_2 = arith.constant 0 : i32
    %5 = arith.cmpi slt, %1, %c0_i32_2 : i32
    %6 = arith.xori %4, %5 : i1
    %7 = arith.andi %6, %3 : i1
    %8 = arith.addi %2, %1 : i32
    %9 = arith.select %7, %8, %2 : i32
    %c0_i32_3 = arith.constant 0 : i32
    %10 = arith.cmpi eq, %arg1, %c0_i32_3 : i32
    %11 = arith.extui %10 : i1 to i32
    %c0_i32_4 = arith.constant 0 : i32
    %12 = arith.cmpi ne, %11, %c0_i32_4 : i32
    scf.if %12 {
      %c0_i32_41 = arith.constant 0 : i32
      %c0_i32_42 = arith.constant 0 : i32
      %c0_i32_43 = arith.constant 0 : i32
      %c0_i32_44 = arith.constant 0 : i32
      %c0_i32_45 = arith.constant 0 : i32
      %144 = tpu.memref_slice %arg2[%arg0, %c0_i32_43, %c0_i32_44, %c0_i32_45] : memref<2x18x24x128xbf16, #tpu.memory_space<any>> -> memref<1x18x24x128xbf16, #tpu.memory_space<any>>
      %145 = tpu.memref_squeeze %144 : memref<1x18x24x128xbf16, #tpu.memory_space<any>> -> memref<18x24x128xbf16, #tpu.memory_space<any>>
      %c0_i32_46 = arith.constant 0 : i32
      %c0_i32_47 = arith.constant 0 : i32
      %c0_i32_48 = arith.constant 0 : i32
      %146 = tpu.memref_slice %arg10[%c0_i32_41, %c0_i32_46, %c0_i32_47, %c0_i32_48] : memref<2x18x24x128xbf16, #tpu.memory_space<vmem>> -> memref<1x18x24x128xbf16, #tpu.memory_space<vmem>>
      %147 = tpu.memref_squeeze %146 : memref<1x18x24x128xbf16, #tpu.memory_space<vmem>> -> memref<18x24x128xbf16, #tpu.memory_space<vmem>>
      %148 = tpu.memref_slice %arg11[%c0_i32_42] : memref<2x!tpu.dma_semaphore, #tpu.memory_space<semaphore_mem>> -> memref<1x!tpu.dma_semaphore, #tpu.memory_space<semaphore_mem>>
      %149 = tpu.memref_squeeze %148 : memref<1x!tpu.dma_semaphore, #tpu.memory_space<semaphore_mem>> -> memref<!tpu.dma_semaphore, #tpu.memory_space<semaphore_mem>>
      tpu.enqueue_dma source(%145 : memref<18x24x128xbf16, #tpu.memory_space<any>>) target(%147 : memref<18x24x128xbf16, #tpu.memory_space<vmem>>) target_semaphore(%149 : memref<!tpu.dma_semaphore, #tpu.memory_space<semaphore_mem>>)
    } else {
    }
    %c16_i32 = arith.constant 16 : i32
    %13 = arith.muli %arg1, %c16_i32 : i32
    %c0_i32_5 = arith.constant 0 : i32
    %c0_i32_6 = arith.constant 0 : i32
    %14 = tpu.memref_slice %arg2[%arg0, %13, %c0_i32_5, %c0_i32_6] : memref<2x18x24x128xbf16, #tpu.memory_space<any>> -> memref<1x18x24x128xbf16, #tpu.memory_space<any>>
    %15 = tpu.memref_squeeze %14 : memref<1x18x24x128xbf16, #tpu.memory_space<any>> -> memref<18x24x128xbf16, #tpu.memory_space<any>>
    %c0_i32_7 = arith.constant 0 : i32
    %c0_i32_8 = arith.constant 0 : i32
    %c0_i32_9 = arith.constant 0 : i32
    %16 = tpu.memref_slice %arg10[%9, %c0_i32_7, %c0_i32_8, %c0_i32_9] : memref<2x18x24x128xbf16, #tpu.memory_space<vmem>> -> memref<1x18x24x128xbf16, #tpu.memory_space<vmem>>
    %17 = tpu.memref_squeeze %16 : memref<1x18x24x128xbf16, #tpu.memory_space<vmem>> -> memref<18x24x128xbf16, #tpu.memory_space<vmem>>
    %18 = tpu.memref_slice %arg11[%9] : memref<2x!tpu.dma_semaphore, #tpu.memory_space<semaphore_mem>> -> memref<1x!tpu.dma_semaphore, #tpu.memory_space<semaphore_mem>>
    %19 = tpu.memref_squeeze %18 : memref<1x!tpu.dma_semaphore, #tpu.memory_space<semaphore_mem>> -> memref<!tpu.dma_semaphore, #tpu.memory_space<semaphore_mem>>
    tpu.wait_dma2 semaphore(%19 : memref<!tpu.dma_semaphore, #tpu.memory_space<semaphore_mem>>) src(%15 : memref<18x24x128xbf16, #tpu.memory_space<any>>) dst(%17 : memref<18x24x128xbf16, #tpu.memory_space<vmem>>)
    %c1_i32_10 = arith.constant 1 : i32
    %20 = arith.addi %arg1, %c1_i32_10 : i32
    %c1_i32_11 = arith.constant 1 : i32
    %21 = arith.cmpi slt, %20, %c1_i32_11 : i32
    %22 = arith.extui %21 : i1 to i32
    %c0_i32_12 = arith.constant 0 : i32
    %23 = arith.cmpi ne, %22, %c0_i32_12 : i32
    scf.if %23 {
      %c1_i32_41 = arith.constant 1 : i32
      %144 = arith.addi %arg1, %c1_i32_41 : i32
      %c1_i32_42 = arith.constant 1 : i32
      %145 = arith.subi %c1_i32_42, %9 : i32
      %c16_i32_43 = arith.constant 16 : i32
      %146 = arith.muli %144, %c16_i32_43 : i32
      %c0_i32_44 = arith.constant 0 : i32
      %c0_i32_45 = arith.constant 0 : i32
      %147 = tpu.memref_slice %arg2[%arg0, %146, %c0_i32_44, %c0_i32_45] : memref<2x18x24x128xbf16, #tpu.memory_space<any>> -> memref<1x18x24x128xbf16, #tpu.memory_space<any>>
      %148 = tpu.memref_squeeze %147 : memref<1x18x24x128xbf16, #tpu.memory_space<any>> -> memref<18x24x128xbf16, #tpu.memory_space<any>>
      %c0_i32_46 = arith.constant 0 : i32
      %c0_i32_47 = arith.constant 0 : i32
      %c0_i32_48 = arith.constant 0 : i32
      %149 = tpu.memref_slice %arg10[%145, %c0_i32_46, %c0_i32_47, %c0_i32_48] : memref<2x18x24x128xbf16, #tpu.memory_space<vmem>> -> memref<1x18x24x128xbf16, #tpu.memory_space<vmem>>
      %150 = tpu.memref_squeeze %149 : memref<1x18x24x128xbf16, #tpu.memory_space<vmem>> -> memref<18x24x128xbf16, #tpu.memory_space<vmem>>
      %151 = tpu.memref_slice %arg11[%145] : memref<2x!tpu.dma_semaphore, #tpu.memory_space<semaphore_mem>> -> memref<1x!tpu.dma_semaphore, #tpu.memory_space<semaphore_mem>>
      %152 = tpu.memref_squeeze %151 : memref<1x!tpu.dma_semaphore, #tpu.memory_space<semaphore_mem>> -> memref<!tpu.dma_semaphore, #tpu.memory_space<semaphore_mem>>
      tpu.enqueue_dma source(%148 : memref<18x24x128xbf16, #tpu.memory_space<any>>) target(%150 : memref<18x24x128xbf16, #tpu.memory_space<vmem>>) target_semaphore(%152 : memref<!tpu.dma_semaphore, #tpu.memory_space<semaphore_mem>>)
    } else {
    }
    %24 = arith.index_cast %9 : i32 to index
    %c0 = arith.constant 0 : index
    %c0_13 = arith.constant 0 : index
    %c0_14 = arith.constant 0 : index
    %25 = vector.load %arg10[%24, %c0, %c0_13, %c0_14] : memref<2x18x24x128xbf16, #tpu.memory_space<vmem>>, vector<1x18x24x128xbf16>
    %26 = vector.shape_cast %25 : vector<1x18x24x128xbf16> to vector<18x24x128xbf16>
    %27 = vector.shape_cast %26 : vector<18x24x128xbf16> to vector<432x128xbf16>
    %c0_15 = arith.constant 0 : index
    %c0_16 = arith.constant 0 : index
    %28 = vector.load %arg3[%c0_15, %c0_16] : memref<128x128xbf16, #tpu.memory_space<vmem>>, vector<128x128xbf16>
    %cst = arith.constant dense<0.000000e+00> : vector<432x128xf32>
    %29 = tpu.matmul %27, %28, %cst {dimension_numbers = #tpu.dot_dimension_numbers<[1], [0], [0], [1], [0, 0, 1, 1], [], []>} : vector<432x128xbf16>, vector<128x128xbf16>, vector<432x128xf32> -> vector<432x128xf32>
    %c0_17 = arith.constant 0 : index
    %c0_18 = arith.constant 0 : index
    %30 = vector.load %arg6[%c0_17, %c0_18] : memref<1x128xf32, #tpu.memory_space<vmem>>, vector<1x128xf32>
    %31 = vector.broadcast %30 : vector<1x128xf32> to vector<432x128xf32>
    %32 = arith.addf %29, %31 : vector<432x128xf32>
    %cst_19 = arith.constant 0.000000e+00 : f32
    %33 = vector.broadcast %cst_19 : f32 to vector<432x128xf32>
    %34 = arith.maximumf %32, %33 : vector<432x128xf32>
    %35 = vector.shape_cast %34 : vector<432x128xf32> to vector<18x24x128xf32>
    %c16_i32_20 = arith.constant 16 : i32
    %36 = arith.muli %arg1, %c16_i32_20 : i32
    %37 = tpu.iota {dimensions = array<i32: 0>} : vector<18x24x1xi32>
    %38 = vector.broadcast %36 : i32 to vector<18x24x1xi32>
    %39 = arith.addi %38, %37 : vector<18x24x1xi32>
    %40 = tpu.iota {dimensions = array<i32: 1>} : vector<18x24x1xi32>
    %c1_i32_21 = arith.constant 1 : i32
    %41 = vector.broadcast %c1_i32_21 : i32 to vector<18x24x1xi32>
    %42 = arith.cmpi sge, %39, %41 : vector<18x24x1xi32>
    %c16_i32_22 = arith.constant 16 : i32
    %43 = vector.broadcast %c16_i32_22 : i32 to vector<18x24x1xi32>
    %44 = arith.cmpi sle, %39, %43 : vector<18x24x1xi32>
    %45 = arith.andi %42, %44 : vector<18x24x1xi1>
    %c1_i32_23 = arith.constant 1 : i32
    %46 = vector.broadcast %c1_i32_23 : i32 to vector<18x24x1xi32>
    %47 = arith.cmpi sge, %40, %46 : vector<18x24x1xi32>
    %48 = arith.andi %45, %47 : vector<18x24x1xi1>
    %c16_i32_24 = arith.constant 16 : i32
    %49 = vector.broadcast %c16_i32_24 : i32 to vector<18x24x1xi32>
    %50 = arith.cmpi sle, %40, %49 : vector<18x24x1xi32>
    %51 = arith.andi %48, %50 : vector<18x24x1xi1>
    %cst_25 = arith.constant 0.000000e+00 : f32
    %52 = vector.shape_cast %51 : vector<18x24x1xi1> to vector<18x24x1xi1>
    %53 = vector.broadcast %52 : vector<18x24x1xi1> to vector<18x24x128xi1>
    %54 = vector.broadcast %cst_25 : f32 to vector<18x24x128xf32>
    %55 = arith.select %53, %35, %54 : vector<18x24x128xi1>, vector<18x24x128xf32>
    %c0_26 = arith.constant 0 : index
    %c0_27 = arith.constant 0 : index
    %c0_28 = arith.constant 0 : index
    %56 = vector.load %arg4[%c0_26, %c0_27, %c0_28] : memref<3x3x128xf32, #tpu.memory_space<vmem>>, vector<3x3x128xf32>
    %57 = vector.extract_strided_slice %55 {offsets = [0, 0, 0], sizes = [18, 16, 128], strides = [1, 1, 1]} : vector<18x24x128xf32> to vector<18x16x128xf32>
    %58 = vector.extract_strided_slice %55 {offsets = [0, 1, 0], sizes = [18, 16, 128], strides = [1, 1, 1]} : vector<18x24x128xf32> to vector<18x16x128xf32>
    %59 = vector.extract_strided_slice %55 {offsets = [0, 2, 0], sizes = [18, 16, 128], strides = [1, 1, 1]} : vector<18x24x128xf32> to vector<18x16x128xf32>
    %60 = vector.extract_strided_slice %57 {offsets = [0, 0, 0], sizes = [16, 16, 128], strides = [1, 1, 1]} : vector<18x16x128xf32> to vector<16x16x128xf32>
    %61 = vector.extract_strided_slice %56 {offsets = [0, 0, 0], sizes = [1, 1, 128], strides = [1, 1, 1]} : vector<3x3x128xf32> to vector<1x1x128xf32>
    %62 = vector.shape_cast %61 : vector<1x1x128xf32> to vector<128xf32>
    %63 = vector.shape_cast %62 : vector<128xf32> to vector<1x1x128xf32>
    %64 = vector.broadcast %63 : vector<1x1x128xf32> to vector<16x16x128xf32>
    %65 = arith.mulf %60, %64 : vector<16x16x128xf32>
    %66 = vector.extract_strided_slice %58 {offsets = [0, 0, 0], sizes = [16, 16, 128], strides = [1, 1, 1]} : vector<18x16x128xf32> to vector<16x16x128xf32>
    %67 = vector.extract_strided_slice %56 {offsets = [0, 1, 0], sizes = [1, 1, 128], strides = [1, 1, 1]} : vector<3x3x128xf32> to vector<1x1x128xf32>
    %68 = vector.shape_cast %67 : vector<1x1x128xf32> to vector<128xf32>
    %69 = vector.shape_cast %68 : vector<128xf32> to vector<1x1x128xf32>
    %70 = vector.broadcast %69 : vector<1x1x128xf32> to vector<16x16x128xf32>
    %71 = arith.mulf %66, %70 : vector<16x16x128xf32>
    %72 = arith.addf %65, %71 : vector<16x16x128xf32>
    %73 = vector.extract_strided_slice %59 {offsets = [0, 0, 0], sizes = [16, 16, 128], strides = [1, 1, 1]} : vector<18x16x128xf32> to vector<16x16x128xf32>
    %74 = vector.extract_strided_slice %56 {offsets = [0, 2, 0], sizes = [1, 1, 128], strides = [1, 1, 1]} : vector<3x3x128xf32> to vector<1x1x128xf32>
    %75 = vector.shape_cast %74 : vector<1x1x128xf32> to vector<128xf32>
    %76 = vector.shape_cast %75 : vector<128xf32> to vector<1x1x128xf32>
    %77 = vector.broadcast %76 : vector<1x1x128xf32> to vector<16x16x128xf32>
    %78 = arith.mulf %73, %77 : vector<16x16x128xf32>
    %79 = arith.addf %72, %78 : vector<16x16x128xf32>
    %80 = vector.extract_strided_slice %57 {offsets = [1, 0, 0], sizes = [16, 16, 128], strides = [1, 1, 1]} : vector<18x16x128xf32> to vector<16x16x128xf32>
    %81 = vector.extract_strided_slice %56 {offsets = [1, 0, 0], sizes = [1, 1, 128], strides = [1, 1, 1]} : vector<3x3x128xf32> to vector<1x1x128xf32>
    %82 = vector.shape_cast %81 : vector<1x1x128xf32> to vector<128xf32>
    %83 = vector.shape_cast %82 : vector<128xf32> to vector<1x1x128xf32>
    %84 = vector.broadcast %83 : vector<1x1x128xf32> to vector<16x16x128xf32>
    %85 = arith.mulf %80, %84 : vector<16x16x128xf32>
    %86 = arith.addf %79, %85 : vector<16x16x128xf32>
    %87 = vector.extract_strided_slice %58 {offsets = [1, 0, 0], sizes = [16, 16, 128], strides = [1, 1, 1]} : vector<18x16x128xf32> to vector<16x16x128xf32>
    %88 = vector.extract_strided_slice %56 {offsets = [1, 1, 0], sizes = [1, 1, 128], strides = [1, 1, 1]} : vector<3x3x128xf32> to vector<1x1x128xf32>
    %89 = vector.shape_cast %88 : vector<1x1x128xf32> to vector<128xf32>
    %90 = vector.shape_cast %89 : vector<128xf32> to vector<1x1x128xf32>
    %91 = vector.broadcast %90 : vector<1x1x128xf32> to vector<16x16x128xf32>
    %92 = arith.mulf %87, %91 : vector<16x16x128xf32>
    %93 = arith.addf %86, %92 : vector<16x16x128xf32>
    %94 = vector.extract_strided_slice %59 {offsets = [1, 0, 0], sizes = [16, 16, 128], strides = [1, 1, 1]} : vector<18x16x128xf32> to vector<16x16x128xf32>
    %95 = vector.extract_strided_slice %56 {offsets = [1, 2, 0], sizes = [1, 1, 128], strides = [1, 1, 1]} : vector<3x3x128xf32> to vector<1x1x128xf32>
    %96 = vector.shape_cast %95 : vector<1x1x128xf32> to vector<128xf32>
    %97 = vector.shape_cast %96 : vector<128xf32> to vector<1x1x128xf32>
    %98 = vector.broadcast %97 : vector<1x1x128xf32> to vector<16x16x128xf32>
    %99 = arith.mulf %94, %98 : vector<16x16x128xf32>
    %100 = arith.addf %93, %99 : vector<16x16x128xf32>
    %101 = vector.extract_strided_slice %57 {offsets = [2, 0, 0], sizes = [16, 16, 128], strides = [1, 1, 1]} : vector<18x16x128xf32> to vector<16x16x128xf32>
    %102 = vector.extract_strided_slice %56 {offsets = [2, 0, 0], sizes = [1, 1, 128], strides = [1, 1, 1]} : vector<3x3x128xf32> to vector<1x1x128xf32>
    %103 = vector.shape_cast %102 : vector<1x1x128xf32> to vector<128xf32>
    %104 = vector.shape_cast %103 : vector<128xf32> to vector<1x1x128xf32>
    %105 = vector.broadcast %104 : vector<1x1x128xf32> to vector<16x16x128xf32>
    %106 = arith.mulf %101, %105 : vector<16x16x128xf32>
    %107 = arith.addf %100, %106 : vector<16x16x128xf32>
    %108 = vector.extract_strided_slice %58 {offsets = [2, 0, 0], sizes = [16, 16, 128], strides = [1, 1, 1]} : vector<18x16x128xf32> to vector<16x16x128xf32>
    %109 = vector.extract_strided_slice %56 {offsets = [2, 1, 0], sizes = [1, 1, 128], strides = [1, 1, 1]} : vector<3x3x128xf32> to vector<1x1x128xf32>
    %110 = vector.shape_cast %109 : vector<1x1x128xf32> to vector<128xf32>
    %111 = vector.shape_cast %110 : vector<128xf32> to vector<1x1x128xf32>
    %112 = vector.broadcast %111 : vector<1x1x128xf32> to vector<16x16x128xf32>
    %113 = arith.mulf %108, %112 : vector<16x16x128xf32>
    %114 = arith.addf %107, %113 : vector<16x16x128xf32>
    %115 = vector.extract_strided_slice %59 {offsets = [2, 0, 0], sizes = [16, 16, 128], strides = [1, 1, 1]} : vector<18x16x128xf32> to vector<16x16x128xf32>
    %116 = vector.extract_strided_slice %56 {offsets = [2, 2, 0], sizes = [1, 1, 128], strides = [1, 1, 1]} : vector<3x3x128xf32> to vector<1x1x128xf32>
    %117 = vector.shape_cast %116 : vector<1x1x128xf32> to vector<128xf32>
    %118 = vector.shape_cast %117 : vector<128xf32> to vector<1x1x128xf32>
    %119 = vector.broadcast %118 : vector<1x1x128xf32> to vector<16x16x128xf32>
    %120 = arith.mulf %115, %119 : vector<16x16x128xf32>
    %121 = arith.addf %114, %120 : vector<16x16x128xf32>
    %c0_29 = arith.constant 0 : index
    %c0_30 = arith.constant 0 : index
    %122 = vector.load %arg7[%c0_29, %c0_30] : memref<1x128xf32, #tpu.memory_space<vmem>>, vector<1x128xf32>
    %123 = vector.shape_cast %122 : vector<1x128xf32> to vector<1x1x128xf32>
    %124 = vector.broadcast %123 : vector<1x1x128xf32> to vector<16x16x128xf32>
    %125 = arith.addf %121, %124 : vector<16x16x128xf32>
    %cst_31 = arith.constant 0.000000e+00 : f32
    %126 = vector.broadcast %cst_31 : f32 to vector<16x16x128xf32>
    %127 = arith.maximumf %125, %126 : vector<16x16x128xf32>
    %128 = vector.shape_cast %127 : vector<16x16x128xf32> to vector<256x128xf32>
    %129 = arith.truncf %128 : vector<256x128xf32> to vector<256x128xbf16>
    %c0_32 = arith.constant 0 : index
    %c0_33 = arith.constant 0 : index
    %130 = vector.load %arg5[%c0_32, %c0_33] : memref<128x128xbf16, #tpu.memory_space<vmem>>, vector<128x128xbf16>
    %cst_34 = arith.constant dense<0.000000e+00> : vector<256x128xf32>
    %131 = tpu.matmul %129, %130, %cst_34 {dimension_numbers = #tpu.dot_dimension_numbers<[1], [0], [0], [1], [0, 0, 1, 1], [], []>} : vector<256x128xbf16>, vector<128x128xbf16>, vector<256x128xf32> -> vector<256x128xf32>
    %c0_35 = arith.constant 0 : index
    %c0_36 = arith.constant 0 : index
    %132 = vector.load %arg8[%c0_35, %c0_36] : memref<1x128xf32, #tpu.memory_space<vmem>>, vector<1x128xf32>
    %133 = vector.broadcast %132 : vector<1x128xf32> to vector<256x128xf32>
    %134 = arith.addf %131, %133 : vector<256x128xf32>
    %135 = vector.extract_strided_slice %26 {offsets = [1, 1, 0], sizes = [16, 16, 128], strides = [1, 1, 1]} : vector<18x24x128xbf16> to vector<16x16x128xbf16>
    %136 = arith.extf %135 : vector<16x16x128xbf16> to vector<16x16x128xf32>
    %137 = vector.shape_cast %136 : vector<16x16x128xf32> to vector<256x128xf32>
    %138 = arith.addf %134, %137 : vector<256x128xf32>
    %139 = vector.extract_strided_slice %138 {offsets = [0, 0], sizes = [256, 8], strides = [1, 1]} : vector<256x128xf32> to vector<256x8xf32>
    %140 = vector.shape_cast %139 : vector<256x8xf32> to vector<16x16x8xf32>
    %c0_37 = arith.constant 0 : index
    %c0_38 = arith.constant 0 : index
    %c0_39 = arith.constant 0 : index
    %c0_40 = arith.constant 0 : index
    %141 = vector.load %arg9[%c0_37, %c0_38, %c0_39, %c0_40] : memref<1x16x16x8xf32, #tpu.memory_space<vmem>>, vector<1x16x16x8xf32>
    %142 = vector.shape_cast %141 : vector<1x16x16x8xf32> to vector<16x16x8xf32>
    %143 = vector.shape_cast %140 : vector<16x16x8xf32> to vector<1x16x16x8xf32>
    tpu.vector_store %arg9[%c0_37, %c0_38, %c0_39, %c0_40], %143 {strides = array<i32>} : memref<1x16x16x8xf32, #tpu.memory_space<vmem>>, vector<1x16x16x8xf32>,
    return
  }
  func.func @transform_1(%arg0: i32, %arg1: i32) -> (i32, i32) {
    %c0_i32 = arith.constant 0 : i32
    %c0_i32_0 = arith.constant 0 : i32
    %c0_i32_1 = arith.constant 0 : i32
    return %c0_i32, %c0_i32_0 : i32, i32
  }
  func.func @transform_2(%arg0: i32, %arg1: i32) -> (i32, i32, i32) {
    %c0_i32 = arith.constant 0 : i32
    %c0_i32_0 = arith.constant 0 : i32
    %c0_i32_1 = arith.constant 0 : i32
    %c0_i32_2 = arith.constant 0 : i32
    return %c0_i32, %c0_i32_0, %c0_i32_1 : i32, i32, i32
  }
  func.func @transform_3(%arg0: i32, %arg1: i32) -> (i32, i32) {
    %c0_i32 = arith.constant 0 : i32
    %c0_i32_0 = arith.constant 0 : i32
    %c0_i32_1 = arith.constant 0 : i32
    return %c0_i32, %c0_i32_0 : i32, i32
  }
  func.func @transform_4(%arg0: i32, %arg1: i32) -> (i32, i32) {
    %c0_i32 = arith.constant 0 : i32
    %c0_i32_0 = arith.constant 0 : i32
    %c0_i32_1 = arith.constant 0 : i32
    return %c0_i32, %c0_i32_0 : i32, i32
  }
  func.func @transform_5(%arg0: i32, %arg1: i32) -> (i32, i32) {
    %c0_i32 = arith.constant 0 : i32
    %c0_i32_0 = arith.constant 0 : i32
    %c0_i32_1 = arith.constant 0 : i32
    return %c0_i32, %c0_i32_0 : i32, i32
  }
  func.func @transform_6(%arg0: i32, %arg1: i32) -> (i32, i32) {
    %c0_i32 = arith.constant 0 : i32
    %c0_i32_0 = arith.constant 0 : i32
    %c0_i32_1 = arith.constant 0 : i32
    return %c0_i32, %c0_i32_0 : i32, i32
  }
  func.func @transform_7(%arg0: i32, %arg1: i32) -> (i32, i32, i32, i32) {
    %c0_i32 = arith.constant 0 : i32
    %c0_i32_0 = arith.constant 0 : i32
    %c0_i32_1 = arith.constant 0 : i32
    return %arg0, %arg1, %c0_i32, %c0_i32_0 : i32, i32, i32, i32
  }
}

</mosaic_0001>

<bundles_post_ra>
// kernel: _lambda_.1
= control target key start
LH: loop header
LB: loop body
LE: loop exit
PB: predicated region body
PF: predicated region fallthrough
CT: control target
= control target key end

     0   :  { %s4331_s24 = smov 0   ;;  %s4333_s25 = smov 0   ;;  %s6927_s0 = inlined_call_operand.vmem [shape: bf16[2,18,24,128], index: 0, kind: input, shape index: {}]   ;;  %s6928_s1 = inlined_call_operand.vmem [shape: bf16[128,128], index: 1, kind: input, shape index: {}]   ;;  %s6929_s2 = inlined_call_operand.vmem [shape: f32[3,3,128], index: 2, kind: input, shape index: {}]   ;;  %s6930_s3 = inlined_call_operand.vmem [shape: bf16[128,128], index: 3, kind: input, shape index: {}]   ;;  %s6931_s4 = inlined_call_operand.vmem [shape: f32[1,128], index: 4, kind: input, shape index: {}]   ;;  %s6932_s5 = inlined_call_operand.vmem [shape: f32[1,128], index: 5, kind: input, shape index: {}]   ;;  %s6933_s6 = inlined_call_operand.vmem [shape: f32[1,128], index: 6, kind: input, shape index: {}]   ;;  %s6934_s7 = inlined_call_operand.vmem [shape: f32[2,16,16,8], index: 7, kind: output, shape index: {}]  }
   0x1   :  { %s4335_s26 = smov 0  }
   0x2 LB: > { %s29_s27 = sadd.s32 1, %s4283_s25  ;;  %p3788_p0 = scmp.ge.s32.totalorder %s4287_s26, 1  ;;  %s4287_s26 = sphi %s4335_s26, %s17_s26   ;;  %s4283_s25 = sphi %s4333_s25, %s7443_s25   ;;  %s4279_s24 = sphi %s4331_s24, %s7442_s24  }
   0x3   : > { %p31_p1 = scmp.ge.s32.totalorder %s29_s27, 2  ;;  %p217_p2 = scmp.lt.s32.totalorder %s4287_s26, 3 }
   0x5   : > { %s7445_s27 = smov (%p31_p1, %s29_s27), 0  ;;  %p218_p3 = pnand %p3788_p0, %p217_p2 }
   0x7   : > { %221 = sbr.rel (%p218_p3) target bundleno = 856 (0x358), region = 44 }
   0xe   : > { %p248_p4 = scmp.lt.s32.totalorder %s4279_s24, 1  ;;  %s3900_s28 = smul.u32 216, %s4279_s24 }
  0x10   : > { %s7447_s24 = smov (!%p248_p4, %s4279_s24), 1  ;;  %s4352_s8 = scalar_lea.vmem %s6927_s0, %s3900_s28 }
  0x11   : > { %s3899_s9 = sshll.u32 %s7447_s24, 8  ;;  %v310_v0 = vld [vmem:[%s4352_s8] sm:$0xff]  ;;  %v312_v1 = vld [vmem:[%s4352_s8 + $0x8] sm:$0xff]  ;;  %v314_v2 = vld [vmem:[%s4352_s8 + $0x10] sm:$0xff] }
  0x12   : > { %s4360_s12 = scalar_lea.vmem %s6934_s7, %s3899_s9  ;;  %311 = vst [vmem:[#allocation2] sm:$0xff] %v310_v0  ;;  %313 = vst [vmem:[#allocation2 + $0x8] sm:$0xff] %v312_v1  ;;  %v316_v3 = vld [vmem:[%s4352_s8 + $0x18] sm:$0xff]  ;;  %v318_v4 = vld [vmem:[%s4352_s8 + $0x20] sm:$0xff] }
  0x13   : > { %315 = vst [vmem:[#allocation2 + $0x10] sm:$0xff] %v314_v2  ;;  %v320_v5 = vld [vmem:[%s4352_s8 + $0x28] sm:$0xff]  ;;  %317 = vst [vmem:[#allocation2 + $0x18] sm:$0xff] %v316_v3  ;;  %v322_v6 = vld [vmem:[%s4352_s8 + $0x30] sm:$0xff] }
  0x14   : > { %319 = vst [vmem:[#allocation2 + $0x20] sm:$0xff] %v318_v4  ;;  %321 = vst [vmem:[#allocation2 + $0x28] sm:$0xff] %v320_v5  ;;  %v324_v7 = vld [vmem:[%s4352_s8 + $0x38] sm:$0xff]  ;;  %v326_v8 = vld [vmem:[%s4352_s8 + $0x40] sm:$0xff] }
  0x15   : > { %323 = vst [vmem:[#allocation2 + $0x30] sm:$0xff] %v322_v6  ;;  %325 = vst [vmem:[#allocation2 + $0x38] sm:$0xff] %v324_v7  ;;  %v328_v9 = vld [vmem:[%s4352_s8 + $0x48] sm:$0xff]  ;;  %v330_v10 = vld [vmem:[%s4352_s8 + $0x50] sm:$0xff] }
  0x16   : > { %327 = vst [vmem:[#allocation2 + $0x40] sm:$0xff] %v326_v8  ;;  %v332_v11 = vld [vmem:[%s4352_s8 + $0x58] sm:$0xff]  ;;  %329 = vst [vmem:[#allocation2 + $0x48] sm:$0xff] %v328_v9  ;;  %v334_v12 = vld [vmem:[%s4352_s8 + $0x60] sm:$0xff] }
  0x17   : > { %331 = vst [vmem:[#allocation2 + $0x50] sm:$0xff] %v330_v10  ;;  %333 = vst [vmem:[#allocation2 + $0x58] sm:$0xff] %v332_v11  ;;  %v336_v13 = vld [vmem:[%s4352_s8 + $0x68] sm:$0xff]  ;;  %v338_v14 = vld [vmem:[%s4352_s8 + $0x70] sm:$0xff] }
  0x18   : > { %335 = vst [vmem:[#allocation2 + $0x60] sm:$0xff] %v334_v12  ;;  %337 = vst [vmem:[#allocation2 + $0x68] sm:$0xff] %v336_v13  ;;  %v340_v15 = vld [vmem:[%s4352_s8 + $0x78] sm:$0xff]  ;;  %v342_v16 = vld [vmem:[%s4352_s8 + $0x80] sm:$0xff] }
  0x19   : > { %339 = vst [vmem:[#allocation2 + $0x70] sm:$0xff] %v338_v14  ;;  %v344_v17 = vld [vmem:[%s4352_s8 + $0x88] sm:$0xff]  ;;  %341 = vst [vmem:[#allocation2 + $0x78] sm:$0xff] %v340_v15  ;;  %v346_v18 = vld [vmem:[%s4352_s8 + $0x90] sm:$0xff] }
  0x1a   : > { %343 = vst [vmem:[#allocation2 + $0x80] sm:$0xff] %v342_v16  ;;  %345 = vst [vmem:[#allocation2 + $0x88] sm:$0xff] %v344_v17  ;;  %v348_v19 = vld [vmem:[%s4352_s8 + $0x98] sm:$0xff]  ;;  %v350_v20 = vld [vmem:[%s4352_s8 + $0xa0] sm:$0xff] }
  0x1b   : > { %347 = vst [vmem:[#allocation2 + $0x90] sm:$0xff] %v346_v18  ;;  %349 = vst [vmem:[#allocation2 + $0x98] sm:$0xff] %v348_v19  ;;  %v352_v21 = vld [vmem:[%s4352_s8 + $0xa8] sm:$0xff]  ;;  %v354_v22 = vld [vmem:[%s4352_s8 + $0xb0] sm:$0xff] }
  0x1c   : > { %351 = vst [vmem:[#allocation2 + $0xa0] sm:$0xff] %v350_v20  ;;  %v356_v23 = vld [vmem:[%s4352_s8 + $0xb8] sm:$0xff]  ;;  %353 = vst [vmem:[#allocation2 + $0xa8] sm:$0xff] %v352_v21  ;;  %v358_v24 = vld [vmem:[%s4352_s8 + $0xc0] sm:$0xff] }
  0x1d   : > { %355 = vst [vmem:[#allocation2 + $0xb0] sm:$0xff] %v354_v22  ;;  %357 = vst [vmem:[#allocation2 + $0xb8] sm:$0xff] %v356_v23  ;;  %v360_v25 = vld [vmem:[%s4352_s8 + $0xc8] sm:$0xff]  ;;  %v362_v26 = vld [vmem:[%s4352_s8 + $0xd0] sm:$0xff] }
  0x1e   : > { %359 = vst [vmem:[#allocation2 + $0xc0] sm:$0xff] %v358_v24  ;;  %361 = vst [vmem:[#allocation2 + $0xc8] sm:$0xff] %v360_v25 }
  0x1f   : > { %363 = vst [vmem:[#allocation2 + $0xd0] sm:$0xff] %v362_v26 }
  0x20   : > { %371 = vsyncadd [#allocation3], 3456 }
  0x21   : > { %4275 = dma.done.wait [#allocation3], 3456 }
  0x22   : > { %4276 = vsyncadd [#allocation3], 4294963840  ;;  %v4289_v27 = vmov 0.0   ;;  %vm4290_vm0 = vmmov 0   ;;  %v4174_v28 = vld [vmem:[%s6928_s1] sm:$0xff]   ;;  %v4175_v29 = vld [vmem:[%s6928_s1 + $0x8] sm:$0xff]   ;;  %v1100_v7 = vlaneseq }
  0x23   : > { %3960 = vmatprep.subr.bf16.mxu0 %v4289_v27  ;;  %3976 = vmatprep.mubr.msk.bf16.mxu0 %vm4290_vm0, %v4289_v27  ;;  %v4176_v30 = vld [vmem:[%s6928_s1 + $0x10] sm:$0xff]   ;;  %v4177_v31 = vld [vmem:[%s6928_s1 + $0x18] sm:$0xff]   ;;  %v4178_v32 = vld [vmem:[%s6928_s1 + $0x20] sm:$0xff]   ;;  %vm1573_vm3 = vcmask 1046528   ;;  %vm1818_vm4 = vcmask 1045504   ;;  %vm3634_vm5 = vcmask 64512  }
  0x24   : > { %4132 = vmatprep.subr.bf16.mxu1 %v4289_v27  ;;  %4048 = vmatprep.mubr.msk.bf16.mxu1 %vm4290_vm0, %v4289_v27  ;;  %v4179_v33 = vld [vmem:[%s6928_s1 + $0x28] sm:$0xff]   ;;  %v4180_v34 = vld [vmem:[%s6928_s1 + $0x30] sm:$0xff]   ;;  %v4181_v35 = vld [vmem:[%s6928_s1 + $0x38] sm:$0xff]   ;;  %v4543_v8 = vshrl.u32 %v1100_v7, 7 }
  0x25   : > { %3961 = vmatpush3.bf16.msra.mxu0 %v4174_v28  ;;  %4140 = vmatpush3.bf16.msra.mxu1 %v4174_v28  ;;  %v528_v36 = vld [vmem:[#allocation2 + $0x90] sm:$0xff]   ;;  %v4182_v37 = vld [vmem:[#allocation2] sm:$0xff]   ;;  %v4432_v38 = vld [vmem:[#allocation2 + $0x8] sm:$0xff]  }
  0x26   : > { %3962 = vmatprep.subr.bf16.mxu0 %v4289_v27  ;;  %4133 = vmatprep.subr.bf16.mxu1 %v4289_v27  ;;  %v530_v39 = vld [vmem:[#allocation2 + $0x98] sm:$0xff]   ;;  %v4439_v40 = vld [vmem:[#allocation2 + $0x10] sm:$0xff]   ;;  %v532_v41 = vld [vmem:[#allocation2 + $0xa0] sm:$0xff]   ;;  %v4546_v9 = vsub.s32 1, %v4543_v8  ;;  %v4552_v11 = vsub.s32 0, %v4543_v8  ;;  %v4558_v13 = vsub.s32 2, %v4543_v8  ;;  %v3394_v14 = vunpack.c.h.bf16 %v4432_v38 }
  0x27   : > { %v4446_v42 = vld [vmem:[#allocation2 + $0x18] sm:$0xff]   ;;  %v534_v43 = vld [vmem:[#allocation2 + $0xa8] sm:$0xff]   ;;  %v4453_v44 = vld [vmem:[#allocation2 + $0x20] sm:$0xff]   ;;  %v3395_v15 = vunpack.c.l.bf16 %v4439_v40  ;;  %v3396_v16 = vunpack.c.h.bf16 %v4439_v40  ;;  %vm1158_vm1 = vcmp.ge.s32.totalorder %v4543_v8, 1 }
  0x28   : > { %v536_v45 = vld [vmem:[#allocation2 + $0xb0] sm:$0xff]   ;;  %v4460_v46 = vld [vmem:[#allocation2 + $0x28] sm:$0xff]   ;;  %v538_v47 = vld [vmem:[#allocation2 + $0xb8] sm:$0xff]   ;;  %v3397_v17 = vunpack.c.l.bf16 %v4446_v42  ;;  %v4571_v21 = vrot.slane %v3394_v14, 1  ;;  %v3398_v22 = vunpack.c.h.bf16 %v4446_v42  ;;  %v3399_v26 = vunpack.c.l.bf16 %v4453_v44 }
  0x29   : > { %3963 = vmatpush3.bf16.msra.mxu0 %v4175_v29  ;;  %4141 = vmatpush3.bf16.msra.mxu1 %v4175_v29  ;;  %7041 = vst [vmem:[#allocation7_spill] sm:$0xff] %v4460_v46  ;;  %v4467_v48 = vld [vmem:[#allocation2 + $0x30] sm:$0xff]   ;;  %v540_v49 = vld [vmem:[#allocation2 + $0xc0] sm:$0xff]   ;;  %v4474_v50 = vld [vmem:[#allocation2 + $0x38] sm:$0xff]   ;;  %v4574_v23 = vrot.slane %v3395_v15, 1  ;;  %v4576_v24 = vrot.slane %v3396_v16, 1  ;;  %v3401_v28 = vunpack.c.l.bf16 %v4460_v46 }
  0x2a   : > { %3964 = vmatprep.subr.bf16.mxu0 %v4289_v27  ;;  %4134 = vmatprep.subr.bf16.mxu1 %v4289_v27  ;;  %7042 = vst [vmem:[#allocation8_spill] sm:$0xff] %v4467_v48  ;;  %v542_v51 = vld [vmem:[#allocation2 + $0xc8] sm:$0xff]   ;;  %v4481_v52 = vld [vmem:[#allocation2 + $0x40] sm:$0xff]   ;;  %v4493_v54 = vld [vmem:[#allocation2 + $0x50] sm:$0xff]   ;;  %v4578_v25 = vrot.slane %v3397_v17, 1  ;;  %v3404_v29 = vunpack.c.h.bf16 %v4467_v48  ;;  %v4635_v14 = vadd.s32 16, %v4543_v8 }
  0x2b   : > { %v4488_v53 = vld [vmem:[#allocation2 + $0x48] sm:$0xff]   ;;  %v4498_v55 = vld [vmem:[#allocation2 + $0x58] sm:$0xff]   ;;  %v4503_v56 = vld [vmem:[#allocation2 + $0x60] sm:$0xff]   ;;  %7045 = vst [vmem:[#allocation11_spill] sm:$0xff] %v4571_v21 }
  0x2c   : > { %7043 = vst [vmem:[#allocation9_spill] sm:$0xff] %v4503_v56  ;;  %v4508_v57 = vld [vmem:[#allocation2 + $0x68] sm:$0xff]   ;;  %v520_v58 = vld [vmem:[#allocation2 + $0x70] sm:$0xff]   ;;  %v522_v59 = vld [vmem:[#allocation2 + $0x78] sm:$0xff]   ;;  %vm1217_vm2 = vcmp.le.s32.totalorder %v4635_v14, 16 }
  0x2d   : > { %3965 = vmatpush3.bf16.msra.mxu0 %v4176_v30  ;;  %4142 = vmatpush3.bf16.msra.mxu1 %v4176_v30  ;;  %7044 = vst [vmem:[#allocation10_spill] sm:$0xff] %v4508_v57  ;;  %v4208_v60 = vld [vmem:[%s6930_s3] sm:$0xff]   ;;  %v4209_v62 = vld [vmem:[%s6930_s3 + $0x8] sm:$0xff]   ;;  %v4210_v63 = vld [vmem:[%s6930_s3 + $0x10] sm:$0xff]   ;;  %v3405_v30 = vunpack.c.l.bf16 %v4474_v50 }
  0x2e   : > { %3966 = vmatprep.subr.bf16.mxu0 %v4289_v27  ;;  %4135 = vmatprep.subr.bf16.mxu1 %v4289_v27  ;;  %v524_v61 = vld [vmem:[#allocation2 + $0x80] sm:$0xff]   ;;  %v526_v0 = vld [vmem:[#allocation2 + $0x88] sm:$0xff]   ;;  %v4211_v1 = vld [vmem:[%s6930_s3 + $0x18] sm:$0xff]   ;;  %7046 = vst [vmem:[#allocation12_spill] sm:$0xff] %v4574_v23 }
  0x2f   : > { %v4212_v2 = vld [vmem:[%s6930_s3 + $0x20] sm:$0xff]   ;;  %v4213_v3 = vld [vmem:[%s6930_s3 + $0x28] sm:$0xff]   ;;  %v4214_v4 = vld [vmem:[#allocation2 + $0xd0] sm:$0xff]   ;;  %7047 = vst [vmem:[#allocation13_spill] sm:$0xff] %v4576_v24 }
  0x30   : > { %v4215_v5 = vld [vmem:[%s6930_s3 + $0x30] sm:$0xff]   ;;  %v4216_v6 = vld [vmem:[%s6930_s3 + $0x38] sm:$0xff]   ;;  %v1434_v10 = vld [vmem:[%s6929_s2] sm:$0x7]  ;;  %7048 = vst [vmem:[#allocation14_spill] sm:$0xff] %v4578_v25 }
  0x31   : > { %3967 = vmatpush3.bf16.msra.mxu0 %v4177_v31  ;;  %4143 = vmatpush3.bf16.msra.mxu1 %v4177_v31  ;;  %v4555_v12 = vrot.slane %v1434_v10, %v4546_v9  ;;  %v4565_v18 = vrot.slane %v1434_v10, %v4552_v11  ;;  %v4569_v20 = vrot.slane %v1434_v10, %v4558_v13  ;;  %v3406_v31 = vunpack.c.h.bf16 %v4474_v50  ;;  %v1436_v7 = vld [vmem:[%s6929_s2 + $0x8] sm:$0x7] }
  0x32   : > { %3968 = vmatprep.subr.bf16.mxu0 %v4289_v27  ;;  %4136 = vmatprep.subr.bf16.mxu1 %v4289_v27 }
  0x33   : > { %v1477_v19 = vmul.f32 0.0, %v4555_v12 }
  0x35   : > { %3969 = vmatpush3.bf16.msra.mxu0 %v4178_v32  ;;  %4144 = vmatpush3.bf16.msra.mxu1 %v4178_v32  ;;  %v1441_v32 = vmul.f32 0.0, %v4565_v18 }
  0x36   : > { %3970 = vmatprep.subr.bf16.mxu0 %v4289_v27  ;;  %4137 = vmatprep.subr.bf16.mxu1 %v4289_v27 }
  0x39   : > { %3971 = vmatpush3.bf16.msra.mxu0 %v4179_v33  ;;  %4145 = vmatpush3.bf16.msra.mxu1 %v4179_v33  ;;  %v1574_v33 = vrot.slane %v1477_v19, 1 }
  0x3a   : > { %3972 = vmatprep.subr.bf16.mxu0 %v4289_v27  ;;  %4138 = vmatprep.subr.bf16.mxu1 %v4289_v27 }
  0x3d   : > { %3973 = vmatpush3.bf16.msra.mxu0 %v4180_v34  ;;  %4146 = vmatpush3.bf16.msra.mxu1 %v4180_v34  ;;  %v1722_v34 = vmul.f32 0.0, %v4569_v20 }
  0x3e   : > { %3974 = vmatprep.subr.bf16.mxu0 %v4289_v27  ;;  %4139 = vmatprep.subr.bf16.mxu1 %v4289_v27 }
  0x41   : > { %3975 = vmatpush3.bf16.msra.mxu0 %v4181_v35  ;;  %4147 = vmatpush3.bf16.msra.mxu1 %v4181_v35  ;;  %v4588_v35 = vrot.slane %v3398_v22, 1 }
  0x42   : > { %4084 = vmatprep.subr.bf16.mxu1 %v4208_v60 }
  0x43   : > { %7049 = vst [vmem:[#allocation15_spill] sm:$0xff] %v4588_v35 }
  0x44   : > { %3977 = vmatmul.mubr.bf16.vlgmr.msra.gmra.mrb[0].mxu0 %v4182_v37  ;;  %4049 = vmatmul.mubr.bf16.vlgmr.msra.gmra.mrb[0].mxu1 %v528_v36  ;;  %v3407_v36 = vunpack.c.l.bf16 %v4481_v52  ;;  %v3410_v37 = vunpack.c.h.bf16 %v4488_v53 }
  0x45   : > { %3980 = vmatprep.mubr.msk.bf16.mxu0 %vm4290_vm0, %v4289_v27  ;;  %4052 = vmatprep.mubr.msk.bf16.mxu1 %vm4290_vm0, %v4289_v27 }
  0x46   : > { %4085 = vmatpush3.bf16.msra.mxu1 %v4208_v60 }
  0x47   : > { %4086 = vmatprep.subr.bf16.mxu1 %v4209_v62 }
  0x4a   : > { %4087 = vmatpush3.bf16.msra.mxu1 %v4209_v62  ;;  %v4616_v62 = vrot.slane %v3410_v37, 1 }
  0x4b   : > { %4088 = vmatprep.subr.bf16.mxu1 %v4210_v63 }
  0x4c   : > { %3981 = vmatmul.mubr.bf16.gmra.mrb[4].mxu0 %v4432_v38  ;;  %4053 = vmatmul.mubr.bf16.gmra.mrb[4].mxu1 %v530_v39  ;;  %v3411_v38 = vunpack.c.l.bf16 %v4493_v54  ;;  %7057 = vst [vmem:[#allocation23_spill] sm:$0xff] %v4616_v62 }
  0x4d   : > { %3984 = vmatprep.mubr.msk.bf16.mxu0 %vm4290_vm0, %v4289_v27  ;;  %4056 = vmatprep.mubr.msk.bf16.mxu1 %vm4290_vm0, %v4289_v27 }
  0x4e   : > { %4089 = vmatpush3.bf16.msra.mxu1 %v4210_v63  ;;  %v4618_v63 = vrot.slane %v3411_v38, 1 }
  0x4f   : > { %4090 = vmatprep.subr.bf16.mxu1 %v4211_v1 }
  0x50   : > { %7058 = vst [vmem:[#allocation24_spill] sm:$0xff] %v4618_v63 }
  0x52   : > { %4091 = vmatpush3.bf16.msra.mxu1 %v4211_v1 }
  0x53   : > { %4092 = vmatprep.subr.bf16.mxu1 %v4212_v2 }
  0x54   : > { %3985 = vmatmul.mubr.bf16.gmra.mrb[8].mxu0 %v4439_v40  ;;  %4057 = vmatmul.mubr.bf16.gmra.mrb[8].mxu1 %v532_v41  ;;  %v4593_v40 = vrot.slane %v3399_v26, 1 }
  0x55   : > { %3988 = vmatprep.mubr.msk.bf16.mxu0 %vm4290_vm0, %v4289_v27  ;;  %4060 = vmatprep.mubr.msk.bf16.mxu1 %vm4290_vm0, %v4289_v27 }
  0x56   : > { %4093 = vmatpush3.bf16.msra.mxu1 %v4212_v2  ;;  %7050 = vst [vmem:[#allocation16_spill] sm:$0xff] %v4593_v40 }
  0x57   : > { %4094 = vmatprep.subr.bf16.mxu1 %v4213_v3 }
  0x5a   : > { %4095 = vmatpush3.bf16.msra.mxu1 %v4213_v3 }
  0x5b   : > { %4096 = vmatprep.subr.bf16.mxu1 %v4215_v5 }
  0x5c   : > { %3989 = vmatmul.mubr.bf16.gmra.mrb[12].mxu0 %v4446_v42  ;;  %4061 = vmatmul.mubr.bf16.gmra.mrb[12].mxu1 %v534_v43  ;;  %v3412_v42 = vunpack.c.h.bf16 %v4493_v54  ;;  %v3413_v43 = vunpack.c.l.bf16 %v4498_v55 }
  0x5d   : > { %3992 = vmatprep.mubr.msk.bf16.mxu0 %vm4290_vm0, %v4289_v27  ;;  %4064 = vmatprep.mubr.msk.bf16.mxu1 %vm4290_vm0, %v4289_v27 }
  0x5e   : > { %4097 = vmatpush3.bf16.msra.mxu1 %v4215_v5  ;;  %v4624_v3 = vrot.slane %v3412_v42, 1 }
  0x5f   : > { %4098 = vmatprep.subr.bf16.mxu1 %v4216_v6 }
  0x60   : > { %7059 = vst [vmem:[#allocation25_spill] sm:$0xff] %v4624_v3 }
  0x62   : > { %4099 = vmatpush3.bf16.msra.mxu1 %v4216_v6 }
  0x64   : > { %3993 = vmatmul.mubr.bf16.gmra.mrb[16].mxu0 %v4453_v44  ;;  %4065 = vmatmul.mubr.bf16.gmra.mrb[16].mxu1 %v536_v45 }
  0x65   : > { %3996 = vmatprep.mubr.msk.bf16.mxu0 %vm4290_vm0, %v4289_v27  ;;  %4068 = vmatprep.mubr.msk.bf16.mxu1 %vm4290_vm0, %v4289_v27 }
  0x6c   : > { %3997 = vmatmul.mubr.bf16.gmra.mrb[20].mxu0 %v4460_v46  ;;  %4069 = vmatmul.mubr.bf16.gmra.mrb[20].mxu1 %v538_v47  ;;  %v4600_v47 = vrot.slane %v3401_v28, 1 }
  0x6d   : > { %4000 = vmatprep.mubr.msk.bf16.mxu0 %vm4290_vm0, %v4289_v27  ;;  %4072 = vmatprep.mubr.msk.bf16.mxu1 %vm4290_vm0, %v4289_v27 }
  0x6e   : > { %7052 = vst [vmem:[#allocation18_spill] sm:$0xff] %v4600_v47 }
  0x74   : > { %4001 = vmatmul.mubr.bf16.gmra.mrb[24].mxu0 %v4467_v48  ;;  %4073 = vmatmul.mubr.bf16.gmra.mrb[24].mxu1 %v540_v49  ;;  %v4602_v49 = vrot.slane %v3404_v29, 1  ;;  %v4650_v29 = vrot.slane %v1436_v7, %v4552_v11 }
  0x75   : > { %4004 = vmatprep.mubr.msk.bf16.mxu0 %vm4290_vm0, %v4289_v27  ;;  %4076 = vmatprep.mubr.msk.bf16.mxu1 %vm4290_vm0, %v4289_v27 }
  0x76   : > { %7053 = vst [vmem:[#allocation19_spill] sm:$0xff] %v4602_v49 }
  0x7c   : > { %4005 = vmatmul.mubr.bf16.gmra.mrb[28].mxu0 %v4474_v50  ;;  %4077 = vmatmul.mubr.bf16.gmra.mrb[28].mxu1 %v542_v51  ;;  %v4604_v50 = vrot.slane %v3405_v30, 1  ;;  %v4653_v30 = vrot.slane %v1436_v7, %v4546_v9 }
  0x7d   : > { %4008 = vmatprep.mubr.msk.bf16.mxu0 %vm4290_vm0, %v4289_v27  ;;  %4080 = vmatprep.mubr.msk.bf16.mxu1 %vm4290_vm0, %v4289_v27 }
  0x7e   : > { %7054 = vst [vmem:[#allocation20_spill] sm:$0xff] %v4604_v50 }
  0x84   : > { %4009 = vmatmul.mubr.bf16.gmra.mrb[32].mxu0 %v4481_v52  ;;  %4081 = vmatmul.mubr.bf16.gmra.mrb[32].mxu1 %v4214_v4  ;;  %v4626_v4 = vrot.slane %v3413_v43, 1 }
  0x85   : > { %4012 = vmatprep.mubr.msk.bf16.mxu0 %vm4290_vm0, %v4289_v27 }
  0x86   : > { %7060 = vst [vmem:[#allocation26_spill] sm:$0xff] %v4626_v4 }
  0x8c   : > { %4013 = vmatmul.mubr.bf16.gmra.mrb[36].mxu0 %v4488_v53  ;;  %v4607_v53 = vrot.slane %v3406_v31, 1 }
  0x8d   : > { %4016 = vmatprep.mubr.msk.bf16.mxu0 %vm4290_vm0, %v4289_v27 }
  0x8e   : > { %7055 = vst [vmem:[#allocation21_spill] sm:$0xff] %v4607_v53 }
  0x94   : > { %4017 = vmatmul.mubr.bf16.gmra.mrb[40].mxu0 %v4493_v54  ;;  %v4612_v54 = vld [vmem:[%s6931_s4] ss:$0 sm:$0xff] }
  0x95   : > { %4020 = vmatprep.mubr.msk.bf16.mxu0 %vm4290_vm0, %v4289_v27 }
  0x9c   : > { %4021 = vmatmul.mubr.bf16.gmra.mrb[44].mxu0 %v4498_v55  ;;  %v1686_v55 = vadd.f32 %v1574_v33, %v1441_v32 }
  0x9d   : > { %4024 = vmatprep.mubr.msk.bf16.mxu0 %vm4290_vm0, %v4289_v27 }
  0xa4   : > { %4025 = vmatmul.mubr.bf16.gmra.mrb[48].mxu0 %v4503_v56 }
  0xa5   : > { %4028 = vmatprep.mubr.msk.bf16.mxu0 %vm4290_vm0, %v4289_v27 }
  0xac   : > { %4029 = vmatmul.mubr.bf16.gmra.mrb[52].mxu0 %v4508_v57 }
  0xad   : > { %4032 = vmatprep.mubr.msk.bf16.mxu0 %vm4290_vm0, %v4289_v27 }
  0xb4   : > { %4033 = vmatmul.mubr.bf16.gmra.mrb[56].mxu0 %v520_v58 }
  0xb5   : > { %4036 = vmatprep.mubr.msk.bf16.mxu0 %vm4290_vm0, %v4289_v27 }
  0xbc   : > { %4037 = vmatmul.mubr.bf16.gmra.mrb[60].mxu0 %v522_v59  ;;  %v1819_v59 = vrot.slane %v1722_v34, 2 }
  0xbd   : > { %4040 = vmatprep.mubr.msk.bf16.mxu0 %vm4290_vm0, %v4289_v27 }
  0xbe   : > { %v4638_v19 = vadd.f32 %v1819_v59, %v1686_v55 }
  0xc4   : > { %4041 = vmatmul.mubr.bf16.gmra.mrb[64].mxu0 %v524_v61  ;;  %v4614_v61 = vrot.slane %v3407_v36, 1  ;;  %v4662_v36 = vrot.slane %v1436_v7, %v4558_v13 }
  0xc5   : > { %4044 = vmatprep.mubr.msk.bf16.mxu0 %vm4290_vm0, %v4289_v27  ;;  %v3400_v27 = vunpack.c.h.bf16 %v4453_v44 }
  0xc6   : > { %7056 = vst [vmem:[#allocation22_spill] sm:$0xff] %v4614_v61 }
  0xc7   : > { %v4598_v45 = vrot.slane %v3400_v27, 1 }
  0xc9   : > { %7051 = vst [vmem:[#allocation17_spill] sm:$0xff] %v4598_v45 }
  0xcc   : > { %4045 = vmatmul.mubr.bf16.gmra.mrb[68].mxu0 %v526_v0  ;;  %v1435_v0 = vld [vmem:[%s6929_s2 + $0x4] sm:$0x7] }
  0xcd   : > { %v4641_v22 = vrot.slane %v1435_v0, %v4552_v11  ;;  %v4644_v26 = vrot.slane %v1435_v0, %v4546_v9  ;;  %v4647_v27 = vrot.slane %v1435_v0, %v4558_v13 }
 0x117   : > { %v813_v39 = vpop.f32.mrb[0].mxu0  ;;  %v957_v60 = vpop.f32.mrb[0].mxu1 }
 0x118   : > { %v3978_v44 = vpop.f32.mrb[1].mxu0  ;;  %v958_v1 = vadd.f32 %v4612_v54, %v957_v60  ;;  %v4050_v2 = vpop.f32.mrb[1].mxu1 }
 0x119   : > { %v816_v51 = vpop.f32.mrb[2].mxu0  ;;  %v960_v10 = vpop.f32.mrb[2].mxu1 }
 0x11a   : > { %v3979_v58 = vpop.f32.mrb[3].mxu0  ;;  %v1064_v15 = vmax.f32 %v958_v1, 0.0  ;;  %v961_v16 = vadd.f32 %v4612_v54, %v960_v10  ;;  %v4051_v17 = vpop.f32.mrb[3].mxu1 }
 0x11c   : > { %v4657_v31 = vsel %vm1158_vm1, %v1064_v15, 0.0  ;;  %v4659_v32 = vmax.f32 %v961_v16, 0.0 }
 0x11d   : > { %7061 = vst [vmem:[#allocation27_spill] sm:$0xff] %v4657_v31  ;;  %v4666_v37 = vmul.f32 %v4555_v12, %v4657_v31  ;;  %v4670_v11 = vmul.f32 %v4569_v20, %v4657_v31  ;;  %v4689_v55 = vmul.f32 %v4565_v18, %v4657_v31 }
 0x11e   : > { %7062 = vst [vmem:[#allocation28_spill] sm:$0xff] %v4659_v32  ;;  %v4676_v42 = vmul.f32 %v4555_v12, %v4659_v32  ;;  %v4680_v13 = vmul.f32 %v4569_v20, %v4659_v32  ;;  %v4684_v43 = vmul.f32 %v4644_v26, %v4659_v32  ;;  %v1466_v0 = vmul.f32 %v4565_v18, %v4659_v32 }
 0x11f   : > { %v821_v28 = vpop.f32.mrb[4].mxu0  ;;  %v965_v33 = vpop.f32.mrb[4].mxu1  ;;  %7063 = vst [vmem:[#allocation29_spill] sm:$0xff] %v4666_v37  ;;  %7064 = vst [vmem:[#allocation30_spill] sm:$0xff] %v4670_v11 }
 0x120   : > { %v3982_v34 = vpop.f32.mrb[5].mxu0  ;;  %v966_v9 = vadd.f32 %v4612_v54, %v965_v33  ;;  %v4054_v38 = vpop.f32.mrb[5].mxu1  ;;  %7065 = vst [vmem:[#allocation31_spill] sm:$0xff] %v4676_v42  ;;  %7066 = vst [vmem:[#allocation32_spill] sm:$0xff] %v4680_v13  ;;  %v7072_v63 = vrot.slane %v4676_v42, 1 }
 0x121   : > { %v824_v39 = vpop.f32.mrb[6].mxu0  ;;  %7067 = vst [vmem:[#allocation33_spill] sm:$0xff] %v4684_v43  ;;  %7068 = vst [vmem:[#allocation34_spill] sm:$0xff] %v4689_v55 }
 0x122   : > { %v825_v44 = vadd.f32 %v4612_v54, %v824_v39  ;;  %v3983_v51 = vpop.f32.mrb[7].mxu0  ;;  %v1066_v58 = vmax.f32 %v966_v9, 0.0 }
 0x124   : > { %v1031_v1 = vmax.f32 %v825_v44, 0.0  ;;  %v1418_v2 = vsel %vm1217_vm2, %v1066_v58, 0.0 }
 0x125   : > { %v1515_v15 = vmul.f32 %v4555_v12, %v1418_v2  ;;  %v1760_v16 = vmul.f32 %v4569_v20, %v1418_v2  ;;  %v2070_v17 = vmul.f32 %v4644_v26, %v1418_v2  ;;  %v4706_v34 = vmul.f32 %v4647_v27, %v1418_v2 }
 0x126   : > { %v1383_v33 = vsel %vm1158_vm1, %v1031_v1, 0.0  ;;  %v4709_v9 = vmul.f32 %v4653_v30, %v1418_v2  ;;  %v4712_v38 = vmul.f32 %v4662_v36, %v1418_v2 }
 0x127   : > { %7069 = vst [vmem:[#allocation35_spill] sm:$0xff] %v4706_v34  ;;  %v1443_v39 = vmul.f32 %v4565_v18, %v1383_v33  ;;  %v1480_v44 = vmul.f32 %v4555_v12, %v1383_v33  ;;  %v1725_v51 = vmul.f32 %v4569_v20, %v1383_v33  ;;  %v1967_v58 = vmul.f32 %v4641_v22, %v1383_v33  ;;  %v829_v41 = vpop.f32.mrb[8].mxu0 }
 0x128   : > { %7070 = vst [vmem:[#allocation36_spill] sm:$0xff] %v4709_v9  ;;  %7071 = vst [vmem:[#allocation37_spill] sm:$0xff] %v4712_v38  ;;  %v4719_v1 = vmul.f32 %v4644_v26, %v1383_v33  ;;  %v4722_v5 = vmul.f32 %v4647_v27, %v1383_v33  ;;  %v830_v52 = vadd.f32 %v4612_v54, %v829_v41  ;;  %v3986_v6 = vpop.f32.mrb[9].mxu0  ;;  %v1637_v2 = vrot.slane %v1515_v15, 1 }
 0x129   : > { %v1579_v60 = vrot.slane %v1480_v44, 1  ;;  %v1824_v59 = vrot.slane %v1725_v51, 2  ;;  %v4726_v28 = vadd.f32 %v1967_v58, %v4638_v19  ;;  %v832_v10 = vpop.f32.mrb[10].mxu0  ;;  %v1882_v7 = vrot.slane %v1760_v16, 2  ;;  %v4751_v51 = vpop.f32.mrb[6].mxu1 }
 0x12a   : > { %v2131_v46 = vrot.slane %v4719_v1, 1  ;;  %v2375_v3 = vrot.slane %v4722_v5, 2  ;;  %v1032_v4 = vmax.f32 %v830_v52, 0.0  ;;  %v833_v62 = vadd.f32 %v4612_v54, %v832_v10  ;;  %v3987_v33 = vpop.f32.mrb[11].mxu0  ;;  %7076 = vst [vmem:[#allocation39_spill] sm:$0xff] %v4751_v51 }
 0x12b   : > { %v1638_v41 = vsel %vm1573_vm3, %v7072_v63, %v1637_v2  ;;  %v7073_v6 = vrot.slane %v4680_v13, 2  ;;  %v2189_v44 = vrot.slane %v2070_v17, 1 }
 0x12c   : > { %v1033_v16 = vmax.f32 %v833_v62, 0.0  ;;  %v1444_v58 = vmul.f32 %v4565_v18, %v1032_v4  ;;  %v1481_v5 = vmul.f32 %v4555_v12, %v1032_v4  ;;  %v1726_v52 = vmul.f32 %v4569_v20, %v1032_v4 }
 0x12d   : > { %v1883_v15 = vsel %vm1818_vm4, %v7073_v6, %v1882_v7  ;;  %v1968_v10 = vmul.f32 %v4641_v22, %v1032_v4  ;;  %v2036_v1 = vmul.f32 %v4644_v26, %v1032_v4  ;;  %v2280_v63 = vmul.f32 %v4647_v27, %v1032_v4 }
 0x12e   : > { %v1711_v2 = vadd.f32 %v1638_v41, %v1466_v0  ;;  %v1385_v7 = vsel %vm1217_vm2, %v1033_v16, 0.0  ;;  %v1580_v17 = vrot.slane %v1481_v5, 1  ;;  %v1825_v33 = vrot.slane %v1726_v52, 2  ;;  %v4055_v41 = vpop.f32.mrb[7].mxu1 }
 0x12f   : > { %v7074_v62 = vrot.slane %v4684_v43, 1  ;;  %v1482_v53 = vmul.f32 %v4555_v12, %v1385_v7  ;;  %v1727_v61 = vmul.f32 %v4569_v20, %v1385_v7  ;;  %v2000_v56 = vadd.f32 %v1968_v10, %v4638_v19  ;;  %v837_v0 = vpop.f32.mrb[12].mxu0  ;;  %v4760_v48 = vpop.f32.mrb[8].mxu1 }
 0x130   : > { %v2037_v4 = vmul.f32 %v4644_v26, %v1385_v7  ;;  %v1581_v16 = vsel %vm1573_vm3, %v1579_v60, %v1580_v17  ;;  %v1826_v5 = vsel %vm1818_vm4, %v1824_v59, %v1825_v33  ;;  %v2132_v52 = vrot.slane %v2036_v1, 1  ;;  %7077 = vst [vmem:[#allocation40_spill] sm:$0xff] %v4760_v48  ;;  %v4058_v19 = vpop.f32.mrb[9].mxu1 }
 0x131   : > { %v4749_v6 = vsel %vm1573_vm3, %v7074_v62, %v2189_v44  ;;  %v2281_v44 = vmul.f32 %v4647_v27, %v1385_v7  ;;  %v3990_v62 = vpop.f32.mrb[13].mxu0  ;;  %v1582_v49 = vrot.slane %v1482_v53, 1  ;;  %v1688_v50 = vadd.f32 %v1581_v16, %v1443_v39  ;;  %v4764_v59 = vpop.f32.mrb[10].mxu1 }
 0x132   : > { %7075 = vst [vmem:[#allocation38_spill] sm:$0xff] %v4749_v6  ;;  %v1827_v45 = vrot.slane %v1727_v61, 2  ;;  %v2134_v47 = vrot.slane %v2037_v4, 1  ;;  %v840_v57 = vpop.f32.mrb[14].mxu0  ;;  %v2376_v10 = vrot.slane %v2280_v63, 2  ;;  %v838_v41 = vadd.f32 %v4612_v54, %v837_v0  ;;  %7078 = vst [vmem:[#allocation41_spill] sm:$0xff] %v4764_v59 }
 0x133   : > { %v2378_v24 = vrot.slane %v2281_v44, 2  ;;  %v841_v60 = vadd.f32 %v4612_v54, %v840_v57  ;;  %v3991_v40 = vpop.f32.mrb[15].mxu0  ;;  %v1583_v1 = vsel %vm1573_vm3, %v1580_v17, %v1582_v49  ;;  %v1933_v62 = vadd.f32 %v1826_v5, %v1688_v50  ;;  %v4059_v61 = vpop.f32.mrb[11].mxu1 }
 0x134   : > { %v1828_v7 = vsel %vm1818_vm4, %v1825_v33, %v1827_v45  ;;  %v2135_v53 = vsel %vm1573_vm3, %v2132_v52, %v2134_v47  ;;  %v1689_v39 = vadd.f32 %v1583_v1, %v1444_v58  ;;  %v1034_v16 = vmax.f32 %v838_v41, 0.0  ;;  %v4808_v5 = vpop.f32.mrb[12].mxu1 }
 0x135   : > { %v2244_v4 = vadd.f32 %v2135_v53, %v2000_v56  ;;  %v2379_v63 = vsel %vm1818_vm4, %v2376_v10, %v2378_v24  ;;  %v4770_v44 = vmax.f32 %v841_v60, 0.0  ;;  %v2133_v57 = vsel %vm1573_vm3, %v2131_v46, %v2132_v52  ;;  %7080 = vst [vmem:[#allocation43_spill] sm:$0xff] %v4808_v5  ;;  %v4062_v1 = vpop.f32.mrb[13].mxu1 }
 0x136   : > { %v2377_v40 = vsel %vm1818_vm4, %v2375_v3, %v2376_v10  ;;  %v4774_v0 = vadd.f32 %v1883_v15, %v1711_v2  ;;  %v1934_v49 = vadd.f32 %v1828_v7, %v1689_v39  ;;  %v4780_v45 = vsel %vm1158_vm1, %v1034_v16, 0.0 }
 0x137   : > { %v4776_v17 = vadd.f32 %v2379_v63, %v2244_v4  ;;  %v2243_v56 = vadd.f32 %v2133_v57, %v4726_v28  ;;  %v4785_v24 = vmul.f32 %v4565_v18, %v4780_v45  ;;  %v4789_v46 = vmul.f32 %v4555_v12, %v4780_v45  ;;  %v845_v3 = vpop.f32.mrb[16].mxu0  ;;  %v4824_v63 = vpop.f32.mrb[14].mxu1 }
 0x138   : > { %7079 = vst [vmem:[#allocation42_spill] sm:$0xff] %v4774_v0  ;;  %v4793_v47 = vmul.f32 %v4569_v20, %v4780_v45  ;;  %v1969_v50 = vmul.f32 %v4641_v22, %v4780_v45  ;;  %v4799_v15 = vmul.f32 %v4644_v26, %v4780_v45  ;;  %v4803_v28 = vmul.f32 %v4647_v27, %v4780_v45  ;;  %v3994_v33 = vpop.f32.mrb[17].mxu0 }
 0x139   : > { %v846_v58 = vadd.f32 %v4612_v54, %v845_v3  ;;  %v1446_v2 = vmul.f32 %v4565_v18, %v4770_v44  ;;  %v4816_v41 = vmul.f32 %v4555_v12, %v4770_v44  ;;  %v848_v60 = vpop.f32.mrb[18].mxu0  ;;  %v4822_v39 = vmul.f32 %v4569_v20, %v4770_v44  ;;  %7081 = vst [vmem:[#allocation44_spill] sm:$0xff] %v4824_v63  ;;  %v4063_v3 = vpop.f32.mrb[15].mxu1 }
 0x13a   : > { %v4812_v10 = vadd.f32 %v1969_v50, %v1933_v62  ;;  %v3995_v4 = vpop.f32.mrb[19].mxu0  ;;  %v1970_v16 = vmul.f32 %v4641_v22, %v4770_v44  ;;  %v4831_v57 = vmul.f32 %v4644_v26, %v4770_v44  ;;  %v4835_v50 = vmul.f32 %v4647_v27, %v4770_v44 }
 0x13b   : > { %v1036_v61 = vmax.f32 %v846_v58, 0.0  ;;  %v849_v1 = vadd.f32 %v4612_v54, %v848_v60  ;;  %v4841_v4 = vadd.f32 %v2377_v40, %v2243_v56  ;;  %v7082_v0 = vrot.slane %v4816_v41, 1 }
 0x13c   : > { %v2002_v53 = vadd.f32 %v1970_v16, %v1934_v49  ;;  %v7083_v11 = vrot.slane %v4822_v39, 2  ;;  %v2835_v48 = vmul.f32 %v4662_v36, %v4780_v45 }
 0x13d   : > { %v1388_v58 = vsel %vm1217_vm2, %v1036_v61, 0.0  ;;  %v1037_v16 = vmax.f32 %v849_v1, 0.0 }
 0x13e   : > { %v1485_v19 = vmul.f32 %v4555_v12, %v1388_v58  ;;  %v1730_v52 = vmul.f32 %v4569_v20, %v1388_v58  ;;  %v2040_v7 = vmul.f32 %v4644_v26, %v1388_v58  ;;  %v2284_v3 = vmul.f32 %v4647_v27, %v1388_v58 }
 0x13f   : > { %v4850_v61 = vmul.f32 %v4653_v30, %v1388_v58  ;;  %v4853_v56 = vmul.f32 %v4662_v36, %v1388_v58  ;;  %v853_v23 = vpop.f32.mrb[20].mxu0 }
 0x140   : > { %v1587_v33 = vrot.slane %v1485_v19, 1  ;;  %v1832_v60 = vrot.slane %v1730_v52, 2  ;;  %v2139_v40 = vrot.slane %v2040_v7, 1  ;;  %v2383_v25 = vrot.slane %v2284_v3, 2  ;;  %v3998_v35 = vpop.f32.mrb[21].mxu0 }
 0x141   : > { %v854_v62 = vadd.f32 %v4612_v54, %v853_v23  ;;  %v7084_v19 = vrot.slane %v4831_v57, 1  ;;  %v856_v3 = vpop.f32.mrb[22].mxu0  ;;  %v7085_v23 = vrot.slane %v4835_v50, 2 }
 0x142   : > { %v1588_v21 = vsel %vm1573_vm3, %v7082_v0, %v1587_v33  ;;  %v1833_v52 = vsel %vm1818_vm4, %v7083_v11, %v1832_v60  ;;  %v4872_v0 = vsel %vm1158_vm1, %v1037_v16, 0.0  ;;  %v3999_v33 = vpop.f32.mrb[23].mxu0  ;;  %v857_v16 = vadd.f32 %v4612_v54, %v856_v3 }
 0x143   : > { %v2140_v7 = vsel %vm1573_vm3, %v7084_v19, %v2139_v40  ;;  %v1691_v49 = vadd.f32 %v1588_v21, %v1446_v2  ;;  %v2384_v35 = vsel %vm1818_vm4, %v7085_v23, %v2383_v25  ;;  %v4876_v11 = vmul.f32 %v4565_v18, %v4872_v0 }
 0x144   : > { %v2246_v1 = vadd.f32 %v2140_v7, %v2002_v53  ;;  %v4880_v60 = vmul.f32 %v4555_v12, %v4872_v0  ;;  %v4884_v21 = vmul.f32 %v4569_v20, %v4872_v0  ;;  %v4888_v25 = vmul.f32 %v4653_v30, %v4872_v0 }
 0x145   : > { %7086 = vst [vmem:[#allocation45_spill] sm:$0xff] %v4876_v11  ;;  %v4890_v2 = vadd.f32 %v1833_v52, %v1691_v49  ;;  %v4892_v40 = vmax.f32 %v854_v62, 0.0  ;;  %v2523_v33 = vmul.f32 %v4650_v29, %v4780_v45  ;;  %v1039_v58 = vmax.f32 %v857_v16, 0.0 }
 0x146   : > { %7087 = vst [vmem:[#allocation46_spill] sm:$0xff] %v4880_v60  ;;  %7088 = vst [vmem:[#allocation47_spill] sm:$0xff] %v4884_v21  ;;  %v2490_v53 = vadd.f32 %v2384_v35, %v2246_v1 }
 0x147   : > { %v1448_v13 = vmul.f32 %v4565_v18, %v4892_v40  ;;  %v4904_v49 = vmul.f32 %v4555_v12, %v4892_v40  ;;  %v4908_v62 = vmul.f32 %v4569_v20, %v4892_v40  ;;  %v4912_v52 = vmul.f32 %v4644_v26, %v4892_v40  ;;  %v861_v16 = vpop.f32.mrb[24].mxu0 }
 0x148   : > { %v2526_v3 = vmul.f32 %v4650_v29, %v4892_v40  ;;  %v4918_v1 = vmul.f32 %v4653_v30, %v4892_v40  ;;  %v4922_v35 = vmul.f32 %v4662_v36, %v4892_v40  ;;  %v1391_v7 = vsel %vm1217_vm2, %v1039_v58, 0.0  ;;  %v4002_v37 = vpop.f32.mrb[25].mxu0 }
 0x149   : > { %7089 = vst [vmem:[#allocation48_spill] sm:$0xff] %v4904_v49  ;;  %7090 = vst [vmem:[#allocation49_spill] sm:$0xff] %v4908_v62  ;;  %v862_v55 = vadd.f32 %v4612_v54, %v861_v16  ;;  %v1488_v42 = vmul.f32 %v4555_v12, %v1391_v7  ;;  %v1733_v34 = vmul.f32 %v4569_v20, %v1391_v7  ;;  %v864_v32 = vpop.f32.mrb[26].mxu0  ;;  %v7092_v9 = vrot.slane %v4904_v49, 1 }
 0x14a   : > { %v2043_v6 = vmul.f32 %v4644_v26, %v1391_v7  ;;  %v4934_v31 = vmul.f32 %v4647_v27, %v1391_v7  ;;  %v2558_v58 = vadd.f32 %v2526_v3, %v2490_v53  ;;  %v2596_v19 = vmul.f32 %v4653_v30, %v1391_v7  ;;  %v4003_v63 = vpop.f32.mrb[27].mxu0 }
 0x14b   : > { %v1592_v16 = vrot.slane %v1488_v42, 1  ;;  %v1837_v37 = vrot.slane %v1733_v34, 2  ;;  %v2840_v59 = vmul.f32 %v4662_v36, %v1391_v7  ;;  %v6958_v43 = vrot.slane %v4922_v35, 2 }
 0x14c   : > { %7091 = vst [vmem:[#allocation50_spill] sm:$0xff] %v4934_v31  ;;  %v2144_v5 = vrot.slane %v2043_v6, 1  ;;  %v2695_v51 = vrot.slane %v2596_v19, 1  ;;  %v1040_v38 = vmax.f32 %v862_v55, 0.0  ;;  %v7093_v3 = vrot.slane %v4908_v62, 2 }
 0x14d   : > { %v1593_v53 = vsel %vm1573_vm3, %v7092_v9, %v1592_v16  ;;  %v7094_v42 = vrot.slane %v4912_v52, 1  ;;  %v2939_v6 = vrot.slane %v2840_v59, 2  ;;  %v7095_v19 = vrot.slane %v4918_v1, 1  ;;  %v4960_v16 = vpop.f32.mrb[16].mxu1 }
 0x14e   : > { %v1838_v23 = vsel %vm1818_vm4, %v7093_v3, %v1837_v37  ;;  %v1693_v63 = vadd.f32 %v1593_v53, %v1448_v13  ;;  %v4957_v55 = vsel %vm1158_vm1, %v1040_v38, 0.0  ;;  %v865_v9 = vadd.f32 %v4612_v54, %v864_v32  ;;  %7096 = vst [vmem:[#allocation51_spill] sm:$0xff] %v4960_v16  ;;  %v4066_v59 = vpop.f32.mrb[17].mxu1 }
 0x14f   : > { %v4950_v34 = vsel %vm1573_vm3, %v7094_v42, %v2144_v5  ;;  %v2696_v7 = vsel %vm1573_vm3, %v7095_v19, %v2695_v51  ;;  %v4967_v5 = vsel %vm1818_vm4, %v6958_v43, %v2939_v6  ;;  %v4971_v13 = vmul.f32 %v4565_v18, %v4957_v55  ;;  %v869_v38 = vpop.f32.mrb[28].mxu0 }
 0x150   : > { %v4962_v37 = vadd.f32 %v2696_v7, %v2558_v58  ;;  %v4975_v51 = vmul.f32 %v4555_v12, %v4957_v55  ;;  %v4977_v32 = vadd.f32 %v1838_v23, %v1693_v63  ;;  %v4981_v58 = vmul.f32 %v4569_v20, %v4957_v55  ;;  %v4006_v42 = vpop.f32.mrb[29].mxu0 }
 0x151   : > { %7097 = vst [vmem:[#allocation52_spill] sm:$0xff] %v4971_v13  ;;  %v4983_v53 = vmax.f32 %v865_v9, 0.0  ;;  %v2524_v3 = vmul.f32 %v4650_v29, %v4770_v44  ;;  %v2555_v19 = vadd.f32 %v2523_v33, %v4841_v4  ;;  %v2591_v7 = vmul.f32 %v4653_v30, %v4780_v45  ;;  %v872_v63 = vpop.f32.mrb[30].mxu0 }
 0x152   : > { %7098 = vst [vmem:[#allocation53_spill] sm:$0xff] %v4975_v51  ;;  %7099 = vst [vmem:[#allocation54_spill] sm:$0xff] %v4977_v32  ;;  %v2592_v23 = vmul.f32 %v4653_v30, %v4770_v44  ;;  %v2836_v42 = vmul.f32 %v4662_v36, %v4770_v44  ;;  %v4007_v6 = vpop.f32.mrb[31].mxu0  ;;  %v870_v33 = vadd.f32 %v4612_v54, %v869_v38  ;;  %v2931_v13 = vrot.slane %v2835_v48, 2  ;;  %v5018_v48 = vpop.f32.mrb[18].mxu1 }
 0x153   : > { %7100 = vst [vmem:[#allocation55_spill] sm:$0xff] %v4981_v58  ;;  %v2556_v9 = vadd.f32 %v2524_v3, %v4776_v17  ;;  %v2687_v43 = vrot.slane %v2591_v7, 1  ;;  %v1450_v16 = vmul.f32 %v4565_v18, %v4983_v53  ;;  %v5004_v59 = vmul.f32 %v4555_v12, %v4983_v53  ;;  %7102 = vst [vmem:[#allocation56_spill] sm:$0xff] %v5018_v48 }
 0x154   : > { %v2688_v4 = vrot.slane %v2592_v23, 1  ;;  %v2932_v51 = vrot.slane %v2836_v42, 2  ;;  %v5008_v17 = vmul.f32 %v4569_v20, %v4983_v53  ;;  %v7101_v45 = vrot.slane %v4850_v61, 1  ;;  %v4067_v61 = vpop.f32.mrb[19].mxu1 }
 0x155   : > { %v1042_v38 = vmax.f32 %v870_v33, 0.0  ;;  %v5016_v6 = vmul.f32 %v4644_v26, %v4983_v53  ;;  %v7103_v58 = vrot.slane %v4853_v56, 2  ;;  %v7106_v31 = vrot.slane %v5004_v59, 1 }
 0x156   : > { %v2689_v44 = vsel %vm1573_vm3, %v2687_v43, %v2688_v4  ;;  %v2691_v3 = vsel %vm1573_vm3, %v2688_v4, %v7101_v45  ;;  %v2933_v42 = vsel %vm1818_vm4, %v2931_v13, %v2932_v51  ;;  %v5027_v43 = vld [vmem:[%s6932_s5] ss:$0 sm:$0xff] }
 0x157   : > { %v2799_v7 = vadd.f32 %v2689_v44, %v2555_v19  ;;  %v2800_v23 = vadd.f32 %v2691_v3, %v2556_v9  ;;  %v2935_v32 = vsel %vm1818_vm4, %v2932_v51, %v7103_v58  ;;  %v1394_v4 = vsel %vm1217_vm2, %v1042_v38, 0.0  ;;  %v877_v13 = vpop.f32.mrb[32].mxu0  ;;  %v5034_v44 = vpop.f32.mrb[20].mxu1 }
 0x158   : > { %7104 = vst [vmem:[#allocation57_spill] sm:$0xff] %v5034_v44  ;;  %v1491_v58 = vmul.f32 %v4555_v12, %v1394_v4  ;;  %v1736_v45 = vmul.f32 %v4569_v20, %v1394_v4  ;;  %v4010_v3 = vpop.f32.mrb[33].mxu0  ;;  %v4070_v61 = vpop.f32.mrb[21].mxu1  ;;  %v2046_v48 = vmul.f32 %v4644_v26, %v1394_v4  ;;  %v5040_v38 = vmul.f32 %v4647_v27, %v1394_v4 }
 0x159   : > { %v3043_v56 = vadd.f32 %v2933_v42, %v2799_v7  ;;  %v3044_v51 = vadd.f32 %v2935_v32, %v2800_v23  ;;  %v5043_v19 = vmul.f32 %v4653_v30, %v1394_v4  ;;  %v5046_v9 = vmul.f32 %v4662_v36, %v1394_v4  ;;  %v880_v33 = vpop.f32.mrb[34].mxu0  ;;  %v5048_v7 = vpop.f32.mrb[22].mxu1 }
 0x15a   : > { %7105 = vst [vmem:[#allocation58_spill] sm:$0xff] %v5048_v7  ;;  %v1597_v42 = vrot.slane %v1491_v58, 1  ;;  %v1842_v3 = vrot.slane %v1736_v45, 2  ;;  %v4011_v61 = vpop.f32.mrb[35].mxu0  ;;  %v4071_v44 = vpop.f32.mrb[23].mxu1  ;;  %v2149_v21 = vrot.slane %v2046_v48, 1  ;;  %v873_v45 = vadd.f32 %v4612_v54, %v872_v63 }
 0x15b   : > { %v3082_v32 = vadd.f32 %v5027_v43, %v3043_v56  ;;  %v3083_v23 = vadd.f32 %v5027_v43, %v3044_v51  ;;  %v7107_v56 = vrot.slane %v5008_v17, 2  ;;  %v7108_v44 = vrot.slane %v5016_v6, 1 }
 0x15c   : > { %v1598_v7 = vsel %vm1573_vm3, %v7106_v31, %v1597_v42  ;;  %v7109_v61 = vrot.slane %v4831_v57, 1  ;;  %v7111_v42 = vrot.slane %v4835_v50, 2  ;;  %v1043_v63 = vmax.f32 %v873_v45, 0.0 }
 0x15d   : > { %v3114_v4 = vmax.f32 %v3082_v32, 0.0  ;;  %v3115_v49 = vmax.f32 %v3083_v23, 0.0  ;;  %v1843_v51 = vsel %vm1818_vm4, %v7107_v56, %v1842_v3  ;;  %v1695_v58 = vadd.f32 %v1598_v7, %v1450_v16 }
 0x15e   : > { %v5064_v48 = vsel %vm1573_vm3, %v7108_v44, %v2149_v21  ;;  %v7110_v32 = vrot.slane %v4799_v15, 1  ;;  %v7112_v16 = vrot.slane %v4803_v28, 2  ;;  %v2525_v21 = vmul.f32 %v4650_v29, %v4872_v0 }
 0x15f   : > { %v3146_v62 = vpack.c.bf16 %v3115_v49, %v3114_v4  ;;  %v5080_v3 = vadd.f32 %v1843_v51, %v1695_v58  ;;  %v7113_v57 = vrot.slane %v4918_v1, 1  ;;  %v7114_v15 = vrot.slane %v4888_v25, 1  ;;  %v885_v50 = vpop.f32.mrb[36].mxu0 }
 0x160   : > { %v2138_v23 = vsel %vm1573_vm3, %v7110_v32, %v7109_v61  ;;  %v2382_v7 = vsel %vm1818_vm4, %v7112_v16, %v7111_v42  ;;  %v3046_v4 = vadd.f32 %v4967_v5, %v4962_v37  ;;  %v878_v56 = vadd.f32 %v4612_v54, %v877_v13  ;;  %v4014_v58 = vpop.f32.mrb[37].mxu0 }
 0x161   : > { %v2245_v31 = vadd.f32 %v2138_v23, %v4812_v10  ;;  %v2694_v49 = vsel %vm1573_vm3, %v7114_v15, %v7113_v57  ;;  %v2838_v10 = vmul.f32 %v4662_v36, %v4872_v0  ;;  %4100 = vmatprep.mubr.bf16.mxu1 %v3146_v62  ;;  %v881_v51 = vadd.f32 %v4612_v54, %v880_v33  ;;  %v888_v45 = vpop.f32.mrb[38].mxu0 }
 0x162   : > { %v5095_v1 = vsel %vm1158_vm1, %v1043_v63, 0.0  ;;  %v886_v44 = vadd.f32 %v4612_v54, %v885_v50  ;;  %v7115_v61 = vrot.slane %v4816_v41, 1  ;;  %v7116_v62 = vrot.slane %v4789_v46, 1  ;;  %v4015_v23 = vpop.f32.mrb[39].mxu0 }
 0x163   : > { %v2489_v28 = vadd.f32 %v2382_v7, %v2245_v31  ;;  %v2936_v25 = vrot.slane %v2838_v10, 2  ;;  %v5105_v37 = vmul.f32 %v4565_v18, %v5095_v1  ;;  %v5109_v5 = vmul.f32 %v4555_v12, %v5095_v1 }
 0x164   : > { %v1586_v32 = vsel %vm1573_vm3, %v7116_v62, %v7115_v61  ;;  %v5113_v33 = vmul.f32 %v4569_v20, %v5095_v1  ;;  %v7119_v41 = vrot.slane %v4922_v35, 2  ;;  %v3085_v31 = vadd.f32 %v5027_v43, %v3046_v4 }
 0x165   : > { %7117 = vst [vmem:[#allocation59_spill] sm:$0xff] %v5105_v37  ;;  %v2557_v13 = vadd.f32 %v2525_v21, %v2489_v28  ;;  %v5119_v42 = vmax.f32 %v878_v56, 0.0  ;;  %v1045_v16 = vmax.f32 %v881_v51, 0.0  ;;  %v1046_v15 = vmax.f32 %v886_v44, 0.0 }
 0x166   : > { %7118 = vst [vmem:[#allocation60_spill] sm:$0xff] %v5113_v33  ;;  %v2938_v46 = vsel %vm1818_vm4, %v2936_v25, %v7119_v41  ;;  %v3117_v10 = vmax.f32 %v3085_v31, 0.0 }
 0x167   : > { %v2801_v57 = vadd.f32 %v2694_v49, %v2557_v13  ;;  %v1397_v21 = vsel %vm1217_vm2, %v1045_v16, 0.0  ;;  %v1452_v35 = vmul.f32 %v4565_v18, %v5119_v42  ;;  %v5129_v50 = vmul.f32 %v4555_v12, %v5119_v42  ;;  %v5146_v61 = vpop.f32.mrb[40].mxu0 }
 0x168   : > { %v1494_v4 = vmul.f32 %v4555_v12, %v1397_v21  ;;  %v5134_v56 = vmul.f32 %v4569_v20, %v5119_v42  ;;  %v1739_v49 = vmul.f32 %v4569_v20, %v1397_v21  ;;  %v5140_v58 = vmul.f32 %v4644_v26, %v5119_v42 }
 0x169   : > { %v3045_v28 = vadd.f32 %v2938_v46, %v2801_v57  ;;  %v6966_v51 = vrot.slane %v5129_v50, 1  ;;  %v2049_v25 = vmul.f32 %v4644_v26, %v1397_v21  ;;  %v5144_v44 = vmul.f32 %v4647_v27, %v1397_v21  ;;  %v4018_v46 = vpop.f32.mrb[41].mxu0 }
 0x16a   : > { %v1602_v13 = vrot.slane %v1494_v4, 1  ;;  %v6967_v23 = vrot.slane %v5134_v56, 2  ;;  %v1847_v41 = vrot.slane %v1739_v49, 2  ;;  %v6968_v31 = vrot.slane %v5140_v58, 1  ;;  %v5155_v7 = vpop.f32.mrb[42].mxu0 }
 0x16b   : > { %v3084_v62 = vadd.f32 %v5027_v43, %v3045_v28  ;;  %v2154_v16 = vrot.slane %v2049_v25, 1  ;;  %v5153_v63 = vmul.f32 %v4653_v30, %v1397_v21  ;;  %v5164_v49 = vmul.f32 %v4662_v36, %v1397_v21  ;;  %v4019_v25 = vpop.f32.mrb[43].mxu0 }
 0x16c   : > { %v1603_v28 = vsel %vm1573_vm3, %v6966_v51, %v1602_v13  ;;  %v1848_v4 = vsel %vm1818_vm4, %v6967_v23, %v1847_v41  ;;  %v5174_v11 = vsel %vm1158_vm1, %v1046_v15, 0.0  ;;  %v889_v15 = vadd.f32 %v4612_v54, %v888_v45 }
 0x16d   : > { %v3116_v60 = vmax.f32 %v3084_v62, 0.0  ;;  %v1697_v46 = vadd.f32 %v1603_v28, %v1452_v35  ;;  %v5169_v57 = vsel %vm1573_vm3, %v6968_v31, %v2154_v16  ;;  %v5179_v21 = vmul.f32 %v4565_v18, %v5174_v11 }
 0x16e   : > { %v5183_v35 = vmul.f32 %v4555_v12, %v5174_v11  ;;  %v5189_v16 = vmul.f32 %v4569_v20, %v5174_v11  ;;  %v7124_v28 = vrot.slane %v4822_v39, 2  ;;  %v7125_v25 = vrot.slane %v4793_v47, 2 }
 0x16f   : > { %v3147_v13 = vpack.c.bf16 %v3117_v10, %v3116_v60  ;;  %7120 = vst [vmem:[#allocation61_spill] sm:$0xff] %v5179_v21  ;;  %v5185_v41 = vadd.f32 %v1848_v4, %v1697_v46  ;;  %v1690_v60 = vadd.f32 %v1586_v32, %v4785_v24  ;;  %v1971_v4 = vmul.f32 %v4641_v22, %v4872_v0  ;;  %v5233_v21 = vpop.f32.mrb[24].mxu1 }
 0x170   : > { %7121 = vst [vmem:[#allocation62_spill] sm:$0xff] %v5183_v35  ;;  %7123 = vst [vmem:[#allocation64_spill] sm:$0xff] %v5189_v16  ;;  %v1831_v23 = vsel %vm1818_vm4, %v7125_v25, %v7124_v28  ;;  %v1972_v46 = vmul.f32 %v4641_v22, %v4892_v40  ;;  %v5204_v45 = vmax.f32 %v889_v15, 0.0  ;;  %v2041_v32 = vmul.f32 %v4644_v26, %v4872_v0 }
 0x171   : > { %7122 = vst [vmem:[#allocation63_spill] sm:$0xff] %v5185_v41  ;;  %4101 = vmatmul.mubr.bf16.vlgmr.msra.gmra.mrb[36].mxu1 %v3147_v13  ;;  %v1935_v24 = vadd.f32 %v1831_v23, %v1690_v60  ;;  %v5208_v13 = vpop.f32.mrb[44].mxu0  ;;  %v2285_v39 = vmul.f32 %v4647_v27, %v4872_v0  ;;  %v2286_v28 = vmul.f32 %v4647_v27, %v4892_v40  ;;  %7127 = vst [vmem:[#allocation65_spill] sm:$0xff] %v5233_v21 }
 0x172   : > { %v2004_v47 = vadd.f32 %v1972_v46, %v4890_v2  ;;  %v2527_v25 = vmul.f32 %v4650_v29, %v4957_v55  ;;  %v4022_v31 = vpop.f32.mrb[45].mxu0  ;;  %v2141_v10 = vrot.slane %v2041_v32, 1  ;;  %v2528_v23 = vmul.f32 %v4650_v29, %v4983_v53 }
 0x173   : > { %v2003_v15 = vadd.f32 %v1971_v4, %v1935_v24  ;;  %v2597_v60 = vmul.f32 %v4653_v30, %v4957_v55  ;;  %v5221_v51 = vpop.f32.mrb[46].mxu0  ;;  %v2385_v0 = vrot.slane %v2285_v39, 2  ;;  %v2386_v46 = vrot.slane %v2286_v28, 2  ;;  %v7128_v39 = vld [vmem:[#allocation50_spill] sm:$0xff] }
 0x174   : > { %v2248_v2 = vadd.f32 %v4950_v34, %v2004_v47  ;;  %v2598_v40 = vmul.f32 %v4653_v30, %v4983_v53  ;;  %v4023_v62 = vpop.f32.mrb[47].mxu0  ;;  %v7126_v31 = vrot.slane %v4912_v52, 1  ;;  %v2841_v32 = vmul.f32 %v4662_v36, %v4957_v55  ;;  %v4074_v52 = vpop.f32.mrb[25].mxu1 }
 0x175   : > { %v2697_v24 = vrot.slane %v2597_v60, 1  ;;  %v2842_v16 = vmul.f32 %v4662_v36, %v4983_v53  ;;  %v2387_v47 = vsel %vm1818_vm4, %v2385_v0, %v2386_v46  ;;  %v7129_v28 = vrot.slane %v7128_v39, 2  ;;  %v7137_v39 = vld [vmem:[#allocation46_spill] sm:$0xff] }
 0x176   : > { %v2143_v4 = vsel %vm1573_vm3, %v2141_v10, %v7126_v31  ;;  %v2698_v35 = vrot.slane %v2598_v40, 1  ;;  %v2941_v10 = vrot.slane %v2841_v32, 2  ;;  %v894_v31 = vadd.f32 %v4612_v54, %v5146_v61  ;;  %v5253_v61 = vpop.f32.mrb[26].mxu1 }
 0x177   : > { %v2247_v34 = vadd.f32 %v2143_v4, %v2003_v15  ;;  %v2389_v62 = vsel %vm1818_vm4, %v2386_v46, %v7129_v28  ;;  %v2942_v60 = vrot.slane %v2842_v16, 2  ;;  %v7130_v21 = vrot.slane %v5043_v19, 1  ;;  %v5251_v32 = vpop.f32.mrb[48].mxu0  ;;  %7132 = vst [vmem:[#allocation50_spill] sm:$0xff] %v5253_v61 }
 0x178   : > { %v2492_v41 = vadd.f32 %v2389_v62, %v2248_v2  ;;  %v2699_v33 = vsel %vm1573_vm3, %v2697_v24, %v2698_v35  ;;  %v1454_v0 = vmul.f32 %v4565_v18, %v5204_v45  ;;  %v7131_v2 = vrot.slane %v5046_v9, 2  ;;  %v4026_v9 = vpop.f32.mrb[49].mxu0 }
 0x179   : > { %v2491_v37 = vadd.f32 %v2387_v47, %v2247_v34  ;;  %v2701_v15 = vsel %vm1573_vm3, %v2698_v35, %v7130_v21  ;;  %v2943_v46 = vsel %vm1818_vm4, %v2941_v10, %v2942_v60  ;;  %v1048_v40 = vmax.f32 %v894_v31, 0.0  ;;  %v5276_v52 = vpop.f32.mrb[50].mxu0 }
 0x17a   : > { %v2560_v4 = vadd.f32 %v2528_v23, %v2492_v41  ;;  %v2945_v16 = vsel %vm1818_vm4, %v2942_v60, %v7131_v2  ;;  %v5257_v19 = vmul.f32 %v4555_v12, %v5204_v45  ;;  %v5261_v21 = vmul.f32 %v4569_v20, %v5204_v45  ;;  %v4075_v41 = vpop.f32.mrb[27].mxu1 }
 0x17b   : > { %v2559_v24 = vadd.f32 %v2527_v25, %v2491_v37  ;;  %v5265_v35 = vmul.f32 %v4644_v26, %v5204_v45  ;;  %v1400_v34 = vsel %vm1217_vm2, %v1048_v40, 0.0  ;;  %v897_v37 = vadd.f32 %v4612_v54, %v5155_v7  ;;  %v7135_v25 = vld [vmem:[#allocation48_spill] sm:$0xff] }
 0x17c   : > { %7133 = vst [vmem:[#allocation66_spill] sm:$0xff] %v5257_v19  ;;  %7134 = vst [vmem:[#allocation67_spill] sm:$0xff] %v5261_v21  ;;  %v2804_v23 = vadd.f32 %v2701_v15, %v2560_v4  ;;  %v7136_v47 = vrot.slane %v7135_v25, 1  ;;  %v7138_v28 = vrot.slane %v7137_v39, 1  ;;  %v1497_v60 = vmul.f32 %v4555_v12, %v1400_v34  ;;  %v4027_v4 = vpop.f32.mrb[51].mxu0 }
 0x17d   : > { %v2803_v10 = vadd.f32 %v2699_v33, %v2559_v24  ;;  %v6972_v31 = vrot.slane %v5257_v19, 1  ;;  %v1742_v15 = vmul.f32 %v4569_v20, %v1400_v34  ;;  %v6973_v40 = vrot.slane %v5261_v21, 2 }
 0x17e   : > { %v1591_v62 = vsel %vm1573_vm3, %v7138_v28, %v7136_v47  ;;  %v3048_v2 = vadd.f32 %v2945_v16, %v2804_v23  ;;  %v2052_v54 = vmul.f32 %v4644_v26, %v1400_v34  ;;  %v6974_v7 = vrot.slane %v5265_v35, 1 }
 0x17f   : > { %v3047_v9 = vadd.f32 %v2943_v46, %v2803_v10  ;;  %v1607_v41 = vrot.slane %v1497_v60, 1  ;;  %v1852_v25 = vrot.slane %v1742_v15, 2  ;;  %v5285_v47 = vmul.f32 %v4647_v27, %v1400_v34 }
 0x180   : > { %v3087_v33 = vadd.f32 %v5027_v43, %v3048_v2  ;;  %v2159_v24 = vrot.slane %v2052_v54, 1  ;;  %v5289_v39 = vmul.f32 %v4653_v30, %v1400_v34  ;;  %v5292_v16 = vmul.f32 %v4662_v36, %v1400_v34  ;;  %v5308_v2 = vpop.f32.mrb[52].mxu0 }
 0x181   : > { %7139 = vst [vmem:[#allocation48_spill] sm:$0xff] %v5285_v47  ;;  %v3086_v23 = vadd.f32 %v5027_v43, %v3047_v9  ;;  %v1608_v46 = vsel %vm1573_vm3, %v6972_v31, %v1607_v41  ;;  %v1853_v28 = vsel %vm1818_vm4, %v6973_v40, %v1852_v25  ;;  %v1049_v41 = vmax.f32 %v897_v37, 0.0  ;;  %v7140_v31 = vld [vmem:[#allocation45_spill] sm:$0xff]  ;;  %v4030_v25 = vpop.f32.mrb[53].mxu0 }
 0x182   : > { %v3119_v60 = vmax.f32 %v3087_v33, 0.0  ;;  %v1699_v15 = vadd.f32 %v1608_v46, %v1454_v0  ;;  %v5305_v4 = vsel %vm1573_vm3, %v6974_v7, %v2159_v24  ;;  %v1692_v61 = vadd.f32 %v1591_v62, %v7140_v31  ;;  %v7142_v33 = vld [vmem:[#allocation49_spill] sm:$0xff]  ;;  %v7144_v46 = vld [vmem:[#allocation47_spill] sm:$0xff]  ;;  %v5323_v34 = vpop.f32.mrb[54].mxu0 }
 0x183   : > { %v3118_v54 = vmax.f32 %v3086_v23, 0.0  ;;  %v7143_v0 = vrot.slane %v7142_v33, 2  ;;  %v7145_v10 = vrot.slane %v7144_v46, 2  ;;  %v1973_v7 = vmul.f32 %v4641_v22, %v4957_v55 }
 0x184   : > { %v5312_v40 = vadd.f32 %v1853_v28, %v1699_v15  ;;  %v1974_v23 = vmul.f32 %v4641_v22, %v4983_v53  ;;  %v5327_v62 = vsel %vm1158_vm1, %v1049_v41, 0.0  ;;  %v2044_v28 = vmul.f32 %v4644_v26, %v4957_v55  ;;  %v4031_v15 = vpop.f32.mrb[55].mxu0 }
 0x185   : > { %v1836_v24 = vsel %vm1818_vm4, %v7145_v10, %v7143_v0  ;;  %v3148_v37 = vpack.c.bf16 %v3119_v60, %v3118_v54  ;;  %v5333_v10 = vmul.f32 %v4565_v18, %v5327_v62  ;;  %v5337_v25 = vmul.f32 %v4555_v12, %v5327_v62  ;;  %v7149_v54 = vld [vmem:[#allocation54_spill] sm:$0xff] }
 0x186   : > { %7141 = vst [vmem:[#allocation46_spill] sm:$0xff] %v5312_v40  ;;  %v1937_v31 = vadd.f32 %v1836_v24, %v1692_v61  ;;  %v5341_v60 = vmul.f32 %v4569_v20, %v5327_v62  ;;  %v2006_v41 = vadd.f32 %v1974_v23, %v7149_v54  ;;  %v2146_v33 = vrot.slane %v2044_v28, 1 }
 0x187   : > { %7146 = vst [vmem:[#allocation45_spill] sm:$0xff] %v5333_v10  ;;  %7147 = vst [vmem:[#allocation49_spill] sm:$0xff] %v5337_v25  ;;  %4104 = vmatprep.mubr.bf16.mxu1 %v3148_v37  ;;  %v2288_v0 = vmul.f32 %v4647_v27, %v4957_v55  ;;  %v2289_v46 = vmul.f32 %v4647_v27, %v4983_v53  ;;  %v2529_v10 = vmul.f32 %v4650_v29, %v5095_v1 }
 0x188   : > { %7148 = vst [vmem:[#allocation47_spill] sm:$0xff] %v5341_v60  ;;  %v2005_v61 = vadd.f32 %v1973_v7, %v1937_v31  ;;  %v2250_v9 = vadd.f32 %v5064_v48, %v2006_v41  ;;  %v7150_v23 = vrot.slane %v5016_v6, 1  ;;  %v2530_v55 = vmul.f32 %v4650_v29, %v5119_v42  ;;  %v5364_v41 = vpop.f32.mrb[56].mxu0 }
 0x189   : > { %v2390_v37 = vrot.slane %v2288_v0, 2  ;;  %v2391_v31 = vrot.slane %v2289_v46, 2  ;;  %v2600_v53 = vmul.f32 %v4653_v30, %v5095_v1  ;;  %v2601_v54 = vmul.f32 %v4653_v30, %v5119_v42  ;;  %7151 = vst [vmem:[#allocation54_spill] sm:$0xff] %v5364_v41  ;;  %v5375_v46 = vld [vmem:[%s6931_s4] ss:$0 sm:$0xff] }
 0x18a   : > { %v2148_v7 = vsel %vm1573_vm3, %v2146_v33, %v7150_v23  ;;  %v2844_v48 = vmul.f32 %v4662_v36, %v5095_v1  ;;  %v7152_v33 = vrot.slane %v5040_v38, 2  ;;  %v902_v23 = vadd.f32 %v5375_v46, %v5208_v13 }
 0x18b   : > { %v2249_v28 = vadd.f32 %v2148_v7, %v2005_v61  ;;  %v2392_v6 = vsel %vm1818_vm4, %v2390_v37, %v2391_v31  ;;  %v2845_v61 = vmul.f32 %v4662_v36, %v5119_v42  ;;  %v4034_v7 = vpop.f32.mrb[57].mxu0  ;;  %v2702_v60 = vrot.slane %v2600_v53, 1 }
 0x18c   : > { %v2394_v0 = vsel %vm1818_vm4, %v2391_v31, %v7152_v33  ;;  %v2703_v37 = vrot.slane %v2601_v54, 1  ;;  %v5379_v25 = vpop.f32.mrb[58].mxu0  ;;  %v2946_v38 = vrot.slane %v2844_v48, 2  ;;  %v5381_v33 = vmax.f32 %v902_v23, 0.0 }
 0x18d   : > { %v2493_v15 = vadd.f32 %v2392_v6, %v2249_v28  ;;  %v2494_v24 = vadd.f32 %v2394_v0, %v2250_v9  ;;  %v2947_v31 = vrot.slane %v2845_v61, 2  ;;  %v905_v40 = vadd.f32 %v5375_v46, %v5221_v51  ;;  %v4035_v21 = vpop.f32.mrb[59].mxu0  ;;  %v5395_v51 = vpop.f32.mrb[28].mxu1 }
 0x18e   : > { %v2704_v47 = vsel %vm1573_vm3, %v2702_v60, %v2703_v37  ;;  %v7153_v13 = vrot.slane %v5153_v63, 1  ;;  %v7154_v53 = vrot.slane %v5164_v49, 2  ;;  %v1456_v6 = vmul.f32 %v4565_v18, %v5381_v33  ;;  %7155 = vst [vmem:[#allocation68_spill] sm:$0xff] %v5395_v51 }
 0x18f   : > { %v2561_v19 = vadd.f32 %v2529_v10, %v2493_v15  ;;  %v2562_v41 = vadd.f32 %v2530_v55, %v2494_v24  ;;  %v2948_v28 = vsel %vm1818_vm4, %v2946_v38, %v2947_v31  ;;  %v1051_v48 = vmax.f32 %v905_v40, 0.0  ;;  %v4078_v24 = vpop.f32.mrb[29].mxu1  ;;  %v5417_v23 = vpop.f32.mrb[60].mxu0 }
 0x190   : > { %v2706_v9 = vsel %vm1573_vm3, %v2703_v37, %v7153_v13  ;;  %v2950_v54 = vsel %vm1818_vm4, %v2947_v31, %v7154_v53  ;;  %v5399_v60 = vmul.f32 %v4555_v12, %v5381_v33  ;;  %v5403_v63 = vmul.f32 %v4569_v20, %v5381_v33  ;;  %v1016_v15 = vpop.f32.mrb[30].mxu1  ;;  %v4038_v13 = vpop.f32.mrb[61].mxu0 }
 0x191   : > { %v2805_v21 = vadd.f32 %v2704_v47, %v2561_v19  ;;  %v2806_v10 = vadd.f32 %v2706_v9, %v2562_v41  ;;  %v1403_v49 = vsel %vm1217_vm2, %v1051_v48, 0.0  ;;  %v5409_v40 = vmul.f32 %v4644_v26, %v5381_v33  ;;  %v4079_v7 = vpop.f32.mrb[31].mxu1 }
 0x192   : > { %7156 = vst [vmem:[#allocation69_spill] sm:$0xff] %v5403_v63  ;;  %v910_v19 = vadd.f32 %v5375_v46, %v5251_v32  ;;  %v913_v47 = vadd.f32 %v5375_v46, %v5276_v52  ;;  %v1500_v0 = vmul.f32 %v4555_v12, %v1403_v49  ;;  %v6980_v61 = vrot.slane %v5399_v60, 1 }
 0x193   : > { %v3049_v55 = vadd.f32 %v2948_v28, %v2805_v21  ;;  %v3050_v41 = vadd.f32 %v2950_v54, %v2806_v10  ;;  %v1745_v37 = vmul.f32 %v4569_v20, %v1403_v49  ;;  %v6981_v38 = vrot.slane %v5403_v63, 2  ;;  %v5428_v54 = vpop.f32.mrb[62].mxu0 }
 0x194   : > { %v2055_v31 = vmul.f32 %v4644_v26, %v1403_v49  ;;  %v6983_v32 = vrot.slane %v5409_v40, 1  ;;  %v1612_v28 = vrot.slane %v1500_v0, 1  ;;  %v5426_v53 = vmul.f32 %v4647_v27, %v1403_v49  ;;  %v4039_v15 = vpop.f32.mrb[63].mxu0 }
 0x195   : > { %v3088_v52 = vadd.f32 %v5027_v43, %v3049_v55  ;;  %v3089_v9 = vadd.f32 %v5027_v43, %v3050_v41  ;;  %v1857_v48 = vrot.slane %v1745_v37, 2  ;;  %v5431_v10 = vmul.f32 %v4653_v30, %v1403_v49 }
 0x196   : > { %v2164_v21 = vrot.slane %v2055_v31, 1  ;;  %v5434_v24 = vmul.f32 %v4662_v36, %v1403_v49  ;;  %v1613_v55 = vsel %vm1573_vm3, %v6980_v61, %v1612_v28  ;;  %v1052_v15 = vmax.f32 %v910_v19, 0.0  ;;  %v7162_v19 = vld [vmem:[#allocation52_spill] sm:$0xff] }
 0x197   : > { %v3120_v7 = vmax.f32 %v3088_v52, 0.0  ;;  %v3121_v13 = vmax.f32 %v3089_v9, 0.0  ;;  %v1701_v0 = vadd.f32 %v1613_v55, %v1456_v6  ;;  %v1858_v37 = vsel %vm1818_vm4, %v6981_v38, %v1857_v48  ;;  %v7160_v38 = vld [vmem:[#allocation53_spill] sm:$0xff]  ;;  %v5473_v41 = vpop.f32.mrb[64].mxu0 }
 0x198   : > { %v5446_v31 = vsel %vm1573_vm3, %v6983_v32, %v2164_v21  ;;  %v5450_v51 = vmax.f32 %v913_v47, 0.0  ;;  %v7159_v48 = vrot.slane %v5004_v59, 1  ;;  %v7161_v63 = vrot.slane %v7160_v38, 1 }
 0x199   : > { %v3149_v52 = vpack.c.bf16 %v3121_v13, %v3120_v7  ;;  %v5452_v28 = vadd.f32 %v1858_v37, %v1701_v0  ;;  %v5463_v7 = vsel %vm1158_vm1, %v1052_v15, 0.0  ;;  %v7163_v13 = vrot.slane %v5008_v17, 2  ;;  %v7164_v0 = vld [vmem:[#allocation55_spill] sm:$0xff]  ;;  %v4042_v15 = vpop.f32.mrb[65].mxu0 }
 0x19a   : > { %v1596_v21 = vsel %vm1573_vm3, %v7161_v63, %v7159_v48  ;;  %v7165_v37 = vrot.slane %v7164_v0, 2  ;;  %v1975_v59 = vmul.f32 %v4641_v22, %v5095_v1  ;;  %v5477_v63 = vmul.f32 %v4565_v18, %v5463_v7  ;;  %v5495_v0 = vpop.f32.mrb[66].mxu0 }
 0x19b   : > { %4105 = vmatmul.mubr.bf16.gmra.mrb[40].mxu1 %v3149_v52  ;;  %v1694_v47 = vadd.f32 %v1596_v21, %v7162_v19  ;;  %v5481_v38 = vmul.f32 %v4555_v12, %v5463_v7  ;;  %v5485_v17 = vmul.f32 %v4569_v20, %v5463_v7  ;;  %v1976_v52 = vmul.f32 %v4641_v22, %v5119_v42 }
 0x19c   : > { %v1841_v55 = vsel %vm1818_vm4, %v7165_v37, %v7163_v13  ;;  %7166 = vst [vmem:[#allocation53_spill] sm:$0xff] %v5477_v63  ;;  %v2047_v21 = vmul.f32 %v4644_v26, %v5095_v1  ;;  %v2291_v19 = vmul.f32 %v4647_v27, %v5095_v1  ;;  %v2292_v13 = vmul.f32 %v4647_v27, %v5119_v42 }
 0x19d   : > { %7167 = vst [vmem:[#allocation52_spill] sm:$0xff] %v5481_v38  ;;  %7168 = vst [vmem:[#allocation55_spill] sm:$0xff] %v5485_v17  ;;  %v1939_v48 = vadd.f32 %v1841_v55, %v1694_v47  ;;  %v2008_v9 = vadd.f32 %v1976_v52, %v5080_v3  ;;  %v2531_v55 = vmul.f32 %v4650_v29, %v5174_v11  ;;  %v4043_v47 = vpop.f32.mrb[67].mxu0  ;;  %v7169_v3 = vrot.slane %v5140_v58, 1  ;;  %v7171_v58 = vld [vmem:[#allocation39_spill] sm:$0xff] }
 0x19e   : > { %v2151_v49 = vrot.slane %v2047_v21, 1  ;;  %v2395_v61 = vrot.slane %v2291_v19, 2  ;;  %v2396_v6 = vrot.slane %v2292_v13, 2  ;;  %v2532_v42 = vmul.f32 %v4650_v29, %v5204_v45 }
 0x19f   : > { %v2007_v15 = vadd.f32 %v1975_v59, %v1939_v48  ;;  %v2252_v1 = vadd.f32 %v5169_v57, %v2008_v9  ;;  %v2603_v37 = vmul.f32 %v4653_v30, %v5174_v11  ;;  %v2604_v32 = vmul.f32 %v4653_v30, %v5204_v45 }
 0x1a0   : > { %v2153_v52 = vsel %vm1573_vm3, %v2151_v49, %v7169_v3  ;;  %v2397_v59 = vsel %vm1818_vm4, %v2395_v61, %v2396_v6  ;;  %v7170_v48 = vrot.slane %v5144_v44, 2  ;;  %v2847_v57 = vmul.f32 %v4662_v36, %v5174_v11  ;;  %v5524_v44 = vpop.f32.mrb[68].mxu0 }
 0x1a1   : > { %v2251_v9 = vadd.f32 %v2153_v52, %v2007_v15  ;;  %v2707_v13 = vrot.slane %v2603_v37, 1  ;;  %v2708_v47 = vrot.slane %v2604_v32, 1  ;;  %v2848_v17 = vmul.f32 %v4662_v36, %v5204_v45  ;;  %7172 = vst [vmem:[#allocation39_spill] sm:$0xff] %v5524_v44  ;;  %v4046_v37 = vpop.f32.mrb[69].mxu0 }
 0x1a2   : > { %v2399_v21 = vsel %vm1818_vm4, %v2396_v6, %v7170_v48  ;;  %v2951_v63 = vrot.slane %v2847_v57, 2  ;;  %v969_v49 = vadd.f32 %v5375_v46, %v7171_v58  ;;  %v918_v61 = vadd.f32 %v5375_v46, %v5308_v2  ;;  %v5532_v58 = vpop.f32.mrb[70].mxu0 }
 0x1a3   : > { %v2496_v19 = vadd.f32 %v2399_v21, %v2252_v1  ;;  %v2495_v6 = vadd.f32 %v2397_v59, %v2251_v9  ;;  %v2709_v48 = vsel %vm1573_vm3, %v2707_v13, %v2708_v47  ;;  %v7173_v15 = vrot.slane %v5289_v39, 1  ;;  %7174 = vst [vmem:[#allocation70_spill] sm:$0xff] %v5532_v58  ;;  %v4047_v59 = vpop.f32.mrb[71].mxu0 }
 0x1a4   : > { %v2952_v1 = vrot.slane %v2848_v17, 2  ;;  %v1067_v52 = vmax.f32 %v969_v49, 0.0  ;;  %v1054_v21 = vmax.f32 %v918_v61, 0.0  ;;  %v1458_v57 = vmul.f32 %v4565_v18, %v5450_v51 }
 0x1a5   : > { %v2564_v3 = vadd.f32 %v2532_v42, %v2496_v19  ;;  %v2711_v32 = vsel %vm1573_vm3, %v2708_v47, %v7173_v15  ;;  %v2563_v2 = vadd.f32 %v2531_v55, %v2495_v6  ;;  %v5536_v42 = vmul.f32 %v4555_v12, %v5450_v51 }
 0x1a6   : > { %v5540_v39 = vmul.f32 %v4569_v20, %v5450_v51  ;;  %v2953_v17 = vsel %vm1818_vm4, %v2951_v63, %v2952_v1  ;;  %v7177_v9 = vrot.slane %v5292_v16, 2  ;;  %v5548_v13 = vsel %vm1158_vm1, %v1067_v52, 0.0  ;;  %v1021_v16 = vpop.f32.mrb[32].mxu1 }
 0x1a7   : > { %v2808_v38 = vadd.f32 %v2711_v32, %v2564_v3  ;;  %7175 = vst [vmem:[#allocation71_spill] sm:$0xff] %v5536_v42  ;;  %7178 = vst [vmem:[#allocation73_spill] sm:$0xff] %v5548_v13  ;;  %v1406_v55 = vsel %vm1217_vm2, %v1054_v21, 0.0  ;;  %v2807_v47 = vadd.f32 %v2709_v48, %v2563_v2  ;;  %v5554_v61 = vmul.f32 %v4565_v18, %v5548_v13 }
 0x1a8   : > { %7176 = vst [vmem:[#allocation72_spill] sm:$0xff] %v5540_v39  ;;  %v2955_v19 = vsel %vm1818_vm4, %v2952_v1, %v7177_v9  ;;  %v5558_v63 = vmul.f32 %v4555_v12, %v5548_v13  ;;  %v5562_v6 = vmul.f32 %v4569_v20, %v5548_v13  ;;  %v1503_v3 = vmul.f32 %v4555_v12, %v1406_v55 }
 0x1a9   : > { %v3052_v49 = vadd.f32 %v2955_v19, %v2808_v38  ;;  %7179 = vst [vmem:[#allocation74_spill] sm:$0xff] %v5554_v61  ;;  %v1748_v48 = vmul.f32 %v4569_v20, %v1406_v55  ;;  %v4082_v38 = vpop.f32.mrb[33].mxu1  ;;  %v3051_v32 = vadd.f32 %v2953_v17, %v2807_v47  ;;  %v6987_v52 = vrot.slane %v5540_v39, 2 }
 0x1aa   : > { %7180 = vst [vmem:[#allocation75_spill] sm:$0xff] %v5558_v63  ;;  %7181 = vst [vmem:[#allocation76_spill] sm:$0xff] %v5562_v6  ;;  %v1024_v21 = vpop.f32.mrb[34].mxu1  ;;  %v1617_v59 = vrot.slane %v1503_v3, 1  ;;  %v5573_v19 = vmul.f32 %v4644_v26, %v5450_v51  ;;  %v2058_v17 = vmul.f32 %v4644_v26, %v1406_v55  ;;  %v5578_v47 = vmul.f32 %v4647_v27, %v1406_v55 }
 0x1ab   : > { %v3091_v37 = vadd.f32 %v5027_v43, %v3052_v49  ;;  %v1862_v9 = vrot.slane %v1748_v48, 2  ;;  %v4083_v16 = vpop.f32.mrb[35].mxu1  ;;  %v3090_v15 = vadd.f32 %v5027_v43, %v3051_v32  ;;  %v7182_v49 = vrot.slane %v5536_v42, 1 }
 0x1ac   : > { %v5588_v16 = vmul.f32 %v4653_v30, %v1406_v55  ;;  %v2169_v2 = vrot.slane %v2058_v17, 1  ;;  %v5593_v61 = vmul.f32 %v4662_v36, %v1406_v55  ;;  %v7186_v17 = vld [vmem:[#allocation41_spill] sm:$0xff]  ;;  %v2050_v58 = vmul.f32 %v4644_v26, %v5174_v11 }
 0x1ad   : > { %v3123_v38 = vmax.f32 %v3091_v37, 0.0  ;;  %v1618_v21 = vsel %vm1573_vm3, %v7182_v49, %v1617_v59  ;;  %v1863_v3 = vsel %vm1818_vm4, %v6987_v52, %v1862_v9  ;;  %v3122_v32 = vmax.f32 %v3090_v15, 0.0  ;;  %v7183_v59 = vld [vmem:[#allocation40_spill] sm:$0xff] }
 0x1ae   : > { %v1703_v37 = vadd.f32 %v1618_v21, %v1458_v57  ;;  %v974_v49 = vadd.f32 %v5375_v46, %v7183_v59  ;;  %v921_v9 = vadd.f32 %v5375_v46, %v5323_v34  ;;  %v7185_v15 = vrot.slane %v5573_v19, 1  ;;  %v7188_v59 = vld [vmem:[#allocation43_spill] sm:$0xff] }
 0x1af   : > { %v3150_v52 = vpack.c.bf16 %v3123_v38, %v3122_v32  ;;  %v977_v21 = vadd.f32 %v5375_v46, %v7186_v17  ;;  %v982_v63 = vadd.f32 %v5375_v46, %v7188_v59  ;;  %v7189_v38 = vld [vmem:[#allocation44_spill] sm:$0xff]  ;;  %v7190_v32 = vrot.slane %v5129_v50, 1 }
 0x1b0   : > { %v5599_v48 = vadd.f32 %v1863_v3, %v1703_v37  ;;  %v5604_v57 = vsel %vm1573_vm3, %v7185_v15, %v2169_v2  ;;  %v5609_v1 = vmax.f32 %v974_v49, 0.0  ;;  %v1055_v6 = vmax.f32 %v921_v9, 0.0  ;;  %v7193_v17 = vld [vmem:[#allocation60_spill] sm:$0xff] }
 0x1b1   : > { %4108 = vmatprep.mubr.bf16.mxu1 %v3150_v52  ;;  %v1069_v34 = vmax.f32 %v977_v21, 0.0  ;;  %v985_v3 = vadd.f32 %v5375_v46, %v7189_v38  ;;  %v7191_v2 = vrot.slane %v5109_v5, 1  ;;  %v7192_v15 = vrot.slane %v5134_v56, 2 }
 0x1b2   : > { %7184 = vst [vmem:[#allocation40_spill] sm:$0xff] %v5599_v48  ;;  %7187 = vst [vmem:[#allocation41_spill] sm:$0xff] %v5609_v1  ;;  %v7194_v49 = vrot.slane %v7193_v17, 2  ;;  %v5627_v59 = vsel %vm1158_vm1, %v1055_v6, 0.0  ;;  %v1468_v52 = vmul.f32 %v4565_v18, %v5609_v1  ;;  %v5633_v50 = vmul.f32 %v4555_v12, %v5609_v1 }
 0x1b3   : > { %v1601_v37 = vsel %vm1573_vm3, %v7191_v2, %v7190_v32  ;;  %v5637_v5 = vmul.f32 %v4569_v20, %v5609_v1  ;;  %v5641_v56 = vmul.f32 %v4565_v18, %v5627_v59  ;;  %v5645_v21 = vmul.f32 %v4555_v12, %v5627_v59 }
 0x1b4   : > { %v1846_v9 = vsel %vm1818_vm4, %v7194_v49, %v7192_v15  ;;  %7195 = vst [vmem:[#allocation43_spill] sm:$0xff] %v5633_v50  ;;  %v5649_v6 = vmul.f32 %v4569_v20, %v5627_v59  ;;  %v1421_v38 = vsel %vm1217_vm2, %v1069_v34, 0.0  ;;  %v5661_v13 = vmul.f32 %v4644_v26, %v5609_v1 }
 0x1b5   : > { %7196 = vst [vmem:[#allocation44_spill] sm:$0xff] %v5637_v5  ;;  %7197 = vst [vmem:[#allocation60_spill] sm:$0xff] %v5641_v56  ;;  %v1518_v32 = vmul.f32 %v4555_v12, %v1421_v38  ;;  %v1763_v15 = vmul.f32 %v4569_v20, %v1421_v38  ;;  %v2073_v56 = vmul.f32 %v4644_v26, %v1421_v38  ;;  %v1070_v55 = vmax.f32 %v982_v63, 0.0 }
 0x1b6   : > { %7198 = vst [vmem:[#allocation77_spill] sm:$0xff] %v5645_v21  ;;  %7199 = vst [vmem:[#allocation78_spill] sm:$0xff] %v5649_v6  ;;  %v5665_v39 = vmul.f32 %v4647_v27, %v1421_v38  ;;  %v5668_v2 = vmul.f32 %v4653_v30, %v1421_v38  ;;  %v6997_v17 = vrot.slane %v5661_v13, 1  ;;  %v5672_v49 = vmul.f32 %v4662_v36, %v1421_v38 }
 0x1b7   : > { %7200 = vst [vmem:[#allocation79_spill] sm:$0xff] %v5661_v13  ;;  %v1642_v48 = vrot.slane %v1518_v32, 1  ;;  %v1887_v34 = vrot.slane %v1763_v15, 2  ;;  %v2194_v42 = vrot.slane %v2073_v56, 1  ;;  %v7204_v1 = vrot.slane %v5633_v50, 1 }
 0x1b8   : > { %7201 = vst [vmem:[#allocation80_spill] sm:$0xff] %v5665_v39  ;;  %7202 = vst [vmem:[#allocation81_spill] sm:$0xff] %v5668_v2  ;;  %v7205_v32 = vrot.slane %v5637_v5, 2  ;;  %v5690_v38 = vsel %vm1158_vm1, %v1070_v55, 0.0  ;;  %v1977_v55 = vmul.f32 %v4641_v22, %v5174_v11  ;;  %v1978_v21 = vmul.f32 %v4641_v22, %v5204_v45 }
 0x1b9   : > { %7203 = vst [vmem:[#allocation82_spill] sm:$0xff] %v5672_v49  ;;  %v1643_v6 = vsel %vm1573_vm3, %v7204_v1, %v1642_v48  ;;  %v5685_v56 = vsel %vm1573_vm3, %v6997_v17, %v2194_v42  ;;  %7207 = vst [vmem:[#allocation84_spill] sm:$0xff] %v5690_v38  ;;  %v5694_v1 = vmul.f32 %v4565_v18, %v5690_v38  ;;  %v5704_v42 = vmax.f32 %v985_v3, 0.0 }
 0x1ba   : > { %v1888_v15 = vsel %vm1818_vm4, %v7205_v32, %v1887_v34  ;;  %v1713_v44 = vadd.f32 %v1643_v6, %v1468_v52  ;;  %7206 = vst [vmem:[#allocation83_spill] sm:$0xff] %v5685_v56  ;;  %v5698_v48 = vmul.f32 %v4555_v12, %v5690_v38  ;;  %v5702_v52 = vmul.f32 %v4569_v20, %v5690_v38  ;;  %v7213_v34 = vld [vmem:[#allocation59_spill] sm:$0xff]  ;;  %v7218_v56 = vld [vmem:[#allocation54_spill] sm:$0xff] }
 0x1bb   : > { %7208 = vst [vmem:[#allocation85_spill] sm:$0xff] %v5694_v1  ;;  %7211 = vst [vmem:[#allocation88_spill] sm:$0xff] %v5704_v42  ;;  %v1696_v32 = vadd.f32 %v1601_v37, %v7213_v34  ;;  %v2294_v3 = vmul.f32 %v4647_v27, %v5174_v11  ;;  %v2295_v37 = vmul.f32 %v4647_v27, %v5204_v45  ;;  %v7215_v45 = vrot.slane %v5265_v35, 1 }
 0x1bc   : > { %7209 = vst [vmem:[#allocation86_spill] sm:$0xff] %v5698_v48  ;;  %7210 = vst [vmem:[#allocation87_spill] sm:$0xff] %v5702_v52  ;;  %v5706_v6 = vadd.f32 %v1888_v15, %v1713_v44  ;;  %v7214_v15 = vld [vmem:[#allocation63_spill] sm:$0xff]  ;;  %v2533_v34 = vmul.f32 %v4650_v29, %v5327_v62  ;;  %v2534_v63 = vmul.f32 %v4650_v29, %v5381_v33  ;;  %v7219_v13 = vrot.slane %v5431_v10, 1 }
 0x1bd   : > { %v1941_v44 = vadd.f32 %v1846_v9, %v1696_v32  ;;  %v2010_v1 = vadd.f32 %v1978_v21, %v7214_v15  ;;  %v2400_v5 = vrot.slane %v2294_v3, 2  ;;  %v2606_v17 = vmul.f32 %v4653_v30, %v5327_v62 }
 0x1be   : > { %7212 = vst [vmem:[#allocation89_spill] sm:$0xff] %v5706_v6  ;;  %v2156_v6 = vrot.slane %v2050_v58, 1  ;;  %v2401_v9 = vrot.slane %v2295_v37, 2  ;;  %v2607_v21 = vmul.f32 %v4653_v30, %v5381_v33  ;;  %v2850_v58 = vmul.f32 %v4662_v36, %v5327_v62 }
 0x1bf   : > { %v2009_v52 = vadd.f32 %v1977_v55, %v1941_v44  ;;  %v2254_v11 = vadd.f32 %v5305_v4, %v2010_v1  ;;  %v2712_v15 = vrot.slane %v2606_v17, 1  ;;  %v2851_v3 = vmul.f32 %v4662_v36, %v5381_v33  ;;  %v7216_v44 = vld [vmem:[#allocation48_spill] sm:$0xff] }
 0x1c0   : > { %v2158_v32 = vsel %vm1573_vm3, %v2156_v6, %v7215_v45  ;;  %v2402_v55 = vsel %vm1818_vm4, %v2400_v5, %v2401_v9  ;;  %v7217_v4 = vrot.slane %v7216_v44, 2  ;;  %v2713_v37 = vrot.slane %v2607_v21, 1 }
 0x1c1   : > { %v2253_v48 = vadd.f32 %v2158_v32, %v2009_v52  ;;  %v2956_v39 = vrot.slane %v2850_v58, 2  ;;  %v2957_v35 = vrot.slane %v2851_v3, 2  ;;  %v926_v17 = vadd.f32 %v5375_v46, %v7218_v56  ;;  %v7220_v32 = vld [vmem:[#allocation51_spill] sm:$0xff] }
 0x1c2   : > { %v2404_v1 = vsel %vm1818_vm4, %v2401_v9, %v7217_v4  ;;  %v2714_v45 = vsel %vm1573_vm3, %v2712_v15, %v2713_v37  ;;  %v2716_v52 = vsel %vm1573_vm3, %v2713_v37, %v7219_v13  ;;  %v990_v5 = vadd.f32 %v5375_v46, %v7220_v32 }
 0x1c3   : > { %v2498_v50 = vadd.f32 %v2404_v1, %v2254_v11  ;;  %v2497_v6 = vadd.f32 %v2402_v55, %v2253_v48  ;;  %v2958_v9 = vsel %vm1818_vm4, %v2956_v39, %v2957_v35  ;;  %v7221_v11 = vrot.slane %v5434_v24, 2 }
 0x1c4   : > { %v5754_v58 = vmax.f32 %v926_v17, 0.0  ;;  %v1072_v48 = vmax.f32 %v990_v5, 0.0  ;;  %v1470_v15 = vmul.f32 %v4565_v18, %v5704_v42  ;;  %v5760_v10 = vmul.f32 %v4555_v12, %v5704_v42 }
 0x1c5   : > { %v2566_v44 = vadd.f32 %v2534_v63, %v2498_v50  ;;  %v2960_v21 = vsel %vm1818_vm4, %v2957_v35, %v7221_v11  ;;  %v2565_v56 = vadd.f32 %v2533_v34, %v2497_v6  ;;  %v5764_v50 = vmul.f32 %v4569_v20, %v5704_v42  ;;  %v5792_v11 = vld [vmem:[%s6932_s5] ss:$0 sm:$0xff] }
 0x1c6   : > { %7222 = vst [vmem:[#allocation59_spill] sm:$0xff] %v5760_v10  ;;  %v5768_v24 = vmul.f32 %v4644_v26, %v5704_v42  ;;  %v929_v39 = vadd.f32 %v5375_v46, %v5379_v25  ;;  %v1424_v34 = vsel %vm1217_vm2, %v1072_v48, 0.0  ;;  %v7005_v3 = vrot.slane %v5760_v10, 1 }
 0x1c7   : > { %v2810_v13 = vadd.f32 %v2716_v52, %v2566_v44  ;;  %7223 = vst [vmem:[#allocation63_spill] sm:$0xff] %v5764_v50  ;;  %v2809_v63 = vadd.f32 %v2714_v45, %v2565_v56  ;;  %v1460_v55 = vmul.f32 %v4565_v18, %v5754_v58  ;;  %v1521_v1 = vmul.f32 %v4555_v12, %v1424_v34 }
 0x1c8   : > { %7224 = vst [vmem:[#allocation48_spill] sm:$0xff] %v5768_v24  ;;  %v1766_v37 = vmul.f32 %v4569_v20, %v1424_v34  ;;  %v7004_v35 = vrot.slane %v5764_v50, 2  ;;  %v2076_v6 = vmul.f32 %v4644_v26, %v1424_v34  ;;  %v7006_v25 = vrot.slane %v5768_v24, 1 }
 0x1c9   : > { %v3054_v4 = vadd.f32 %v2960_v21, %v2810_v13  ;;  %v3053_v17 = vadd.f32 %v2958_v9, %v2809_v63  ;;  %v5783_v45 = vmul.f32 %v4647_v27, %v1424_v34  ;;  %v1647_v32 = vrot.slane %v1521_v1, 1 }
 0x1ca   : > { %v1892_v5 = vrot.slane %v1766_v37, 2  ;;  %v5787_v44 = vmul.f32 %v4653_v30, %v1424_v34  ;;  %v2199_v21 = vrot.slane %v2076_v6, 1  ;;  %v5797_v48 = vmul.f32 %v4662_v36, %v1424_v34 }
 0x1cb   : > { %7225 = vst [vmem:[#allocation54_spill] sm:$0xff] %v5783_v45  ;;  %v3093_v52 = vadd.f32 %v5027_v43, %v3054_v4  ;;  %v3092_v9 = vadd.f32 %v5792_v11, %v3053_v17  ;;  %v1648_v43 = vsel %vm1573_vm3, %v7005_v3, %v1647_v32  ;;  %v1057_v6 = vmax.f32 %v929_v39, 0.0 }
 0x1cc   : > { %7226 = vst [vmem:[#allocation51_spill] sm:$0xff] %v5787_v44  ;;  %7227 = vst [vmem:[#allocation90_spill] sm:$0xff] %v5797_v48  ;;  %v1893_v63 = vsel %vm1818_vm4, %v7004_v35, %v1892_v5  ;;  %v1715_v37 = vadd.f32 %v1648_v43, %v1470_v15  ;;  %v5809_v17 = vsel %vm1573_vm3, %v7006_v25, %v2199_v21  ;;  %v7232_v21 = vld [vmem:[#allocation56_spill] sm:$0xff]  ;;  %v7233_v35 = vld [vmem:[#allocation57_spill] sm:$0xff] }
 0x1cd   : > { %v3125_v13 = vmax.f32 %v3093_v52, 0.0  ;;  %v3124_v1 = vmax.f32 %v3092_v9, 0.0  ;;  %7228 = vst [vmem:[#allocation91_spill] sm:$0xff] %v5809_v17  ;;  %v5814_v52 = vmul.f32 %v4555_v12, %v5754_v58  ;;  %v5818_v32 = vmul.f32 %v4569_v20, %v5754_v58  ;;  %v7244_v17 = vld [vmem:[#allocation62_spill] sm:$0xff] }
 0x1ce   : > { %v5822_v5 = vmul.f32 %v4644_v26, %v5754_v58  ;;  %v5824_v9 = vadd.f32 %v1893_v63, %v1715_v37  ;;  %v993_v43 = vadd.f32 %v5375_v46, %v7232_v21  ;;  %v998_v39 = vadd.f32 %v5375_v46, %v7233_v35 }
 0x1cf   : > { %7229 = vst [vmem:[#allocation92_spill] sm:$0xff] %v5814_v52  ;;  %7230 = vst [vmem:[#allocation93_spill] sm:$0xff] %v5818_v32  ;;  %v3151_v15 = vpack.c.bf16 %v3125_v13, %v3124_v1  ;;  %v1409_v3 = vsel %vm1217_vm2, %v1057_v6, 0.0  ;;  %v7245_v24 = vrot.slane %v7244_v17, 1 }
 0x1d0   : > { %7231 = vst [vmem:[#allocation94_spill] sm:$0xff] %v5824_v9  ;;  %v1506_v13 = vmul.f32 %v4555_v12, %v1409_v3  ;;  %v1751_v63 = vmul.f32 %v4569_v20, %v1409_v3  ;;  %v2061_v1 = vmul.f32 %v4644_v26, %v1409_v3  ;;  %v5839_v37 = vmul.f32 %v4647_v27, %v1409_v3 }
 0x1d1   : > { %4109 = vmatmul.mubr.bf16.gmra.mrb[44].mxu1 %v3151_v15  ;;  %v5842_v35 = vmul.f32 %v4653_v30, %v1409_v3  ;;  %v5845_v6 = vmul.f32 %v4662_v36, %v1409_v3  ;;  %v1073_v21 = vmax.f32 %v993_v43, 0.0  ;;  %v5847_v4 = vmax.f32 %v998_v39, 0.0 }
 0x1d2   : > { %7234 = vst [vmem:[#allocation56_spill] sm:$0xff] %v5839_v37  ;;  %v1622_v34 = vrot.slane %v1506_v13, 1  ;;  %v1867_v15 = vrot.slane %v1751_v63, 2  ;;  %v2174_v25 = vrot.slane %v2061_v1, 1  ;;  %v934_v3 = vadd.f32 %v5375_v46, %v5417_v23  ;;  %v7239_v23 = vld [vmem:[#allocation58_spill] sm:$0xff] }
 0x1d3   : > { %7235 = vst [vmem:[#allocation57_spill] sm:$0xff] %v5847_v4  ;;  %v5854_v10 = vsel %vm1158_vm1, %v1073_v21, 0.0  ;;  %v7236_v43 = vrot.slane %v5814_v52, 1  ;;  %v7237_v13 = vrot.slane %v5818_v32, 2  ;;  %v7238_v1 = vrot.slane %v5822_v5, 1 }
 0x1d4   : > { %v5871_v21 = vmul.f32 %v4555_v12, %v5854_v10  ;;  %v1058_v9 = vmax.f32 %v934_v3, 0.0  ;;  %v1001_v45 = vadd.f32 %v5375_v46, %v7239_v23 }
 0x1d5   : > { %v1623_v39 = vsel %vm1573_vm3, %v7236_v43, %v1622_v34  ;;  %v1868_v63 = vsel %vm1818_vm4, %v7237_v13, %v1867_v15  ;;  %v5867_v56 = vsel %vm1573_vm3, %v7238_v1, %v2174_v25  ;;  %v1472_v34 = vmul.f32 %v4565_v18, %v5847_v4  ;;  %v7242_v1 = vld [vmem:[#allocation66_spill] sm:$0xff] }
 0x1d6   : > { %v1705_v50 = vadd.f32 %v1623_v39, %v1460_v55  ;;  %v5879_v15 = vmul.f32 %v4555_v12, %v5847_v4  ;;  %v5883_v25 = vmul.f32 %v4569_v20, %v5847_v4  ;;  %v5887_v43 = vmul.f32 %v4644_v26, %v5847_v4 }
 0x1d7   : > { %v937_v55 = vadd.f32 %v5375_v46, %v5428_v54  ;;  %v5895_v39 = vsel %vm1158_vm1, %v1058_v9, 0.0  ;;  %v1075_v13 = vmax.f32 %v1001_v45, 0.0  ;;  %v7243_v23 = vrot.slane %v7242_v1, 1  ;;  %v7252_v1 = vld [vmem:[#allocation61_spill] sm:$0xff] }
 0x1d8   : > { %7240 = vst [vmem:[#allocation58_spill] sm:$0xff] %v5887_v43  ;;  %v5891_v3 = vadd.f32 %v1868_v63, %v1705_v50  ;;  %v5904_v4 = vmul.f32 %v4565_v18, %v5895_v39  ;;  %v5908_v54 = vmul.f32 %v4555_v12, %v5895_v39  ;;  %v5912_v50 = vmul.f32 %v4569_v20, %v5895_v39 }
 0x1d9   : > { %v1606_v48 = vsel %vm1573_vm3, %v7245_v24, %v7243_v23  ;;  %v1427_v9 = vsel %vm1217_vm2, %v1075_v13, 0.0  ;;  %v5919_v63 = vmax.f32 %v937_v55, 0.0  ;;  %v7253_v23 = vld [vmem:[#allocation67_spill] sm:$0xff] }
 0x1da   : > { %7241 = vst [vmem:[#allocation95_spill] sm:$0xff] %v5891_v3  ;;  %7246 = vst [vmem:[#allocation66_spill] sm:$0xff] %v5904_v4  ;;  %v1524_v44 = vmul.f32 %v4555_v12, %v1427_v9  ;;  %v1769_v42 = vmul.f32 %v4569_v20, %v1427_v9  ;;  %v2079_v38 = vmul.f32 %v4644_v26, %v1427_v9  ;;  %v7254_v2 = vrot.slane %v7253_v23, 2  ;;  %v7255_v4 = vld [vmem:[#allocation64_spill] sm:$0xff] }
 0x1db   : > { %7247 = vst [vmem:[#allocation62_spill] sm:$0xff] %v5908_v54  ;;  %7248 = vst [vmem:[#allocation96_spill] sm:$0xff] %v5912_v50  ;;  %v5927_v45 = vmul.f32 %v4647_v27, %v1427_v9  ;;  %v5930_v13 = vmul.f32 %v4653_v30, %v1427_v9  ;;  %v5933_v24 = vmul.f32 %v4662_v36, %v1427_v9  ;;  %v7256_v50 = vrot.slane %v7255_v4, 2 }
 0x1dc   : > { %v1652_v55 = vrot.slane %v1524_v44, 1  ;;  %v1897_v17 = vrot.slane %v1769_v42, 2  ;;  %v1698_v49 = vadd.f32 %v1606_v48, %v7252_v1  ;;  %v2204_v3 = vrot.slane %v2079_v38, 1 }
 0x1dd   : > { %7249 = vst [vmem:[#allocation97_spill] sm:$0xff] %v5927_v45  ;;  %7250 = vst [vmem:[#allocation98_spill] sm:$0xff] %v5930_v13  ;;  %v1851_v54 = vsel %vm1818_vm4, %v7256_v50, %v7254_v2  ;;  %v7257_v9 = vrot.slane %v5879_v15, 1  ;;  %v7258_v42 = vrot.slane %v5883_v25, 2  ;;  %v1979_v2 = vmul.f32 %v4641_v22, %v5327_v62 }
 0x1de   : > { %7251 = vst [vmem:[#allocation99_spill] sm:$0xff] %v5933_v24  ;;  %v1943_v1 = vadd.f32 %v1851_v54, %v1698_v49  ;;  %v7259_v4 = vrot.slane %v5887_v43, 1  ;;  %v1980_v23 = vmul.f32 %v4641_v22, %v5381_v33  ;;  %v2297_v49 = vmul.f32 %v4647_v27, %v5327_v62 }
 0x1df   : > { %v1653_v44 = vsel %vm1573_vm3, %v7257_v9, %v1652_v55  ;;  %v5950_v48 = vsel %vm1818_vm4, %v7258_v42, %v1897_v17  ;;  %v2053_v55 = vmul.f32 %v4644_v26, %v5327_v62  ;;  %v2298_v54 = vmul.f32 %v4647_v27, %v5381_v33  ;;  %v7261_v17 = vld [vmem:[#allocation46_spill] sm:$0xff] }
 0x1e0   : > { %v5954_v38 = vadd.f32 %v1653_v44, %v1472_v34  ;;  %v5959_v50 = vsel %vm1573_vm3, %v7259_v4, %v2204_v3  ;;  %v2011_v9 = vadd.f32 %v1979_v2, %v1943_v1  ;;  %v2535_v34 = vmul.f32 %v4650_v29, %v5463_v7 }
 0x1e1   : > { %7260 = vst [vmem:[#allocation61_spill] sm:$0xff] %v5959_v50  ;;  %v2012_v44 = vadd.f32 %v1980_v23, %v7261_v17  ;;  %v2161_v3 = vrot.slane %v2053_v55, 1  ;;  %v2536_v42 = vmul.f32 %v4650_v29, %v5450_v51  ;;  %v2609_v4 = vmul.f32 %v4653_v30, %v5463_v7 }
 0x1e2   : > { %v2405_v32 = vrot.slane %v2297_v49, 2  ;;  %v2406_v1 = vrot.slane %v2298_v54, 2  ;;  %v2610_v62 = vmul.f32 %v4653_v30, %v5450_v51  ;;  %v2853_v33 = vmul.f32 %v4662_v36, %v5463_v7 }
 0x1e3   : > { %v7262_v2 = vrot.slane %v5409_v40, 1  ;;  %v2256_v23 = vadd.f32 %v5446_v31, %v2012_v44  ;;  %v2717_v55 = vrot.slane %v2609_v4, 1  ;;  %v2854_v17 = vmul.f32 %v4662_v36, %v5450_v51 }
 0x1e4   : > { %v2407_v49 = vsel %vm1818_vm4, %v2405_v32, %v2406_v1  ;;  %v7263_v54 = vrot.slane %v5426_v53, 2  ;;  %v2718_v50 = vrot.slane %v2610_v62, 1  ;;  %v2961_v24 = vrot.slane %v2853_v33, 2 }
 0x1e5   : > { %v2163_v37 = vsel %vm1573_vm3, %v2161_v3, %v7262_v2  ;;  %v2962_v13 = vrot.slane %v2854_v17, 2  ;;  %v942_v40 = vadd.f32 %v5375_v46, %v5473_v41  ;;  %v7264_v44 = vrot.slane %v5588_v16, 1 }
 0x1e6   : > { %v2255_v52 = vadd.f32 %v2163_v37, %v2011_v9  ;;  %v2409_v45 = vsel %vm1818_vm4, %v2406_v1, %v7263_v54  ;;  %v2719_v31 = vsel %vm1573_vm3, %v2717_v55, %v2718_v50  ;;  %v1462_v32 = vmul.f32 %v4565_v18, %v5919_v63 }
 0x1e7   : > { %v2500_v43 = vadd.f32 %v2409_v45, %v2256_v23  ;;  %v2721_v37 = vsel %vm1573_vm3, %v2718_v50, %v7264_v44  ;;  %v2963_v9 = vsel %vm1818_vm4, %v2961_v24, %v2962_v13  ;;  %v7265_v45 = vrot.slane %v5593_v61, 2 }
 0x1e8   : > { %v2499_v3 = vadd.f32 %v2407_v49, %v2255_v52  ;;  %v1060_v1 = vmax.f32 %v942_v40, 0.0  ;;  %v6004_v41 = vmul.f32 %v4555_v12, %v5919_v63  ;;  %v6008_v16 = vmul.f32 %v4569_v20, %v5919_v63 }
 0x1e9   : > { %v2568_v53 = vadd.f32 %v2536_v42, %v2500_v43  ;;  %v2965_v4 = vsel %vm1818_vm4, %v2962_v13, %v7265_v45  ;;  %v6012_v52 = vmul.f32 %v4644_v26, %v5919_v63  ;;  %v945_v24 = vadd.f32 %v5375_v46, %v5495_v0  ;;  %v7266_v13 = vld [vmem:[#allocation65_spill] sm:$0xff] }
 0x1ea   : > { %v2567_v62 = vadd.f32 %v2535_v34, %v2499_v3  ;;  %v1412_v61 = vsel %vm1217_vm2, %v1060_v1, 0.0  ;;  %v1006_v50 = vadd.f32 %v5375_v46, %v7266_v13  ;;  %v7031_v33 = vrot.slane %v6004_v41, 1  ;;  %v7273_v1 = vld [vmem:[#allocation49_spill] sm:$0xff] }
 0x1eb   : > { %v2812_v43 = vadd.f32 %v2721_v37, %v2568_v53  ;;  %v1509_v42 = vmul.f32 %v4555_v12, %v1412_v61  ;;  %v1754_v2 = vmul.f32 %v4569_v20, %v1412_v61  ;;  %v7030_v55 = vrot.slane %v6008_v16, 2 }
 0x1ec   : > { %v2811_v34 = vadd.f32 %v2719_v31, %v2567_v62  ;;  %v2064_v17 = vmul.f32 %v4644_v26, %v1412_v61  ;;  %v7032_v49 = vrot.slane %v6012_v52, 1  ;;  %v6027_v3 = vmul.f32 %v4647_v27, %v1412_v61 }
 0x1ed   : > { %v3056_v23 = vadd.f32 %v2965_v4, %v2812_v43  ;;  %v1627_v40 = vrot.slane %v1509_v42, 1  ;;  %v1872_v0 = vrot.slane %v1754_v2, 2  ;;  %v6031_v37 = vmul.f32 %v4653_v30, %v1412_v61 }
 0x1ee   : > { %v3055_v54 = vadd.f32 %v2963_v9, %v2811_v34  ;;  %v2179_v44 = vrot.slane %v2064_v17, 1  ;;  %v6034_v53 = vmul.f32 %v4662_v36, %v1412_v61  ;;  %v1061_v2 = vmax.f32 %v945_v24, 0.0  ;;  %v7267_v24 = vld [vmem:[#allocation50_spill] sm:$0xff]  ;;  %v7276_v61 = vld [vmem:[#allocation69_spill] sm:$0xff] }
 0x1ef   : > { %v3095_v31 = vadd.f32 %v5792_v11, %v3056_v23  ;;  %v1628_v9 = vsel %vm1573_vm3, %v7031_v33, %v1627_v40  ;;  %v1873_v4 = vsel %vm1818_vm4, %v7030_v55, %v1872_v0  ;;  %v1076_v23 = vmax.f32 %v1006_v50, 0.0 }
 0x1f0   : > { %v3094_v45 = vadd.f32 %v5792_v11, %v3055_v54  ;;  %v1707_v43 = vadd.f32 %v1628_v9, %v1462_v32  ;;  %v6047_v13 = vsel %vm1573_vm3, %v7032_v49, %v2179_v44  ;;  %v1471_v54 = vmul.f32 %v4565_v18, %v5854_v10 }
 0x1f1   : > { %v3127_v62 = vmax.f32 %v3095_v31, 0.0  ;;  %v1649_v40 = vrot.slane %v5871_v21, 1  ;;  %v1767_v32 = vmul.f32 %v4569_v20, %v5854_v10  ;;  %v6060_v31 = vsel %vm1158_vm1, %v1061_v2, 0.0 }
 0x1f2   : > { %v3126_v34 = vmax.f32 %v3094_v45, 0.0  ;;  %v6051_v17 = vadd.f32 %v1873_v4, %v1707_v43  ;;  %v1428_v44 = vsel %vm1158_vm1, %v1076_v23, 0.0  ;;  %v1009_v50 = vadd.f32 %v5375_v46, %v7267_v24 }
 0x1f3   : > { %v6068_v45 = vmul.f32 %v4565_v18, %v6060_v31  ;;  %v6072_v21 = vmul.f32 %v4555_v12, %v6060_v31  ;;  %v6076_v9 = vmul.f32 %v4569_v20, %v6060_v31  ;;  %v7268_v4 = vrot.slane %v5879_v15, 1 }
 0x1f4   : > { %v3152_v0 = vpack.c.bf16 %v3127_v62, %v3126_v34  ;;  %v1894_v43 = vrot.slane %v1767_v32, 2  ;;  %v1997_v34 = vmul.f32 %v4641_v22, %v1428_v44  ;;  %v6083_v2 = vmul.f32 %v4644_v26, %v1428_v44 }
 0x1f5   : > { %v1651_v8 = vsel %vm1573_vm3, %v1649_v40, %v7268_v4  ;;  %v6088_v55 = vmul.f32 %v4647_v27, %v1428_v44  ;;  %v6091_v33 = vmul.f32 %v4650_v29, %v1428_v44  ;;  %v7270_v15 = vrot.slane %v5883_v25, 2  ;;  %v7275_v40 = vld [vmem:[#allocation45_spill] sm:$0xff] }
 0x1f6   : > { %4112 = vmatprep.mubr.bf16.mxu1 %v3152_v0  ;;  %v1716_v62 = vadd.f32 %v1651_v8, %v1471_v54  ;;  %v6098_v32 = vmul.f32 %v4653_v30, %v1428_v44  ;;  %v6101_v0 = vmul.f32 %v4662_v36, %v1428_v44  ;;  %v6104_v24 = vmax.f32 %v1009_v50, 0.0 }
 0x1f7   : > { %7269 = vst [vmem:[#allocation67_spill] sm:$0xff] %v6091_v33  ;;  %v1896_v54 = vsel %vm1818_vm4, %v1894_v43, %v7270_v15  ;;  %v7272_v23 = vrot.slane %v5399_v60, 1  ;;  %v7274_v49 = vrot.slane %v7273_v1, 1  ;;  %v7277_v44 = vrot.slane %v7276_v61, 2  ;;  %v7278_v33 = vld [vmem:[#allocation47_spill] sm:$0xff] }
 0x1f8   : > { %7271 = vst [vmem:[#allocation64_spill] sm:$0xff] %v6101_v0  ;;  %v1961_v4 = vadd.f32 %v1896_v54, %v1716_v62  ;;  %v7279_v62 = vrot.slane %v7278_v33, 2  ;;  %v1981_v60 = vmul.f32 %v4641_v22, %v5463_v7  ;;  %v2056_v1 = vmul.f32 %v4644_v26, %v5463_v7 }
 0x1f9   : > { %v1611_v25 = vsel %vm1573_vm3, %v7274_v49, %v7272_v23  ;;  %v1982_v49 = vmul.f32 %v4641_v22, %v5450_v51  ;;  %v2301_v33 = vmul.f32 %v4647_v27, %v5450_v51  ;;  %v2537_v61 = vmul.f32 %v4650_v29, %v5627_v59 }
 0x1fa   : > { %v1700_v42 = vadd.f32 %v1611_v25, %v7275_v40  ;;  %v1856_v54 = vsel %vm1818_vm4, %v7279_v62, %v7277_v44  ;;  %v6119_v50 = vadd.f32 %v1997_v34, %v1961_v4  ;;  %v2300_v40 = vmul.f32 %v4647_v27, %v5463_v7 }
 0x1fb   : > { %v2014_v34 = vadd.f32 %v1982_v49, %v5452_v28  ;;  %v2166_v4 = vrot.slane %v2056_v1, 1  ;;  %v2538_v25 = vmul.f32 %v4650_v29, %v5754_v58  ;;  %v2612_v44 = vmul.f32 %v4653_v30, %v5627_v59 }
 0x1fc   : > { %v1945_v23 = vadd.f32 %v1856_v54, %v1700_v42  ;;  %v2410_v42 = vrot.slane %v2300_v40, 2  ;;  %v2411_v54 = vrot.slane %v2301_v33, 2  ;;  %v2613_v7 = vmul.f32 %v4653_v30, %v5754_v58 }
 0x1fd   : > { %v7280_v51 = vrot.slane %v5573_v19, 1  ;;  %v2258_v43 = vadd.f32 %v5604_v57, %v2014_v34  ;;  %v2722_v28 = vrot.slane %v2612_v44, 1  ;;  %v2856_v49 = vmul.f32 %v4662_v36, %v5627_v59 }
 0x1fe   : > { %v2013_v62 = vadd.f32 %v1981_v60, %v1945_v23  ;;  %v2412_v8 = vsel %vm1818_vm4, %v2410_v42, %v2411_v54  ;;  %v7281_v60 = vrot.slane %v5578_v47, 2  ;;  %v2723_v40 = vrot.slane %v2613_v7, 1  ;;  %v7284_v42 = vld [vmem:[#allocation68_spill] sm:$0xff] }
 0x1ff   : > { %v2168_v15 = vsel %vm1573_vm3, %v2166_v4, %v7280_v51  ;;  %v2857_v19 = vmul.f32 %v4662_v36, %v5754_v58  ;;  %v2966_v0 = vrot.slane %v2856_v49, 2  ;;  %v7282_v4 = vld [vmem:[#allocation39_spill] sm:$0xff]  ;;  %v1014_v47 = vadd.f32 %v5375_v46, %v7284_v42 }
 0x200   : > { %v2257_v1 = vadd.f32 %v2168_v15, %v2013_v62  ;;  %v2414_v23 = vsel %vm1818_vm4, %v2411_v54, %v7281_v60  ;;  %v950_v57 = vadd.f32 %v5375_v46, %v7282_v4  ;;  %v2724_v44 = vsel %vm1573_vm3, %v2722_v28, %v2723_v40 }
 0x201   : > { %v2502_v33 = vadd.f32 %v2414_v23, %v2258_v43  ;;  %v7283_v15 = vrot.slane %v5842_v35, 1  ;;  %v2967_v7 = vrot.slane %v2857_v19, 2  ;;  %v1962_v51 = vadd.f32 %v5950_v48, %v5954_v38 }
 0x202   : > { %v2501_v34 = vadd.f32 %v2412_v8, %v2257_v1  ;;  %v6160_v43 = vmax.f32 %v950_v57, 0.0  ;;  %v1078_v60 = vmax.f32 %v1014_v47, 0.0  ;;  %v1998_v8 = vmul.f32 %v4641_v22, %v6104_v24 }
 0x203   : > { %v2726_v62 = vsel %vm1573_vm3, %v2723_v40, %v7283_v15  ;;  %v2570_v54 = vadd.f32 %v2538_v25, %v2502_v33  ;;  %v6168_v35 = vmul.f32 %v4644_v26, %v6104_v24  ;;  %v2968_v1 = vsel %vm1818_vm4, %v2966_v0, %v2967_v7  ;;  %v7288_v15 = vld [vmem:[#allocation70_spill] sm:$0xff] }
 0x204   : > { %v2569_v49 = vadd.f32 %v2537_v61, %v2501_v34  ;;  %v7285_v46 = vrot.slane %v5845_v6, 2  ;;  %v6176_v23 = vmul.f32 %v4647_v27, %v6104_v24  ;;  %v1430_v38 = vsel %vm1217_vm2, %v1078_v60, 0.0 }
 0x205   : > { %v2814_v28 = vadd.f32 %v2726_v62, %v2570_v54  ;;  %v2030_v61 = vadd.f32 %v1998_v8, %v1962_v51  ;;  %v7035_v40 = vrot.slane %v6168_v35, 1  ;;  %v2082_v19 = vmul.f32 %v4644_v26, %v1430_v38 }
 0x206   : > { %v2970_v25 = vsel %vm1818_vm4, %v2967_v7, %v7285_v46  ;;  %v2813_v48 = vadd.f32 %v2724_v44, %v2569_v49  ;;  %v2326_v0 = vmul.f32 %v4647_v27, %v1430_v38  ;;  %v7034_v6 = vrot.slane %v6176_v23, 2  ;;  %v4244_v44 = vld [vmem:[%s6931_s4] ss:$0 sm:$0xff]  ;;  %v7297_v49 = vld [vmem:[#allocation55_spill] sm:$0xff] }
 0x207   : > { %v3058_v33 = vadd.f32 %v2970_v25, %v2814_v28  ;;  %v6185_v57 = vmul.f32 %v4653_v30, %v1430_v38  ;;  %v6188_v34 = vmul.f32 %v4662_v36, %v1430_v38  ;;  %v953_v62 = vadd.f32 %v4244_v44, %v7288_v15 }
 0x208   : > { %v3057_v4 = vadd.f32 %v2968_v1, %v2813_v48  ;;  %v2209_v47 = vrot.slane %v2082_v19, 1  ;;  %v2453_v54 = vrot.slane %v2326_v0, 2  ;;  %v1464_v7 = vmul.f32 %v4565_v18, %v6160_v43 }
 0x209   : > { %7286 = vst [vmem:[#allocation46_spill] sm:$0xff] %v6185_v57  ;;  %7287 = vst [vmem:[#allocation65_spill] sm:$0xff] %v6188_v34  ;;  %v3097_v42 = vadd.f32 %v5792_v11, %v3058_v33  ;;  %v1063_v8 = vmax.f32 %v953_v62, 0.0  ;;  %v6208_v25 = vmul.f32 %v4555_v12, %v6160_v43  ;;  %v6214_v33 = vmul.f32 %v4569_v20, %v6160_v43  ;;  %v7309_v57 = vld [vmem:[#allocation78_spill] sm:$0xff] }
 0x20a   : > { %v3096_v51 = vadd.f32 %v5792_v11, %v3057_v4  ;;  %v2210_v1 = vsel %vm1573_vm3, %v7035_v40, %v2209_v47  ;;  %v2454_v46 = vsel %vm1818_vm4, %v7034_v6, %v2453_v54  ;;  %v6221_v44 = vmul.f32 %v4644_v26, %v6160_v43 }
 0x20b   : > { %v3129_v28 = vmax.f32 %v3097_v42, 0.0  ;;  %v2274_v48 = vadd.f32 %v2210_v1, %v2030_v61  ;;  %v1415_v38 = vsel %vm1217_vm2, %v1063_v8, 0.0  ;;  %v7037_v0 = vrot.slane %v6208_v25, 1 }
 0x20c   : > { %v3128_v18 = vmax.f32 %v3096_v51, 0.0  ;;  %v1512_v19 = vmul.f32 %v4555_v12, %v1415_v38  ;;  %v1757_v4 = vmul.f32 %v4569_v20, %v1415_v38  ;;  %v7036_v14 = vrot.slane %v6214_v33, 2 }
 0x20d   : > { %v6223_v62 = vadd.f32 %v2454_v46, %v2274_v48  ;;  %v2067_v61 = vmul.f32 %v4644_v26, %v1415_v38  ;;  %v7038_v54 = vrot.slane %v6221_v44, 1  ;;  %v6229_v12 = vmul.f32 %v4647_v27, %v1415_v38  ;;  %v7292_v46 = vld [vmem:[#allocation52_spill] sm:$0xff] }
 0x20e   : > { %v3153_v15 = vpack.c.bf16 %v3129_v28, %v3128_v18  ;;  %v1632_v42 = vrot.slane %v1512_v19, 1  ;;  %v1877_v47 = vrot.slane %v1757_v4, 2  ;;  %v6232_v51 = vmul.f32 %v4653_v30, %v1415_v38  ;;  %v7290_v28 = vld [vmem:[#allocation71_spill] sm:$0xff] }
 0x20f   : > { %7289 = vst [vmem:[#allocation50_spill] sm:$0xff] %v6223_v62  ;;  %v2184_v20 = vrot.slane %v2067_v61, 1  ;;  %v6235_v8 = vmul.f32 %v4662_v36, %v1415_v38  ;;  %v7291_v1 = vrot.slane %v7290_v28, 1  ;;  %v7293_v18 = vrot.slane %v7292_v46, 1  ;;  %v7294_v61 = vld [vmem:[#allocation53_spill] sm:$0xff] }
 0x210   : > { %4113 = vmatmul.mubr.bf16.gmra.mrb[48].mxu1 %v3153_v15  ;;  %v1633_v19 = vsel %vm1573_vm3, %v7037_v0, %v1632_v42  ;;  %v1878_v4 = vsel %vm1818_vm4, %v7036_v14, %v1877_v47  ;;  %v7298_v6 = vrot.slane %v7297_v49, 2  ;;  %v1983_v40 = vmul.f32 %v4641_v22, %v5627_v59  ;;  %v7305_v62 = vld [vmem:[#allocation77_spill] sm:$0xff] }
 0x211   : > { %v1616_v48 = vsel %vm1573_vm3, %v7293_v18, %v7291_v1  ;;  %v1709_v38 = vadd.f32 %v1633_v19, %v1464_v7  ;;  %v6253_v28 = vsel %vm1573_vm3, %v7038_v54, %v2184_v20  ;;  %v7295_v18 = vld [vmem:[#allocation72_spill] sm:$0xff]  ;;  %v1984_v7 = vmul.f32 %v4641_v22, %v5754_v58 }
 0x212   : > { %v1702_v60 = vadd.f32 %v1616_v48, %v7294_v61  ;;  %v7296_v42 = vrot.slane %v7295_v18, 2  ;;  %v2059_v20 = vmul.f32 %v4644_v26, %v5627_v59  ;;  %v2303_v61 = vmul.f32 %v4647_v27, %v5627_v59  ;;  %v7299_v18 = vld [vmem:[#allocation40_spill] sm:$0xff] }
 0x213   : > { %v6268_v48 = vadd.f32 %v1878_v4, %v1709_v38  ;;  %v2304_v49 = vmul.f32 %v4647_v27, %v5754_v58  ;;  %v2539_v14 = vmul.f32 %v4650_v29, %v5895_v39  ;;  %v2540_v0 = vmul.f32 %v4650_v29, %v5919_v63 }
 0x214   : > { %v1861_v47 = vsel %vm1818_vm4, %v7298_v6, %v7296_v42  ;;  %v2016_v6 = vadd.f32 %v1984_v7, %v7299_v18  ;;  %v2171_v42 = vrot.slane %v2059_v20, 1  ;;  %v2415_v54 = vrot.slane %v2303_v61, 2 }
 0x215   : > { %v1947_v19 = vadd.f32 %v1861_v47, %v1702_v60  ;;  %v2416_v4 = vrot.slane %v2304_v49, 2  ;;  %v2615_v60 = vmul.f32 %v4653_v30, %v5895_v39  ;;  %v7300_v59 = vrot.slane %v5822_v5, 1 }
 0x216   : > { %v2260_v58 = vadd.f32 %v5867_v56, %v2016_v6  ;;  %v2616_v47 = vmul.f32 %v4653_v30, %v5919_v63  ;;  %v2859_v7 = vmul.f32 %v4662_v36, %v5895_v39  ;;  %v7306_v34 = vrot.slane %v7305_v62, 1 }
 0x217   : > { %v2015_v15 = vadd.f32 %v1983_v40, %v1947_v19  ;;  %v2173_v38 = vsel %vm1573_vm3, %v2171_v42, %v7300_v59  ;;  %v2417_v40 = vsel %vm1818_vm4, %v2415_v54, %v2416_v4  ;;  %v7301_v19 = vld [vmem:[#allocation56_spill] sm:$0xff]  ;;  %v2727_v18 = vrot.slane %v2615_v60, 1 }
 0x218   : > { %v7302_v61 = vrot.slane %v7301_v19, 2  ;;  %v2728_v5 = vrot.slane %v2616_v47, 1  ;;  %v2860_v42 = vmul.f32 %v4662_v36, %v5919_v63  ;;  %v2971_v56 = vrot.slane %v2859_v7, 2  ;;  %v7303_v59 = vld [vmem:[#allocation92_spill] sm:$0xff] }
 0x219   : > { %v2259_v20 = vadd.f32 %v2173_v38, %v2015_v15  ;;  %v7304_v1 = vrot.slane %v7303_v59, 1  ;;  %v7307_v38 = vld [vmem:[#allocation93_spill] sm:$0xff]  ;;  %v7310_v19 = vrot.slane %v7309_v57, 2  ;;  %v1985_v60 = vmul.f32 %v4641_v22, %v5895_v39 }
 0x21a   : > { %v2419_v49 = vsel %vm1818_vm4, %v2416_v4, %v7302_v61  ;;  %v7308_v54 = vrot.slane %v7307_v38, 2  ;;  %v2729_v47 = vsel %vm1573_vm3, %v2727_v18, %v2728_v5  ;;  %v7311_v7 = vrot.slane %v6031_v37, 1  ;;  %v7312_v61 = vld [vmem:[#allocation60_spill] sm:$0xff] }
 0x21b   : > { %v2504_v46 = vadd.f32 %v2419_v49, %v2260_v58  ;;  %v2503_v6 = vadd.f32 %v2417_v40, %v2259_v20  ;;  %v1621_v15 = vsel %vm1573_vm3, %v7306_v34, %v7304_v1  ;;  %v2972_v40 = vrot.slane %v2860_v42, 2 }
 0x21c   : > { %v1866_v4 = vsel %vm1818_vm4, %v7310_v19, %v7308_v54  ;;  %v2731_v20 = vsel %vm1573_vm3, %v2728_v5, %v7311_v7  ;;  %v1704_v34 = vadd.f32 %v1621_v15, %v7312_v61  ;;  %v1986_v1 = vmul.f32 %v4641_v22, %v5919_v63  ;;  %v7314_v5 = vld [vmem:[#allocation95_spill] sm:$0xff] }
 0x21d   : > { %v2572_v58 = vadd.f32 %v2540_v0, %v2504_v46  ;;  %v2571_v62 = vadd.f32 %v2539_v14, %v2503_v6  ;;  %v2062_v57 = vmul.f32 %v4644_v26, %v5895_v39  ;;  %v2973_v59 = vsel %vm1818_vm4, %v2971_v56, %v2972_v40 }
 0x21e   : > { %v7313_v0 = vrot.slane %v6034_v53, 2  ;;  %v2306_v37 = vmul.f32 %v4647_v27, %v5895_v39  ;;  %v1949_v14 = vadd.f32 %v1866_v4, %v1704_v34  ;;  %v2018_v42 = vadd.f32 %v1986_v1, %v7314_v5  ;;  %v7318_v5 = vld [vmem:[#allocation62_spill] sm:$0xff] }
 0x21f   : > { %v2816_v49 = vadd.f32 %v2731_v20, %v2572_v58  ;;  %v2815_v18 = vadd.f32 %v2729_v47, %v2571_v62  ;;  %v2176_v6 = vrot.slane %v2062_v57, 1  ;;  %v2307_v38 = vmul.f32 %v4647_v27, %v5919_v63 }
 0x220   : > { %v2975_v46 = vsel %vm1818_vm4, %v2972_v40, %v7313_v0  ;;  %v2420_v54 = vrot.slane %v2306_v37, 2  ;;  %v2541_v56 = vmul.f32 %v4650_v29, %v6060_v31  ;;  %v2017_v53 = vadd.f32 %v1985_v60, %v1949_v14 }
 0x221   : > { %v3060_v15 = vadd.f32 %v2975_v46, %v2816_v49  ;;  %v3059_v19 = vadd.f32 %v2973_v59, %v2815_v18  ;;  %v7315_v58 = vrot.slane %v6012_v52, 1  ;;  %v2262_v39 = vadd.f32 %v6047_v13, %v2018_v42 }
 0x222   : > { %v2421_v47 = vrot.slane %v2307_v38, 2  ;;  %v2542_v20 = vmul.f32 %v4650_v29, %v6160_v43  ;;  %v2618_v63 = vmul.f32 %v4653_v30, %v6060_v31  ;;  %v2619_v60 = vmul.f32 %v4653_v30, %v6160_v43 }
 0x223   : > { %v2178_v7 = vsel %vm1573_vm3, %v2176_v6, %v7315_v58  ;;  %v3099_v4 = vadd.f32 %v5792_v11, %v3060_v15  ;;  %v3098_v40 = vadd.f32 %v5792_v11, %v3059_v19  ;;  %v2862_v52 = vmul.f32 %v4662_v36, %v6060_v31 }
 0x224   : > { %v2261_v62 = vadd.f32 %v2178_v7, %v2017_v53  ;;  %v2422_v13 = vsel %vm1818_vm4, %v2420_v54, %v2421_v47  ;;  %v7316_v34 = vrot.slane %v6027_v3, 2  ;;  %v2732_v57 = vrot.slane %v2618_v63, 1  ;;  %v7321_v3 = vld [vmem:[#allocation96_spill] sm:$0xff] }
 0x225   : > { %v3131_v61 = vmax.f32 %v3099_v4, 0.0  ;;  %v3130_v49 = vmax.f32 %v3098_v40, 0.0  ;;  %v2733_v46 = vrot.slane %v2619_v60, 1  ;;  %v2863_v37 = vmul.f32 %v4662_v36, %v6160_v43 }
 0x226   : > { %v2424_v1 = vsel %vm1818_vm4, %v2421_v47, %v7316_v34  ;;  %v2505_v59 = vadd.f32 %v2422_v13, %v2261_v62  ;;  %v2976_v18 = vrot.slane %v2862_v52, 2  ;;  %v7317_v14 = vrot.slane %v6004_v41, 1  ;;  %v7324_v47 = vld [vmem:[#allocation66_spill] sm:$0xff] }
 0x227   : > { %v2506_v0 = vadd.f32 %v2424_v1, %v2262_v39  ;;  %v7319_v42 = vrot.slane %v7318_v5, 1  ;;  %v7320_v15 = vrot.slane %v6008_v16, 2  ;;  %v7322_v38 = vrot.slane %v7321_v3, 2 }
 0x228   : > { %v3154_v19 = vpack.c.bf16 %v3131_v61, %v3130_v49  ;;  %v2573_v53 = vadd.f32 %v2541_v56, %v2505_v59  ;;  %v2734_v7 = vsel %vm1573_vm3, %v2732_v57, %v2733_v46  ;;  %v7323_v39 = vrot.slane %v6232_v51, 1 }
 0x229   : > { %v1626_v6 = vsel %vm1573_vm3, %v7319_v42, %v7317_v14  ;;  %v1871_v54 = vsel %vm1818_vm4, %v7322_v38, %v7320_v15  ;;  %v2574_v58 = vadd.f32 %v2542_v20, %v2506_v0  ;;  %v2977_v41 = vrot.slane %v2863_v37, 2  ;;  %v7326_v37 = vld [vmem:[#allocation27_spill] sm:$0xff]  ;;  %v7328_v15 = vld [vmem:[#allocation28_spill] sm:$0xff] }
 0x22a   : > { %v2736_v4 = vsel %vm1573_vm3, %v2733_v46, %v7323_v39  ;;  %v1706_v63 = vadd.f32 %v1626_v6, %v7324_v47  ;;  %v1987_v40 = vmul.f32 %v4641_v22, %v6060_v31  ;;  %4116 = vmatprep.mubr.bf16.mxu1 %v3154_v19  ;;  %v2817_v16 = vadd.f32 %v2734_v7, %v2573_v53 }
 0x22b   : > { %v2818_v62 = vadd.f32 %v2736_v4, %v2574_v58  ;;  %v1988_v60 = vmul.f32 %v4641_v22, %v6160_v43  ;;  %v2065_v56 = vmul.f32 %v4644_v26, %v6060_v31  ;;  %v2978_v20 = vsel %vm1818_vm4, %v2976_v18, %v2977_v41 }
 0x22c   : > { %v7325_v51 = vrot.slane %v6235_v8, 2  ;;  %v1951_v61 = vadd.f32 %v1871_v54, %v1706_v63  ;;  %v2309_v13 = vmul.f32 %v4647_v27, %v6060_v31  ;;  %v3061_v34 = vadd.f32 %v2978_v20, %v2817_v16 }
 0x22d   : > { %v2020_v57 = vadd.f32 %v1988_v60, %v6051_v17  ;;  %v2181_v49 = vrot.slane %v2065_v56, 1  ;;  %v2310_v0 = vmul.f32 %v4647_v27, %v6160_v43  ;;  %v2543_v18 = vmul.f32 %v4650_v29, %v7326_v37 }
 0x22e   : > { %v2980_v52 = vsel %vm1818_vm4, %v2977_v41, %v7325_v51  ;;  %v2019_v59 = vadd.f32 %v1987_v40, %v1951_v61  ;;  %v2425_v46 = vrot.slane %v2309_v13, 2  ;;  %v3100_v8 = vadd.f32 %v5792_v11, %v3061_v34  ;;  %v7334_v34 = vld [vmem:[#allocation36_spill] sm:$0xff] }
 0x22f   : > { %v3062_v1 = vadd.f32 %v2980_v52, %v2818_v62  ;;  %v7327_v5 = vrot.slane %v6221_v44, 1  ;;  %v2264_v42 = vadd.f32 %v6253_v28, %v2020_v57  ;;  %v2426_v6 = vrot.slane %v2310_v0, 2 }
 0x230   : > { %v2544_v3 = vmul.f32 %v4650_v29, %v7328_v15  ;;  %v2621_v43 = vmul.f32 %v4653_v30, %v7326_v37  ;;  %v3132_v38 = vmax.f32 %v3100_v8, 0.0  ;;  %v2622_v19 = vmul.f32 %v4653_v30, %v7328_v15 }
 0x231   : > { %v3101_v14 = vadd.f32 %v5792_v11, %v3062_v1  ;;  %v2183_v31 = vsel %vm1573_vm3, %v2181_v49, %v7327_v5  ;;  %v2865_v44 = vmul.f32 %v4662_v36, %v7326_v37  ;;  %v2427_v53 = vsel %vm1818_vm4, %v2425_v46, %v2426_v6 }
 0x232   : > { %v2263_v17 = vadd.f32 %v2183_v31, %v2019_v59  ;;  %v7329_v28 = vrot.slane %v6229_v12, 2  ;;  %v2737_v7 = vrot.slane %v2621_v43, 1  ;;  %v2866_v39 = vmul.f32 %v4662_v36, %v7328_v15 }
 0x233   : > { %v3133_v54 = vmax.f32 %v3101_v14, 0.0  ;;  %v2738_v63 = vrot.slane %v2622_v19, 1  ;;  %v2981_v40 = vrot.slane %v2865_v44, 2  ;;  %v7330_v62 = vrot.slane %v6208_v25, 1  ;;  %v7339_v44 = vld [vmem:[#allocation41_spill] sm:$0xff] }
 0x234   : > { %v2429_v58 = vsel %vm1818_vm4, %v2426_v6, %v7329_v28  ;;  %v2507_v41 = vadd.f32 %v2427_v53, %v2263_v17  ;;  %v2982_v16 = vrot.slane %v2866_v39, 2  ;;  %v7331_v60 = vrot.slane %v6072_v21, 1  ;;  %v7336_v21 = vld [vmem:[#allocation37_spill] sm:$0xff]  ;;  %v7342_v39 = vld [vmem:[#allocation38_spill] sm:$0xff] }
 0x235   : > { %v3155_v4 = vpack.c.bf16 %v3133_v54, %v3132_v38  ;;  %v2508_v47 = vadd.f32 %v2429_v58, %v2264_v42  ;;  %v7332_v12 = vrot.slane %v6214_v33, 2  ;;  %v7333_v20 = vrot.slane %v6076_v9, 2  ;;  %v7338_v42 = vld [vmem:[#allocation73_spill] sm:$0xff] }
 0x236   : > { %v1631_v56 = vsel %vm1573_vm3, %v7331_v60, %v7330_v62  ;;  %v2575_v52 = vadd.f32 %v2543_v18, %v2507_v41  ;;  %v2739_v13 = vsel %vm1573_vm3, %v2737_v7, %v2738_v63  ;;  %v7335_v1 = vrot.slane %v7334_v34, 1  ;;  %v7340_v58 = vld [vmem:[#allocation33_spill] sm:$0xff] }
 0x237   : > { %v1876_v51 = vsel %vm1818_vm4, %v7333_v20, %v7332_v12  ;;  %4117 = vmatmul.mubr.bf16.gmra.mrb[52].mxu1 %v3155_v4  ;;  %v2576_v61 = vadd.f32 %v2544_v3, %v2508_v47  ;;  %v2983_v25 = vsel %vm1818_vm4, %v2981_v40, %v2982_v16  ;;  %v7337_v49 = vrot.slane %v7336_v21, 2  ;;  %v7343_v47 = vld [vmem:[#allocation35_spill] sm:$0xff]  ;;  %v7347_v21 = vld [vmem:[#allocation29_spill] sm:$0xff] }
 0x238   : > { %v2741_v57 = vsel %vm1573_vm3, %v2738_v63, %v7335_v1  ;;  %v1708_v33 = vadd.f32 %v1631_v56, %v6068_v45  ;;  %v1989_v9 = vmul.f32 %v4641_v22, %v7326_v37  ;;  %v2819_v0 = vadd.f32 %v2739_v13, %v2575_v52 }
 0x239   : > { %v2985_v59 = vsel %vm1818_vm4, %v2982_v16, %v7337_v49  ;;  %v2820_v46 = vadd.f32 %v2741_v57, %v2576_v61  ;;  %v1990_v18 = vmul.f32 %v4641_v22, %v7328_v15  ;;  %v2068_v8 = vmul.f32 %v4644_v26, %v7326_v37  ;;  %v7345_v57 = vld [vmem:[#allocation31_spill] sm:$0xff] }
 0x23a   : > { %v1953_v14 = vadd.f32 %v1876_v51, %v1708_v33  ;;  %v2312_v5 = vmul.f32 %v4647_v27, %v7326_v37  ;;  %v2313_v31 = vmul.f32 %v4647_v27, %v7328_v15  ;;  %v2545_v45 = vmul.f32 %v4650_v29, %v7338_v42 }
 0x23b   : > { %v3063_v17 = vadd.f32 %v2983_v25, %v2819_v0  ;;  %v3064_v6 = vadd.f32 %v2985_v59, %v2820_v46  ;;  %v2022_v3 = vadd.f32 %v1990_v18, %v6268_v48  ;;  %v2186_v43 = vrot.slane %v2068_v8, 1  ;;  %v7349_v46 = vld [vmem:[#allocation34_spill] sm:$0xff] }
 0x23c   : > { %v2021_v38 = vadd.f32 %v1989_v9, %v1953_v14  ;;  %v2430_v54 = vrot.slane %v2312_v5, 2  ;;  %v2431_v19 = vrot.slane %v2313_v31, 2  ;;  %v2546_v53 = vmul.f32 %v4650_v29, %v7339_v44  ;;  %v7350_v14 = vld [vmem:[#allocation81_spill] sm:$0xff] }
 0x23d   : > { %v3102_v28 = vadd.f32 %v5792_v11, %v3063_v17  ;;  %v3103_v37 = vadd.f32 %v5792_v11, %v3064_v6  ;;  %v7341_v15 = vrot.slane %v7340_v58, 1  ;;  %v2266_v4 = vadd.f32 %v7342_v39, %v2022_v3  ;;  %v7352_v17 = vld [vmem:[#allocation32_spill] sm:$0xff]  ;;  %v7354_v3 = vld [vmem:[#allocation30_spill] sm:$0xff] }
 0x23e   : > { %v2432_v48 = vsel %vm1818_vm4, %v2430_v54, %v2431_v19  ;;  %v7344_v63 = vrot.slane %v7343_v47, 2  ;;  %v2624_v16 = vmul.f32 %v4653_v30, %v7338_v42  ;;  %v2625_v12 = vmul.f32 %v4653_v30, %v7339_v44 }
 0x23f   : > { %v2188_v7 = vsel %vm1573_vm3, %v2186_v43, %v7341_v15  ;;  %v3134_v62 = vmax.f32 %v3102_v28, 0.0  ;;  %v3135_v60 = vmax.f32 %v3103_v37, 0.0  ;;  %v2868_v52 = vmul.f32 %v4662_v36, %v7338_v42  ;;  %v7356_v28 = vld [vmem:[#allocation82_spill] sm:$0xff] }
 0x240   : > { %v2265_v41 = vadd.f32 %v2188_v7, %v2021_v38  ;;  %v2434_v40 = vsel %vm1818_vm4, %v2431_v19, %v7344_v63  ;;  %v2742_v51 = vrot.slane %v2624_v16, 1  ;;  %v2869_v61 = vmul.f32 %v4662_v36, %v7339_v44  ;;  %v7358_v63 = vld [vmem:[#allocation84_spill] sm:$0xff] }
 0x241   : > { %v2510_v56 = vadd.f32 %v2434_v40, %v2266_v4  ;;  %v3156_v13 = vpack.c.bf16 %v3135_v60, %v3134_v62  ;;  %v2743_v1 = vrot.slane %v2625_v12, 1  ;;  %v7346_v25 = vrot.slane %v7345_v57, 1  ;;  %v7359_v62 = vld [vmem:[#allocation42_spill] sm:$0xff] }
 0x242   : > { %v2509_v20 = vadd.f32 %v2432_v48, %v2265_v41  ;;  %v7348_v49 = vrot.slane %v7347_v21, 1  ;;  %v2986_v9 = vrot.slane %v2868_v52, 2  ;;  %v2987_v0 = vrot.slane %v2869_v61, 2  ;;  %v7360_v61 = vld [vmem:[#allocation88_spill] sm:$0xff] }
 0x243   : > { %v2578_v34 = vadd.f32 %v2546_v53, %v2510_v56  ;;  %4120 = vmatprep.mubr.bf16.mxu1 %v3156_v13  ;;  %v2744_v8 = vsel %vm1573_vm3, %v2742_v51, %v2743_v1  ;;  %v7351_v5 = vrot.slane %v7350_v14, 1  ;;  %v7353_v6 = vrot.slane %v7352_v17, 2  ;;  %v7361_v13 = vld [vmem:[#allocation79_spill] sm:$0xff] }
 0x244   : > { %v1636_v59 = vsel %vm1573_vm3, %v7348_v49, %v7346_v25  ;;  %v2577_v33 = vadd.f32 %v2545_v45, %v2509_v20  ;;  %v7355_v43 = vrot.slane %v7354_v3, 2  ;;  %v1991_v45 = vmul.f32 %v4641_v22, %v7338_v42 }
 0x245   : > { %v1710_v18 = vadd.f32 %v1636_v59, %v7349_v46  ;;  %v2746_v31 = vsel %vm1573_vm3, %v2743_v1, %v7351_v5  ;;  %v2988_v53 = vsel %vm1818_vm4, %v2986_v9, %v2987_v0  ;;  %v7357_v37 = vrot.slane %v7356_v28, 2  ;;  %v7363_v1 = vld [vmem:[#allocation83_spill] sm:$0xff]  ;;  %v6496_v9 = vpop.f32.mrb[36].mxu1 }
 0x246   : > { %v1881_v38 = vsel %vm1818_vm4, %v7355_v43, %v7353_v6  ;;  %v2821_v54 = vadd.f32 %v2744_v8, %v2577_v33  ;;  %v2822_v19 = vadd.f32 %v2746_v31, %v2578_v34  ;;  %v1992_v7 = vmul.f32 %v4641_v22, %v7339_v44  ;;  %v6503_v31 = vpop.f32.mrb[37].mxu1 }
 0x247   : > { %v2990_v58 = vsel %vm1818_vm4, %v2987_v0, %v7357_v37  ;;  %v1955_v15 = vadd.f32 %v1881_v38, %v1710_v18  ;;  %v2071_v39 = vmul.f32 %v4644_v26, %v7338_v42  ;;  %v2315_v4 = vmul.f32 %v4647_v27, %v7338_v42  ;;  %v7364_v0 = vld [vmem:[#allocation80_spill] sm:$0xff]  ;;  %v6507_v38 = vpop.f32.mrb[38].mxu1  ;;  %v7368_v37 = vld [vmem:[#allocation43_spill] sm:$0xff] }
 0x248   : > { %v3065_v41 = vadd.f32 %v2988_v53, %v2821_v54  ;;  %v3066_v48 = vadd.f32 %v2990_v58, %v2822_v19  ;;  %v2316_v47 = vmul.f32 %v4647_v27, %v7339_v44  ;;  %v2547_v40 = vmul.f32 %v4650_v29, %v7358_v63  ;;  %v7366_v54 = vld [vmem:[#allocation51_spill] sm:$0xff] }
 0x249   : > { %v2023_v16 = vadd.f32 %v1991_v45, %v1955_v15  ;;  %v2024_v60 = vadd.f32 %v1992_v7, %v7359_v62  ;;  %v2191_v56 = vrot.slane %v2071_v39, 1  ;;  %v2435_v12 = vrot.slane %v2315_v4, 2  ;;  %v7370_v15 = vld [vmem:[#allocation75_spill] sm:$0xff]  ;;  %v6518_v4 = vpop.f32.mrb[39].mxu1 }
 0x24a   : > { %v3104_v20 = vadd.f32 %v5792_v11, %v3065_v41  ;;  %v3105_v51 = vadd.f32 %v5792_v11, %v3066_v48  ;;  %v2436_v52 = vrot.slane %v2316_v47, 2  ;;  %v2548_v42 = vmul.f32 %v4650_v29, %v7360_v61 }
 0x24b   : > { %v7362_v34 = vrot.slane %v7361_v13, 1  ;;  %v2268_v57 = vadd.f32 %v7363_v1, %v2024_v60  ;;  %v2627_v25 = vmul.f32 %v4653_v30, %v7358_v63  ;;  %v2628_v21 = vmul.f32 %v4653_v30, %v7360_v61  ;;  %v7373_v60 = vld [vmem:[#allocation44_spill] sm:$0xff]  ;;  %v7377_v1 = vld [vmem:[#allocation90_spill] sm:$0xff] }
 0x24c   : > { %v3136_v49 = vmax.f32 %v3104_v20, 0.0  ;;  %v3137_v59 = vmax.f32 %v3105_v51, 0.0  ;;  %v2437_v11 = vsel %vm1818_vm4, %v2435_v12, %v2436_v52  ;;  %v7365_v46 = vrot.slane %v7364_v0, 2  ;;  %v7375_v12 = vld [vmem:[#allocation76_spill] sm:$0xff] }
 0x24d   : > { %v2193_v44 = vsel %vm1573_vm3, %v2191_v56, %v7362_v34  ;;  %v2747_v8 = vrot.slane %v2627_v25, 1  ;;  %v2748_v14 = vrot.slane %v2628_v21, 1  ;;  %v2871_v5 = vmul.f32 %v4662_v36, %v7358_v63 }
 0x24e   : > { %v2267_v33 = vadd.f32 %v2193_v44, %v2023_v16  ;;  %v2439_v18 = vsel %vm1818_vm4, %v2436_v52, %v7365_v46  ;;  %v3157_v17 = vpack.c.bf16 %v3137_v59, %v3136_v49  ;;  %v2872_v43 = vmul.f32 %v4662_v36, %v7360_v61  ;;  %v7372_v16 = vld [vmem:[#allocation74_spill] sm:$0xff]  ;;  %v7379_v49 = vld [vmem:[#allocation89_spill] sm:$0xff] }
 0x24f   : > { %v2512_v3 = vadd.f32 %v2439_v18, %v2268_v57  ;;  %v2749_v45 = vsel %vm1573_vm3, %v2747_v8, %v2748_v14  ;;  %v7367_v19 = vrot.slane %v7366_v54, 1  ;;  %v2991_v28 = vrot.slane %v2871_v5, 2  ;;  %v7380_v5 = vld [vmem:[#allocation48_spill] sm:$0xff] }
 0x250   : > { %v2511_v6 = vadd.f32 %v2437_v11, %v2267_v33  ;;  %v7369_v58 = vrot.slane %v7368_v37, 1  ;;  %v7371_v7 = vrot.slane %v7370_v15, 1  ;;  %4121 = vmatmul.mubr.bf16.gmra.mrb[56].mxu1 %v3157_v17  ;;  %v2992_v47 = vrot.slane %v2872_v43, 2 }
 0x251   : > { %v2751_v53 = vsel %vm1573_vm3, %v2748_v14, %v7367_v19  ;;  %v2580_v48 = vadd.f32 %v2548_v42, %v2512_v3  ;;  %v7374_v56 = vrot.slane %v7373_v60, 2  ;;  %v7376_v20 = vrot.slane %v7375_v12, 2  ;;  %v7382_v3 = vld [vmem:[#allocation91_spill] sm:$0xff] }
 0x252   : > { %v1641_v39 = vsel %vm1573_vm3, %v7371_v7, %v7369_v58  ;;  %v2579_v41 = vadd.f32 %v2547_v40, %v2511_v6  ;;  %v1993_v52 = vmul.f32 %v4641_v22, %v7358_v63  ;;  %v1994_v13 = vmul.f32 %v4641_v22, %v7360_v61 }
 0x253   : > { %v1712_v62 = vadd.f32 %v1641_v39, %v7372_v16  ;;  %v1886_v51 = vsel %vm1818_vm4, %v7376_v20, %v7374_v56  ;;  %v2074_v34 = vmul.f32 %v4644_v26, %v7358_v63  ;;  %v2824_v42 = vadd.f32 %v2751_v53, %v2580_v48  ;;  %v7383_v53 = vld [vmem:[#allocation57_spill] sm:$0xff] }
 0x254   : > { %v2823_v40 = vadd.f32 %v2749_v45, %v2579_v41  ;;  %v2993_v44 = vsel %vm1818_vm4, %v2991_v28, %v2992_v47  ;;  %v7378_v57 = vrot.slane %v7377_v1, 2  ;;  %v2026_v59 = vadd.f32 %v1994_v13, %v7379_v49  ;;  %v7390_v49 = vld [vmem:[#allocation98_spill] sm:$0xff] }
 0x255   : > { %v1957_v21 = vadd.f32 %v1886_v51, %v1712_v62  ;;  %v2196_v33 = vrot.slane %v2074_v34, 1  ;;  %v2318_v11 = vmul.f32 %v4647_v27, %v7358_v63  ;;  %v2319_v18 = vmul.f32 %v4647_v27, %v7360_v61  ;;  %v6550_v63 = vld [vmem:[%s6932_s5] ss:$0 sm:$0xff]  ;;  %v7386_v34 = vld [vmem:[#allocation59_spill] sm:$0xff] }
 0x256   : > { %v2995_v25 = vsel %vm1818_vm4, %v2992_v47, %v7378_v57  ;;  %v3067_v0 = vadd.f32 %v2993_v44, %v2823_v40  ;;  %v2549_v8 = vmul.f32 %v4650_v29, %v5854_v10  ;;  %v7381_v17 = vrot.slane %v7380_v5, 1  ;;  %v7384_v47 = vld [vmem:[#allocation54_spill] sm:$0xff]  ;;  %v7395_v5 = vld [vmem:[#allocation87_spill] sm:$0xff] }
 0x257   : > { %v3068_v46 = vadd.f32 %v2995_v25, %v2824_v42  ;;  %v2025_v14 = vadd.f32 %v1993_v52, %v1957_v21  ;;  %v2270_v43 = vadd.f32 %v7382_v3, %v2026_v59  ;;  %v2440_v45 = vrot.slane %v2318_v11, 2  ;;  %v7388_v42 = vld [vmem:[#allocation86_spill] sm:$0xff] }
 0x258   : > { %v2198_v6 = vsel %vm1573_vm3, %v2196_v33, %v7381_v17  ;;  %v3106_v54 = vadd.f32 %v6550_v63, %v3067_v0  ;;  %v2441_v19 = vrot.slane %v2319_v18, 2  ;;  %v2550_v28 = vmul.f32 %v4650_v29, %v7383_v53  ;;  %v7392_v0 = vld [vmem:[#allocation85_spill] sm:$0xff]  ;;  %v7393_v18 = vld [vmem:[#allocation63_spill] sm:$0xff] }
 0x259   : > { %v3107_v61 = vadd.f32 %v6550_v63, %v3068_v46  ;;  %v2269_v37 = vadd.f32 %v2198_v6, %v2025_v14  ;;  %v2630_v58 = vmul.f32 %v4653_v30, %v5854_v10  ;;  %v2631_v15 = vmul.f32 %v4653_v30, %v7383_v53 }
 0x25a   : > { %v2874_v7 = vmul.f32 %v4662_v36, %v5854_v10  ;;  %v3138_v39 = vmax.f32 %v3106_v54, 0.0  ;;  %v2442_v48 = vsel %vm1818_vm4, %v2440_v45, %v2441_v19  ;;  %v7385_v16 = vrot.slane %v7384_v47, 2 }
 0x25b   : > { %v3139_v41 = vmax.f32 %v3107_v61, 0.0  ;;  %v2513_v60 = vadd.f32 %v2442_v48, %v2269_v37  ;;  %v2752_v12 = vrot.slane %v2630_v58, 1  ;;  %v2753_v20 = vrot.slane %v2631_v15, 1 }
 0x25c   : > { %v2444_v62 = vsel %vm1818_vm4, %v2441_v19, %v7385_v16  ;;  %v2875_v52 = vmul.f32 %v4662_v36, %v7383_v53  ;;  %v2996_v13 = vrot.slane %v2874_v7, 2  ;;  %v7387_v40 = vrot.slane %v7386_v34, 1  ;;  %v7397_v19 = vld [vmem:[#allocation99_spill] sm:$0xff] }
 0x25d   : > { %v2514_v56 = vadd.f32 %v2444_v62, %v2270_v43  ;;  %v3158_v51 = vpack.c.bf16 %v3139_v41, %v3138_v39  ;;  %v7389_v44 = vrot.slane %v7388_v42, 1  ;;  %v2581_v57 = vadd.f32 %v2549_v8, %v2513_v60  ;;  %v7399_v41 = vld [vmem:[#allocation94_spill] sm:$0xff] }
 0x25e   : > { %v2754_v21 = vsel %vm1573_vm3, %v2752_v12, %v2753_v20  ;;  %v7391_v59 = vrot.slane %v7390_v49, 1  ;;  %v2997_v11 = vrot.slane %v2875_v52, 2  ;;  %v7394_v14 = vrot.slane %v7393_v18, 2  ;;  %v7400_v12 = vld [vmem:[#allocation58_spill] sm:$0xff] }
 0x25f   : > { %v1646_v1 = vsel %vm1573_vm3, %v7389_v44, %v7387_v40  ;;  %v2582_v25 = vadd.f32 %v2550_v28, %v2514_v56  ;;  %4124 = vmatprep.mubr.bf16.mxu1 %v3158_v51  ;;  %v7396_v17 = vrot.slane %v7395_v5, 2  ;;  %v1995_v8 = vmul.f32 %v4641_v22, %v5854_v10  ;;  %v7402_v51 = vld [vmem:[#allocation61_spill] sm:$0xff] }
 0x260   : > { %v2756_v33 = vsel %vm1573_vm3, %v2753_v20, %v7391_v59  ;;  %v1714_v46 = vadd.f32 %v1646_v1, %v7392_v0  ;;  %v2825_v3 = vadd.f32 %v2754_v21, %v2581_v57  ;;  %v1996_v45 = vmul.f32 %v4641_v22, %v7383_v53 }
 0x261   : > { %v1891_v6 = vsel %vm1818_vm4, %v7396_v17, %v7394_v14  ;;  %v2826_v43 = vadd.f32 %v2756_v33, %v2582_v25  ;;  %v2077_v54 = vmul.f32 %v4644_v26, %v5854_v10  ;;  %v2998_v61 = vsel %vm1818_vm4, %v2996_v13, %v2997_v11  ;;  %v7407_v33 = vld [vmem:[#allocation97_spill] sm:$0xff]  ;;  %v7410_v17 = vld [vmem:[#allocation46_spill] sm:$0xff] }
 0x262   : > { %v7398_v28 = vrot.slane %v7397_v19, 2  ;;  %v1959_v58 = vadd.f32 %v1891_v6, %v1714_v46  ;;  %v2321_v15 = vmul.f32 %v4647_v27, %v5854_v10  ;;  %v3069_v7 = vadd.f32 %v2998_v61, %v2825_v3  ;;  %v7412_v3 = vld [vmem:[#allocation64_spill] sm:$0xff]  ;;  %v7416_v19 = vld [vmem:[#allocation67_spill] sm:$0xff] }
 0x263   : > { %v2028_v48 = vadd.f32 %v1996_v45, %v7399_v41  ;;  %v2201_v47 = vrot.slane %v2077_v54, 1  ;;  %v2322_v22 = vmul.f32 %v4647_v27, %v7383_v53  ;;  %v2552_v62 = vmul.f32 %v4650_v29, %v6104_v24  ;;  %v7414_v54 = vld [vmem:[#allocation65_spill] sm:$0xff]  ;;  %v7417_v41 = vld [vmem:[#allocation15_spill] sm:$0xff] }
 0x264   : > { %v3000_v37 = vsel %vm1818_vm4, %v2997_v11, %v7398_v28  ;;  %v2027_v16 = vadd.f32 %v1995_v8, %v1959_v58  ;;  %v2445_v26 = vrot.slane %v2321_v15, 2  ;;  %v3108_v60 = vadd.f32 %v6550_v63, %v3069_v7 }
 0x265   : > { %v3070_v39 = vadd.f32 %v3000_v37, %v2826_v43  ;;  %v7401_v20 = vrot.slane %v7400_v12, 1  ;;  %v2272_v52 = vadd.f32 %v7402_v51, %v2028_v48  ;;  %v2446_v34 = vrot.slane %v2322_v22, 2  ;;  %v7418_v48 = vld [vmem:[#allocation14_spill] sm:$0xff] }
 0x266   : > { %v2634_v40 = vmul.f32 %v4653_v30, %v6104_v24  ;;  %v2878_v27 = vmul.f32 %v4662_v36, %v6104_v24  ;;  %v3140_v53 = vmax.f32 %v3108_v60, 0.0  ;;  %v7403_v44 = vrot.slane %v6168_v35, 1  ;;  %v7419_v60 = vld [vmem:[#allocation50_spill] sm:$0xff] }
 0x267   : > { %v3109_v56 = vadd.f32 %v6550_v63, %v3070_v39  ;;  %v2203_v10 = vsel %vm1573_vm3, %v2201_v47, %v7401_v20  ;;  %v7404_v1 = vrot.slane %v6083_v2, 1  ;;  %v7405_v25 = vrot.slane %v6176_v23, 2  ;;  %v6628_v23 = vld [vmem:[%s6933_s6] ss:$0 sm:$0xff] }
 0x268   : > { %v2271_v13 = vadd.f32 %v2203_v10, %v2027_v16  ;;  %v7406_v21 = vrot.slane %v6088_v55, 2  ;;  %v2447_v59 = vsel %vm1818_vm4, %v2445_v26, %v2446_v34  ;;  %v7408_v11 = vrot.slane %v7407_v33, 2  ;;  %v7421_v10 = vld [vmem:[#allocation11_spill] sm:$0xff] }
 0x269   : > { %v3141_v42 = vmax.f32 %v3109_v56, 0.0  ;;  %v2208_v57 = vsel %vm1573_vm3, %v7404_v1, %v7403_v44  ;;  %v2758_v0 = vrot.slane %v2634_v40, 1  ;;  %v3002_v46 = vrot.slane %v2878_v27, 2  ;;  %v7422_v40 = vld [vmem:[#allocation16_spill] sm:$0xff] }
 0x26a   : > { %v2452_v49 = vsel %vm1818_vm4, %v7406_v21, %v7405_v25  ;;  %v2449_v24 = vsel %vm1818_vm4, %v2446_v34, %v7408_v11  ;;  %v2515_v35 = vadd.f32 %v2447_v59, %v2271_v13  ;;  %v2273_v2 = vadd.f32 %v2208_v57, %v6119_v50  ;;  %v7423_v21 = vld [vmem:[#allocation13_spill] sm:$0xff] }
 0x26b   : > { %v3159_v18 = vpack.c.bf16 %v3141_v42, %v3140_v53  ;;  %v2516_v14 = vadd.f32 %v2449_v24, %v2272_v52  ;;  %v7409_v55 = vrot.slane %v6098_v32, 1  ;;  %v7411_v6 = vrot.slane %v7410_v17, 1  ;;  %v7430_v17 = vld [vmem:[#allocation8_spill] sm:$0xff] }
 0x26c   : > { %v7413_v43 = vrot.slane %v7412_v3, 2  ;;  %v7415_v61 = vrot.slane %v7414_v54, 2  ;;  %v2583_v28 = vadd.f32 %v7416_v19, %v2515_v35  ;;  %v2517_v58 = vadd.f32 %v2452_v49, %v2273_v2  ;;  %v7424_v49 = vld [vmem:[#allocation10_spill] sm:$0xff]  ;;  %v7427_v35 = vld [vmem:[#allocation17_spill] sm:$0xff]  ;;  %v7428_v2 = vld [vmem:[#allocation20_spill] sm:$0xff] }
 0x26d   : > { %v2759_v5 = vsel %vm1573_vm3, %v7409_v55, %v2758_v0  ;;  %v2761_v8 = vsel %vm1573_vm3, %v2758_v0, %v7411_v6  ;;  %4125 = vmatmul.mubr.bf16.gmra.mrb[60].mxu1 %v3159_v18  ;;  %v2584_v37 = vadd.f32 %v2552_v62, %v2516_v14  ;;  %v2553_v32 = vmul.f32 0.0, %v4650_v29  ;;  %v7426_v18 = vld [vmem:[#allocation18_spill] sm:$0xff]  ;;  %v7429_v55 = vld [vmem:[#allocation19_spill] sm:$0xff]  ;;  %v7432_v3 = vld [vmem:[#allocation9_spill] sm:$0xff] }
 0x26e   : > { %v3003_v45 = vsel %vm1818_vm4, %v7413_v43, %v3002_v46  ;;  %v3005_v50 = vsel %vm1818_vm4, %v3002_v46, %v7415_v61  ;;  %v2636_v15 = vmul.f32 0.0, %v4653_v30  ;;  %v2880_v7 = vmul.f32 0.0, %v4662_v36  ;;  %v7435_v61 = vld [vmem:[#allocation21_spill] sm:$0xff] }
 0x26f   : > { %v3276_v39 = vadd.f32 %v6496_v9, %v6628_v23  ;;  %v3497_v47 = vsel %vm1573_vm3, %v7418_v48, %v7417_v41  ;;  %v2827_v16 = vadd.f32 %v2759_v5, %v2583_v28  ;;  %v2828_v22 = vadd.f32 %v2761_v8, %v2584_v37  ;;  %v7420_v9 = vld [vmem:[#allocation12_spill] sm:$0xff]  ;;  %v7440_v48 = vld [vmem:[#allocation7_spill] sm:$0xff] }
 0x270   : > { %v2585_v26 = vadd.f32 %v2553_v32, %v2517_v58  ;;  %v2586_v62 = vadd.f32 %v2553_v32, %v7419_v60  ;;  %v2762_v56 = vrot.slane %v2636_v15, 1  ;;  %v3006_v12 = vrot.slane %v2880_v7, 2  ;;  %v7436_v37 = vld [vmem:[#allocation24_spill] sm:$0xff]  ;;  %v7437_v58 = vld [vmem:[#allocation23_spill] sm:$0xff]  ;;  %v7438_v15 = vld [vmem:[#allocation26_spill] sm:$0xff] }
 0x271   : > { %v3604_v29 = vadd.f32 %v3497_v47, %v3276_v39  ;;  %v3071_v30 = vadd.f32 %v3003_v45, %v2827_v16  ;;  %v3072_v20 = vadd.f32 %v3005_v50, %v2828_v22  ;;  %v3268_v36 = vadd.f32 %v6628_v23, %v6503_v31  ;;  %v7439_v7 = vld [vmem:[#allocation25_spill] sm:$0xff] }
 0x272   : > { %v3492_v51 = vsel %vm1573_vm3, %v7421_v10, %v7420_v9  ;;  %v2829_v52 = vadd.f32 %v2762_v56, %v2585_v26  ;;  %v2830_v13 = vadd.f32 %v2762_v56, %v2586_v62  ;;  %v3279_v34 = vadd.f32 %v6507_v38, %v6628_v23  ;;  %v4106_v26 = vpop.f32.mrb[40].mxu1 }
 0x273   : > { %3637 = vst.msk [vmem:[%s4360_s12 + $0x10] sm:$0xff] %vm3634_vm5, %v3604_v29  ;;  %v3499_v27 = vsel %vm1573_vm3, %v7417_v41, %v7422_v40  ;;  %v3110_v53 = vadd.f32 %v6550_v63, %v3071_v30  ;;  %v3111_v31 = vadd.f32 %v6550_v63, %v3072_v20  ;;  %v3602_v42 = vadd.f32 %v3492_v51, %v3268_v36  ;;  %v3283_v56 = vpop.f32.mrb[41].mxu1 }
 0x274   : > { %v3271_v44 = vadd.f32 %v6628_v23, %v6518_v4  ;;  %v3073_v1 = vadd.f32 %v3006_v12, %v2829_v52  ;;  %v3074_v57 = vadd.f32 %v3006_v12, %v2830_v13  ;;  %v3605_v25 = vadd.f32 %v3499_v27, %v3279_v34  ;;  %v4107_v29 = vpop.f32.mrb[42].mxu1  ;;  %v4246_v34 = vld [vmem:[#allocation2 + $0x68] sm:$0xff]   ;;  %v6730_v27 = vld [vmem:[#allocation2 + $0x70] sm:$0xff]  }
 0x275   : > { %v3494_v38 = vsel %vm1573_vm3, %v7420_v9, %v7423_v21  ;;  %v7425_v59 = vunpack.c.l.bf16 %v7424_v49  ;;  %v3142_v11 = vmax.f32 %v3110_v53, 0.0  ;;  %v3143_v24 = vmax.f32 %v3111_v31, 0.0  ;;  %3635 = vst.msk [vmem:[%s4360_s12] sm:$0xff] %vm3634_vm5, %v3602_v42  ;;  %v3286_v36 = vpop.f32.mrb[43].mxu1  ;;  %v4248_v31 = vld [vmem:[#allocation2 + $0x80] sm:$0xff]  }
 0x276   : > { %v3603_v0 = vadd.f32 %v3494_v38, %v3271_v44  ;;  %v3112_v46 = vadd.f32 %v6550_v63, %v3073_v1  ;;  %v3113_v4 = vadd.f32 %v6550_v63, %v3074_v57  ;;  %3638 = vst.msk [vmem:[%s4360_s12 + $0x18] sm:$0xff] %vm3634_vm5, %v3605_v25  ;;  %v3502_v14 = vsel %vm1573_vm3, %v7427_v35, %v7426_v18  ;;  %v7434_v63 = vld [vmem:[#allocation22_spill] sm:$0xff]  ;;  %v6733_v44 = vld [vmem:[#allocation2 + $0x78] sm:$0xff]  }
 0x277   : > { %v3528_v33 = vrot.slane %v7425_v59, 1  ;;  %v3509_v5 = vsel %vm1573_vm3, %v7429_v55, %v7428_v2  ;;  %v7431_v6 = vunpack.c.l.bf16 %v7430_v17  ;;  %v7433_v43 = vunpack.c.h.bf16 %v7432_v3  ;;  %v4253_v35 = vld [vmem:[#allocation2 + $0x48] sm:$0xff]   ;;  %v4254_v17 = vld [vmem:[#allocation2 + $0x40] sm:$0xff]  }
 0x278   : > { %v3160_v54 = vpack.c.bf16 %v3143_v24, %v3142_v11  ;;  %3636 = vst.msk [vmem:[%s4360_s12 + $0x8] sm:$0xff] %vm3634_vm5, %v3603_v0  ;;  %v6696_v50 = vsel %vm1573_vm3, %v7435_v61, %v7434_v63  ;;  %v3144_v19 = vmax.f32 %v3112_v46, 0.0  ;;  %v3145_v28 = vmax.f32 %v3113_v4, 0.0  ;;  %v6748_v11 = vld [vmem:[#allocation2 + $0x88] sm:$0xff]   ;;  %v4251_v0 = vld [vmem:[#allocation2 + $0x98] sm:$0xff]   ;;  %v6751_v4 = vld [vmem:[#allocation2 + $0x90] sm:$0xff]  }
 0x279   : > { %v3505_v8 = vrot.slane %v7431_v6, 1  ;;  %v6689_v45 = vrot.slane %v7433_v43, 1  ;;  %v6701_v32 = vsel %vm1573_vm3, %v7437_v58, %v7436_v37  ;;  %v6706_v39 = vsel %vm1573_vm3, %v7439_v7, %v7438_v15 }
 0x27a   : > { %4128 = vmatprep.mubr.bf16.mxu1 %v3160_v54  ;;  %v7441_v47 = vunpack.c.h.bf16 %v7440_v48  ;;  %v3161_v22 = vpack.c.bf16 %v3145_v28, %v3144_v19  ;;  %v3292_v62 = vadd.f32 %v4106_v26, %v6628_v23  ;;  %v3284_v12 = vadd.f32 %v6628_v23, %v3283_v56 }
 0x27b   : > { %v6710_v41 = vsel %vm1573_vm3, %v6689_v45, %v3528_v33  ;;  %v3507_v60 = vsel %vm1573_vm3, %v3505_v8, %v7429_v55  ;;  %v3295_v20 = vadd.f32 %v4107_v29, %v6628_v23  ;;  %v3287_v51 = vadd.f32 %v6628_v23, %v3286_v36  ;;  %v6787_v36 = vld [vmem:[#allocation2 + $0xa8] sm:$0xff]  }
 0x27c   : > { %v3503_v16 = vrot.slane %v7441_v47, 1  ;;  %4129 = vmatmul.mubr.bf16.gmra.mrb[64].mxu1 %v3161_v22  ;;  %v3608_v30 = vadd.f32 %v3507_v60, %v3292_v62  ;;  %v3606_v10 = vadd.f32 %v3502_v14, %v3284_v12  ;;  %v3418_v40 = vunpack.c.h.bf16 %v4246_v34 }
 0x27d   : > { %v3609_v52 = vadd.f32 %v3509_v5, %v3295_v20  ;;  %v3419_v53 = vunpack.c.l.bf16 %v6730_v27  ;;  %v3423_v42 = vunpack.c.l.bf16 %v4248_v31  ;;  %v3422_v1 = vunpack.c.h.bf16 %v6733_v44  ;;  %v4256_v20 = vld [vmem:[#allocation2 + $0xb0] sm:$0xff]  }
 0x27e   : > { %v3504_v9 = vsel %vm1573_vm3, %v7426_v18, %v3503_v16  ;;  %3641 = vst.msk [vmem:[%s4360_s12 + $0x30] sm:$0xff] %vm3634_vm5, %v3608_v30  ;;  %3639 = vst.msk [vmem:[%s4360_s12 + $0x20] sm:$0xff] %vm3634_vm5, %v3606_v10  ;;  %v3530_v57 = vrot.slane %v3418_v40, 1  ;;  %v3424_v33 = vunpack.c.h.bf16 %v4248_v31  ;;  %v3425_v24 = vunpack.c.l.bf16 %v6748_v11  ;;  %v6784_v30 = vld [vmem:[#allocation2 + $0xa0] sm:$0xff]  }
 0x27f   : > { %v3607_v13 = vadd.f32 %v3504_v9, %v3287_v51  ;;  %3642 = vst.msk [vmem:[%s4360_s12 + $0x38] sm:$0xff] %vm3634_vm5, %v3609_v52  ;;  %v6736_v25 = vrot.slane %v3419_v53, 1  ;;  %v3538_v21 = vrot.slane %v3423_v42, 1  ;;  %v6738_v38 = vrot.slane %v3422_v1, 1  ;;  %v6802_v53 = vld [vmem:[#allocation2 + $0xb8] sm:$0xff]   ;;  %v4259_v42 = vld [vmem:[#allocation2 + $0xc8] sm:$0xff]  }
 0x280   : > { %v3429_v46 = vunpack.c.l.bf16 %v4251_v0  ;;  %v3428_v18 = vunpack.c.h.bf16 %v6751_v4  ;;  %v3409_v14 = vunpack.c.l.bf16 %v4253_v35  ;;  %v3540_v2 = vrot.slane %v3424_v33, 1 }
 0x281   : > { %3640 = vst.msk [vmem:[%s4360_s12 + $0x28] sm:$0xff] %vm3634_vm5, %v3607_v13  ;;  %v6742_v49 = vsel %vm1573_vm3, %v3530_v57, %v6736_v25  ;;  %v6746_v59 = vsel %vm1573_vm3, %v6738_v38, %v3538_v21  ;;  %v6754_v55 = vrot.slane %v3425_v24, 1  ;;  %v3408_v6 = vunpack.c.h.bf16 %v4254_v17  ;;  %v6805_v57 = vld [vmem:[#allocation2 + $0xc0] sm:$0xff]  }
 0x282   : > { %v3548_v5 = vrot.slane %v3429_v46, 1  ;;  %v6756_v8 = vrot.slane %v3428_v18, 1  ;;  %v3515_v3 = vrot.slane %v3409_v14, 1  ;;  %v3430_v29 = vunpack.c.h.bf16 %v4251_v0  ;;  %v4261_v14 = vld [vmem:[#allocation2 + $0x60] sm:$0xff]  }
 0x283   : > { %v6760_v43 = vsel %vm1573_vm3, %v3540_v2, %v6754_v55  ;;  %v3513_v61 = vrot.slane %v3408_v6, 1  ;;  %v3434_v9 = vunpack.c.h.bf16 %v6787_v36  ;;  %v3436_v40 = vunpack.c.h.bf16 %v4256_v20 }
 0x284   : > { %v6764_v54 = vsel %vm1573_vm3, %v6756_v8, %v3548_v5  ;;  %v3517_v28 = vsel %vm1573_vm3, %v3515_v3, %v7437_v58  ;;  %v3550_v10 = vrot.slane %v3430_v29, 1  ;;  %v3437_v31 = vunpack.c.l.bf16 %v6802_v53  ;;  %v4262_v5 = vld [vmem:[#allocation2 + $0x58] sm:$0xff]  }
 0x285   : > { %v3514_v60 = vsel %vm1573_vm3, %v7434_v63, %v3513_v61  ;;  %v3431_v63 = vunpack.c.l.bf16 %v6784_v30  ;;  %v6792_v52 = vrot.slane %v3434_v9, 1  ;;  %v3441_v1 = vunpack.c.l.bf16 %v4259_v42 }
 0x286   : > { %v3440_v21 = vunpack.c.h.bf16 %v6805_v57  ;;  %v3560_v33 = vrot.slane %v3436_v40, 1  ;;  %v6808_v24 = vrot.slane %v3437_v31, 1  ;;  %v3415_v2 = vunpack.c.l.bf16 %v4261_v14 }
 0x287   : > { %v3568_v0 = vrot.slane %v3441_v1, 1  ;;  %v3414_v17 = vunpack.c.h.bf16 %v4262_v5  ;;  %v3427_v1 = vunpack.c.l.bf16 %v6751_v4 }
 0x288   : > { %v6810_v46 = vrot.slane %v3440_v21, 1  ;;  %v6814_v18 = vsel %vm1573_vm3, %v3560_v33, %v6808_v24  ;;  %v3525_v6 = vrot.slane %v3415_v2, 1 }
 0x289   : > { %v3523_v3 = vrot.slane %v3414_v17, 1  ;;  %v3545_v21 = vrot.slane %v3427_v1, 1 }
 0x28a   : > { %v6818_v35 = vsel %vm1573_vm3, %v6810_v46, %v3568_v0 }
 0x2a4   : > { %v4110_v19 = vpop.f32.mrb[44].mxu1 }
 0x2a5   : > { %v3308_v37 = vadd.f32 %v4110_v19, %v6628_v23  ;;  %v3299_v7 = vpop.f32.mrb[45].mxu1  ;;  %v3527_v19 = vsel %vm1573_vm3, %v3525_v6, %v6689_v45 }
 0x2a6   : > { %v3300_v48 = vadd.f32 %v6628_v23, %v3299_v7  ;;  %v4111_v47 = vpop.f32.mrb[46].mxu1 }
 0x2a7   : > { %v3612_v16 = vadd.f32 %v3517_v28, %v3308_v37  ;;  %v3311_v22 = vadd.f32 %v4111_v47, %v6628_v23  ;;  %v3302_v26 = vpop.f32.mrb[47].mxu1 }
 0x2a8   : > { %v3610_v62 = vadd.f32 %v6696_v50, %v3300_v48  ;;  %v3303_v56 = vadd.f32 %v6628_v23, %v3302_v26  ;;  %v3435_v50 = vunpack.c.l.bf16 %v4256_v20  ;;  %v3524_v26 = vsel %vm1573_vm3, %v7438_v15, %v3523_v3 }
 0x2a9   : > { %3645 = vst.msk [vmem:[%s4360_s12 + $0x50] sm:$0xff] %vm3634_vm5, %v3612_v16  ;;  %v3613_v58 = vadd.f32 %v6701_v32, %v3311_v22  ;;  %v6790_v32 = vrot.slane %v3431_v63, 1  ;;  %v3420_v15 = vunpack.c.h.bf16 %v6730_v27 }
 0x2aa   : > { %3643 = vst.msk [vmem:[%s4360_s12 + $0x40] sm:$0xff] %vm3634_vm5, %v3610_v62  ;;  %v3611_v12 = vadd.f32 %v3514_v60, %v3303_v56  ;;  %v3558_v51 = vrot.slane %v3435_v50, 1 }
 0x2ab   : > { %3646 = vst.msk [vmem:[%s4360_s12 + $0x58] sm:$0xff] %vm3634_vm5, %v3613_v58  ;;  %v6796_v13 = vsel %vm1573_vm3, %v3550_v10, %v6790_v32  ;;  %v3421_v58 = vunpack.c.l.bf16 %v6733_v44 }
 0x2ac   : > { %3644 = vst.msk [vmem:[%s4360_s12 + $0x48] sm:$0xff] %vm3634_vm5, %v3611_v12  ;;  %v6800_v34 = vsel %vm1573_vm3, %v6792_v52, %v3558_v51 }
 0x2ad   : > { %v3535_v12 = vrot.slane %v3421_v58, 1  ;;  %v3439_v58 = vunpack.c.l.bf16 %v6805_v57 }
 0x2e3   : > { %v4114_v61 = vpop.f32.mrb[48].mxu1 }
 0x2e4   : > { %v3324_v28 = vadd.f32 %v4114_v61, %v6628_v23  ;;  %v3315_v37 = vpop.f32.mrb[49].mxu1 }
 0x2e5   : > { %v3316_v7 = vadd.f32 %v6628_v23, %v3315_v37  ;;  %v4115_v48 = vpop.f32.mrb[50].mxu1 }
 0x2e6   : > { %v3616_v47 = vadd.f32 %v3527_v19, %v3324_v28  ;;  %v3327_v16 = vadd.f32 %v4115_v48, %v6628_v23  ;;  %v3318_v22 = vpop.f32.mrb[51].mxu1  ;;  %v3433_v28 = vunpack.c.l.bf16 %v6787_v36 }
 0x2e7   : > { %v3614_v60 = vadd.f32 %v6706_v39, %v3316_v7  ;;  %v3319_v62 = vadd.f32 %v6628_v23, %v3318_v22  ;;  %v3533_v39 = vrot.slane %v3420_v15, 1  ;;  %v3565_v15 = vrot.slane %v3439_v58, 1 }
 0x2e8   : > { %3649 = vst.msk [vmem:[%s4360_s12 + $0x70] sm:$0xff] %vm3634_vm5, %v3616_v47  ;;  %v3617_v45 = vadd.f32 %v6710_v41, %v3327_v16  ;;  %v3537_v41 = vsel %vm1573_vm3, %v3535_v12, %v6738_v38  ;;  %v3555_v37 = vrot.slane %v3433_v28, 1 }
 0x2e9   : > { %3647 = vst.msk [vmem:[%s4360_s12 + $0x60] sm:$0xff] %vm3634_vm5, %v3614_v60  ;;  %v3615_v56 = vadd.f32 %v3524_v26, %v3319_v62  ;;  %v3534_v27 = vsel %vm1573_vm3, %v6736_v25, %v3533_v39  ;;  %v3426_v25 = vunpack.c.h.bf16 %v6748_v11 }
 0x2ea   : > { %3650 = vst.msk [vmem:[%s4360_s12 + $0x78] sm:$0xff] %vm3634_vm5, %v3617_v45  ;;  %v3557_v48 = vsel %vm1573_vm3, %v3555_v37, %v6792_v52 }
 0x2eb   : > { %3648 = vst.msk [vmem:[%s4360_s12 + $0x68] sm:$0xff] %vm3634_vm5, %v3615_v56 }
 0x30a   : > { %v4118_v29 = vpop.f32.mrb[52].mxu1 }
 0x30b   : > { %v3340_v63 = vadd.f32 %v4118_v29, %v6628_v23  ;;  %v3331_v20 = vpop.f32.mrb[53].mxu1 }
 0x30c   : > { %v3332_v50 = vadd.f32 %v6628_v23, %v3331_v20  ;;  %v4119_v9 = vpop.f32.mrb[54].mxu1 }
 0x30d   : > { %v3620_v10 = vadd.f32 %v3537_v41, %v3340_v63  ;;  %v3343_v44 = vadd.f32 %v4119_v9, %v6628_v23  ;;  %v3334_v51 = vpop.f32.mrb[55].mxu1 }
 0x30e   : > { %v3618_v40 = vadd.f32 %v6742_v49, %v3332_v50  ;;  %v3335_v31 = vadd.f32 %v6628_v23, %v3334_v51  ;;  %v3543_v49 = vrot.slane %v3426_v25, 1 }
 0x30f   : > { %3653 = vst.msk [vmem:[%s4360_s12 + $0x90] sm:$0xff] %vm3634_vm5, %v3620_v10  ;;  %v3621_v38 = vadd.f32 %v6746_v59, %v3343_v44  ;;  %v3547_v59 = vsel %vm1573_vm3, %v3545_v21, %v6756_v8 }
 0x310   : > { %3651 = vst.msk [vmem:[%s4360_s12 + $0x80] sm:$0xff] %vm3634_vm5, %v3618_v40  ;;  %v3619_v42 = vadd.f32 %v3534_v27, %v3335_v31  ;;  %v3544_v11 = vsel %vm1573_vm3, %v6754_v55, %v3543_v49  ;;  %v3432_v55 = vunpack.c.h.bf16 %v6784_v30 }
 0x311   : > { %3654 = vst.msk [vmem:[%s4360_s12 + $0x98] sm:$0xff] %vm3634_vm5, %v3621_v38 }
 0x312   : > { %3652 = vst.msk [vmem:[%s4360_s12 + $0x88] sm:$0xff] %vm3634_vm5, %v3619_v42 }
 0x323   : > { %v4122_v33 = vpop.f32.mrb[56].mxu1 }
 0x324   : > { %v3356_v0 = vadd.f32 %v4122_v33, %v6628_v23  ;;  %v3347_v14 = vpop.f32.mrb[57].mxu1 }
 0x325   : > { %v3348_v2 = vadd.f32 %v6628_v23, %v3347_v14  ;;  %v4123_v5 = vpop.f32.mrb[58].mxu1 }
 0x326   : > { %v3624_v17 = vadd.f32 %v3547_v59, %v3356_v0  ;;  %v3359_v4 = vadd.f32 %v4123_v5, %v6628_v23  ;;  %v3350_v6 = vpop.f32.mrb[59].mxu1 }
 0x327   : > { %v3622_v3 = vadd.f32 %v6760_v43, %v3348_v2  ;;  %v3351_v61 = vadd.f32 %v6628_v23, %v3350_v6  ;;  %v3553_v43 = vrot.slane %v3432_v55, 1 }
 0x328   : > { %3657 = vst.msk [vmem:[%s4360_s12 + $0xb0] sm:$0xff] %vm3634_vm5, %v3624_v17  ;;  %v3625_v8 = vadd.f32 %v6764_v54, %v3359_v4 }
 0x329   : > { %3655 = vst.msk [vmem:[%s4360_s12 + $0xa0] sm:$0xff] %vm3634_vm5, %v3622_v3  ;;  %v3623_v19 = vadd.f32 %v3544_v11, %v3351_v61  ;;  %v3554_v30 = vsel %vm1573_vm3, %v6790_v32, %v3553_v43  ;;  %v3438_v32 = vunpack.c.h.bf16 %v6802_v53 }
 0x32a   : > { %3658 = vst.msk [vmem:[%s4360_s12 + $0xb8] sm:$0xff] %vm3634_vm5, %v3625_v8 }
 0x32b   : > { %3656 = vst.msk [vmem:[%s4360_s12 + $0xa8] sm:$0xff] %vm3634_vm5, %v3623_v19 }
 0x340   : > { %v4126_v7 = vpop.f32.mrb[60].mxu1 }
 0x341   : > { %v3372_v54 = vadd.f32 %v4126_v7, %v6628_v23  ;;  %v3363_v47 = vpop.f32.mrb[61].mxu1 }
 0x342   : > { %v3364_v16 = vadd.f32 %v6628_v23, %v3363_v47  ;;  %v4127_v22 = vpop.f32.mrb[62].mxu1 }
 0x343   : > { %v3628_v26 = vadd.f32 %v3557_v48, %v3372_v54  ;;  %v3375_v36 = vadd.f32 %v4127_v22, %v6628_v23  ;;  %v3366_v60 = vpop.f32.mrb[63].mxu1 }
 0x344   : > { %v3626_v62 = vadd.f32 %v6796_v13, %v3364_v16  ;;  %v3367_v45 = vadd.f32 %v6628_v23, %v3366_v60  ;;  %v3563_v13 = vrot.slane %v3438_v32, 1 }
 0x345   : > { %3661 = vst.msk [vmem:[%s4360_s12 + $0xd0] sm:$0xff] %vm3634_vm5, %v3628_v26  ;;  %v3629_v52 = vadd.f32 %v6800_v34, %v3375_v36  ;;  %v3567_v34 = vsel %vm1573_vm3, %v3565_v15, %v6810_v46 }
 0x346   : > { %3659 = vst.msk [vmem:[%s4360_s12 + $0xc0] sm:$0xff] %vm3634_vm5, %v3626_v62  ;;  %v3627_v56 = vadd.f32 %v3554_v30, %v3367_v45  ;;  %v3564_v53 = vsel %vm1573_vm3, %v6808_v24, %v3563_v13 }
 0x347   : > { %3662 = vst.msk [vmem:[%s4360_s12 + $0xd8] sm:$0xff] %vm3634_vm5, %v3629_v52 }
 0x348   : > { %3660 = vst.msk [vmem:[%s4360_s12 + $0xc8] sm:$0xff] %vm3634_vm5, %v3627_v56 }
 0x34f   : > { %v4130_v12 = vpop.f32.mrb[64].mxu1 }
 0x350   : > { %v3388_v39 = vadd.f32 %v4130_v12, %v6628_v23  ;;  %v3379_v29 = vpop.f32.mrb[65].mxu1 }
 0x351   : > { %v3380_v57 = vadd.f32 %v6628_v23, %v3379_v29  ;;  %v4131_v41 = vpop.f32.mrb[66].mxu1 }
 0x352   : > { %v3632_v63 = vadd.f32 %v3567_v34, %v3388_v39  ;;  %v3391_v20 = vadd.f32 %v4131_v41, %v6628_v23  ;;  %v3382_v50 = vpop.f32.mrb[67].mxu1 }
 0x353   : > { %v3630_v9 = vadd.f32 %v6814_v18, %v3380_v57  ;;  %v3383_v10 = vadd.f32 %v6628_v23, %v3382_v50 }
 0x354   : > { %3665 = vst.msk [vmem:[%s4360_s12 + $0xf0] sm:$0xff] %vm3634_vm5, %v3632_v63  ;;  %v3633_v46 = vadd.f32 %v6818_v35, %v3391_v20 }
 0x355   : > { %3663 = vst.msk [vmem:[%s4360_s12 + $0xe0] sm:$0xff] %vm3634_vm5, %v3630_v9  ;;  %v3631_v44 = vadd.f32 %v3564_v53, %v3383_v10 }
 0x356   : > { %3666 = vst.msk [vmem:[%s4360_s12 + $0xf8] sm:$0xff] %vm3634_vm5, %v3633_v46 }
 0x357   : > { %3664 = vst.msk [vmem:[%s4360_s12 + $0xe8] sm:$0xff] %vm3634_vm5, %v3631_v44 }
 0x358 PF: > { %s17_s26 = sadd.s32 1, %s4287_s26   ;;  %s7442_s24 = smov %s4283_s25 }
 0x359   : > { %p14_p5 = scmp.ge.s32.totalorder %s17_s26, 4   ;;  %s7443_s25 = smov %s7445_s27 }
 0x35b   :  { %16 = sbr.rel (!%p14_p5) target bundleno = 2 (0x2), region = 170 }
 0x362   :  { %3699 = vsyncmov [#allocation3] }
 0x365   :  { %s3700_s30 = vpop.sfrf %3699 }
 0x366   :  { %p3897_p6 = scmp.ne.s32.totalorder %s3700_s30, 0 }
 0x368   :  { %3704 = shalt.err (%p3897_p6)  }
 0x369   :  { %3706 = vsyncmov [#allocation3 + $0x1] }
 0x36c   :  { %s3707_s8 = vpop.sfrf %3706 }
 0x36d   :  { %p3898_p7 = scmp.ne.s32.totalorder %s3707_s8, 0 }
 0x36f   :  { %3711 = shalt.err (%p3898_p7)  }

</bundles_post_ra>
